<compile_context>
chip_gen: v5e
topology: v5e:2x2
jax: 0.10.0
libtpu: 0.0.40
codegen_flags: <defaults>
</compile_context>

<pallas_src>
import functools

import jax
import jax.numpy as jnp
from jax.experimental import pallas as pl
from jax.experimental.pallas import tpu as pltpu

LN_EPS = 1e-5
# q @ k^T style contraction (contract last dim of both operands).
TRANS_B_DIMS = (((1,), (1,)), ((), ()))


def _tpu_generation():
    """Best-effort TPU generation detection (5 / 6 / 7, 0 if unknown)."""
    try:
        kind = jax.devices()[0].device_kind.lower()
    except Exception:  # pragma: no cover - no device available
        return 0
    for g in (7, 6, 5):
        if f"v{g}" in kind:
            return g
    return 0


# ----------------------------------------------------------------------------
# Fused transformer-block kernel (batch_per_step batch elements per grid step)
# ----------------------------------------------------------------------------
def _make_block_kernel(*, num_heads, din, exp_bf16, has_bias):
    f32, bf16 = jnp.float32, jnp.bfloat16

    def kernel(*refs):
        if has_bias:
            (x_ref, maskf_ref, bias_ref,
             g1_ref, b1_ref, wqkv_ref, wproj_ref, bproj_ref,
             g2_ref, b2_ref, w1_ref, bm1_ref, w2_ref, bm2_ref, o_ref) = refs
        else:
            bias_ref = None
            (x_ref, maskf_ref,
             g1_ref, b1_ref, wqkv_ref, wproj_ref, bproj_ref,
             g2_ref, b2_ref, w1_ref, bm1_ref, w2_ref, bm2_ref, o_ref) = refs

        x = x_ref[...].astype(f32)                    # (bp*N, dim)

        # ---- LayerNorm1 (f32 VPU math, biased variance, eps=1e-5) ----
        mu = jnp.mean(x, axis=-1, keepdims=True)
        var = jnp.mean((x - mu) ** 2, axis=-1, keepdims=True)
        xn = (x - mu) * jax.lax.rsqrt(var + LN_EPS) * g1_ref[...] + b1_ref[...]

        # ---- fused qkv projection (scale pre-baked into q columns) ----
        qkv = jnp.dot(xn.astype(bf16), wqkv_ref[...], preferred_element_type=f32)
        q = qkv[:, :din]                              # (bp*N, din)
        k = qkv[:, din:2 * din]
        v = qkv[:, 2 * din:3 * din]

        maskf = maskf_ref[...]                        # (H*bp*N, din) bf16 0/1

        def replicate(z):                             # (bp*N, din) -> (H*bp*N, din)
            z16 = z.astype(bf16)
            rep = jnp.broadcast_to(z16[None], (num_heads,) + z16.shape)
            return rep.reshape(num_heads * z16.shape[0], din)

        # zero out other heads' feature columns (h-major row order)
        k_blk = replicate(k) * maskf
        v_blk = replicate(v) * maskf

        # scores: lane-dense (bp*N, H*bp*N); head-h column block of the row's
        # own batch holds q_h @ k_h^T (scale already folded into W_qkv).
        s = jax.lax.dot_general(q.astype(bf16), k_blk, TRANS_B_DIMS,
                                preferred_element_type=f32)
        if has_bias:
            s = s + bias_ref[...]                     # -1e30 on cross-batch entries
        # Global per-row max: constant within each head's chunk so each head's
        # softmax is unchanged; denom is guarded below against head underflow.
        s = s - jnp.max(s, axis=-1, keepdims=True)
        if exp_bf16:
            e16 = jnp.exp(s.astype(bf16))             # bf16 EUP (v6e/v7x)
        else:
            e16 = jnp.exp(s).astype(bf16)             # f32 EUP (v5e / unknown)

        # Fused PV + denominator: one (bp*N, rows) x (rows, 2*din=128) matmul.
        vm = jnp.concatenate([v_blk, maskf], axis=-1)
        cd = jnp.dot(e16, vm, preferred_element_type=f32)       # (bp*N, 2*din)
        ctx = cd[:, :din]
        denom = jnp.maximum(cd[:, din:], 1e-30)       # NaN-guard for dead heads
        ctx = ctx * pl.reciprocal(denom, approx=True)            # EUP slot

        proj = jnp.dot(ctx.astype(bf16), wproj_ref[...],
                       preferred_element_type=f32) + bproj_ref[...]
        x2 = v + proj            # sr_ratio == 1 branch: residual add of raw v

        # ---- LayerNorm2 + MLP (ReLU) + residual, still resident in VMEM ----
        mu2 = jnp.mean(x2, axis=-1, keepdims=True)
        var2 = jnp.mean((x2 - mu2) ** 2, axis=-1, keepdims=True)
        xn2 = (x2 - mu2) * jax.lax.rsqrt(var2 + LN_EPS) * g2_ref[...] + b2_ref[...]
        h = jnp.dot(xn2.astype(bf16), w1_ref[...],
                    preferred_element_type=f32) + bm1_ref[...]
        h = jnp.maximum(h, 0.0)
        y = jnp.dot(h.astype(bf16), w2_ref[...],
                    preferred_element_type=f32) + bm2_ref[...]

        o_ref[...] = (x2 + y).astype(o_ref.dtype)

    return kernel


# ----------------------------------------------------------------------------
# One-time parameter / mask preparation (no per-call casts or iotas)
# ----------------------------------------------------------------------------
def prepare_block_params(params, *, num_heads, n_tok, batch_per_step):
    bf16, f32 = jnp.bfloat16, jnp.float32
    din = params["wqkv"].shape[1] // 3
    hd = din // num_heads
    scale = hd ** (-0.5)

    # Bake the attention scale into the q-columns of W_qkv (exact in f32).
    wqkv = params["wqkv"].astype(f32)
    wqkv = wqkv.at[:, :din].multiply(scale)

    rows = num_heads * batch_per_step * n_tok         # h-major row ordering
    head_of_row = jnp.arange(rows) // (batch_per_step * n_tok)
    head_of_col = jnp.arange(din) // hd
    maskf = (head_of_row[:, None] == head_of_col[None, :]).astype(bf16)

    prep = {
        "norm1_g": params["norm1_g"].reshape(1, -1).astype(f32),
        "norm1_b": params["norm1_b"].reshape(1, -1).astype(f32),
        "wqkv": wqkv.astype(bf16),
        "wproj": params["wproj"].astype(bf16),
        "bproj": params["bproj"].reshape(1, -1).astype(f32),
        "norm2_g": params["norm2_g"].reshape(1, -1).astype(f32),
        "norm2_b": params["norm2_b"].reshape(1, -1).astype(f32),
        "mlp_w1": params["mlp_w1"].astype(bf16),
        "mlp_b1": params["mlp_b1"].reshape(1, -1).astype(f32),
        "mlp_w2": params["mlp_w2"].astype(bf16),
        "mlp_b2": params["mlp_b2"].reshape(1, -1).astype(f32),
        "maskf": maskf,
    }
    if batch_per_step > 1:
        q_batch = jnp.arange(batch_per_step * n_tok) // n_tok
        kv_batch = (jnp.arange(rows) % (batch_per_step * n_tok)) // n_tok
        prep["batch_bias"] = jnp.where(
            q_batch[:, None] == kv_batch[None, :], 0.0, -1e30).astype(bf16)
    return prep


# ----------------------------------------------------------------------------
# Wrapper
# ----------------------------------------------------------------------------
def transformer_block_forward(x, prep, *, num_heads, batch_per_step, exp_bf16):
    """x: (B, N, dim) -> (B, N, in_dim). Whole transformer block, one pallas_call."""
    B, N, dim = x.shape
    din3 = prep["wqkv"].shape[1]
    din = din3 // 3
    hidden = prep["mlp_w1"].shape[1]
    bp = batch_per_step
    grid_steps = B // bp
    has_bias = bp > 1
    rows = num_heads * bp * N

    kernel = _make_block_kernel(num_heads=num_heads, din=din,
                                exp_bf16=exp_bf16, has_bias=has_bias)

    x2d = x.reshape(B * N, dim)

    in_specs = [
        pl.BlockSpec((bp * N, dim), lambda i: (i, 0)),           # x (flattened batch)
        pl.BlockSpec((rows, din), lambda i: (0, 0)),             # head mask (bf16)
    ]
    inputs = [x2d, prep["maskf"]]
    if has_bias:
        in_specs.append(pl.BlockSpec((bp * N, rows), lambda i: (0, 0)))
        inputs.append(prep["batch_bias"])                        # cross-batch bias
    in_specs += [
        pl.BlockSpec((1, dim), lambda i: (0, 0)),                # norm1 gamma
        pl.BlockSpec((1, dim), lambda i: (0, 0)),                # norm1 beta
        pl.BlockSpec((dim, din3), lambda i: (0, 0)),             # W_qkv (bf16, q pre-scaled)
        pl.BlockSpec((din, din), lambda i: (0, 0)),              # W_proj (bf16)
        pl.BlockSpec((1, din), lambda i: (0, 0)),                # b_proj
        pl.BlockSpec((1, din), lambda i: (0, 0)),                # norm2 gamma
        pl.BlockSpec((1, din), lambda i: (0, 0)),                # norm2 beta
        pl.BlockSpec((din, hidden), lambda i: (0, 0)),           # W_fc1 (bf16)
        pl.BlockSpec((1, hidden), lambda i: (0, 0)),             # b_fc1
        pl.BlockSpec((hidden, din), lambda i: (0, 0)),           # W_fc2 (bf16)
        pl.BlockSpec((1, din), lambda i: (0, 0)),                # b_fc2
    ]
    inputs += [prep["norm1_g"], prep["norm1_b"], prep["wqkv"], prep["wproj"],
               prep["bproj"], prep["norm2_g"], prep["norm2_b"],
               prep["mlp_w1"], prep["mlp_b1"], prep["mlp_w2"], prep["mlp_b2"]]

    out2d = pl.pallas_call(
        kernel,
        out_shape=jax.ShapeDtypeStruct((B * N, din), x.dtype),
        grid=(grid_steps,),
        in_specs=in_specs,
        out_specs=pl.BlockSpec((bp * N, din), lambda i: (i, 0)),
        compiler_params=pltpu.CompilerParams(dimension_semantics=("parallel",)),
    )(*inputs)
    return out2d.reshape(B, N, din)


# ----------------------------------------------------------------------------
# Pure-JAX f32 reference (mirrors the PyTorch module exactly)
# ----------------------------------------------------------------------------
def reference_block(x, params, num_heads):
    def ln(z, g, b):
        m = jnp.mean(z, axis=-1, keepdims=True)
        v = jnp.mean((z - m) ** 2, axis=-1, keepdims=True)
        return (z - m) * jax.lax.rsqrt(v + LN_EPS) * g + b

    B, N, _ = x.shape
    din = params["wqkv"].shape[1] // 3
    hd = din // num_heads

    xn = ln(x, params["norm1_g"], params["norm1_b"])
    qkv = xn @ params["wqkv"]                                       # (B, N, 3*din)
    qkv = qkv.reshape(B, N, 3, num_heads, hd).transpose(2, 0, 3, 1, 4)
    q, k, v = qkv[0], qkv[1], qkv[2]                                # (B, H, N, hd)
    attn = (q @ jnp.swapaxes(k, -1, -2)) * (hd ** (-0.5))
    attn = jax.nn.softmax(attn, axis=-1)
    ctx = (attn @ v).transpose(0, 2, 1, 3).reshape(B, N, din)
    proj = ctx @ params["wproj"] + params["bproj"]
    v2 = v.transpose(0, 2, 1, 3).reshape(B, N, din)
    x2 = v2 + proj                                                  # sr_ratio == 1
    xn2 = ln(x2, params["norm2_g"], params["norm2_b"])
    h = jnp.maximum(xn2 @ params["mlp_w1"] + params["mlp_b1"], 0.0)
    y = h @ params["mlp_w2"] + params["mlp_b2"]
    return x2 + y


# ----------------------------------------------------------------------------
# Deterministic parameter initialization (float32 masters)
# ----------------------------------------------------------------------------
def init_params(key, dim, in_dim, num_heads, mlp_ratio):
    hidden = int(in_dim * mlp_ratio)

    def lin(k, fi, fo):
        kw, kb = jax.random.split(k)
        return (0.02 * jax.random.normal(kw, (fi, fo), jnp.float32),
                0.02 * jax.random.normal(kb, (fo,), jnp.float32))

    def norm(k, d):
        kg, kb = jax.random.split(k)
        return (1.0 + 0.1 * jax.random.normal(kg, (d,), jnp.float32),
                0.1 * jax.random.normal(kb, (d,), jnp.float32))

    ks = jax.random.split(key, 6)
    n1g, n1b = norm(ks[0], dim)
    wqkv, _ = lin(ks[1], dim, 3 * in_dim)          # qkv_bias=False
    wproj, bproj = lin(ks[2], in_dim, in_dim)
    n2g, n2b = norm(ks[3], in_dim)
    w1, b1 = lin(ks[4], in_dim, hidden)
    w2, b2 = lin(ks[5], hidden, in_dim)
    return {"norm1_g": n1g, "norm1_b": n1b,
            "wqkv": wqkv, "wproj": wproj, "bproj": bproj,
            "norm2_g": n2g, "norm2_b": n2b,
            "mlp_w1": w1, "mlp_b1": b1, "mlp_w2": w2, "mlp_b2": b2}


# ----------------------------------------------------------------------------
# main
# ----------------------------------------------------------------------------
if __name__ == "__main__":
    # transformer_bloack(dim=32, in_dim=64, num_heads=4, mlp_ratio=1.0)
    B, N = 2, 64                 # N = 8x8 tokens
    dim, in_dim, num_heads, mlp_ratio = 32, 64, 4, 1.0

    key = jax.random.PRNGKey(0)
    kx, kp = jax.random.split(key)
    x = jax.random.normal(kx, (B, N, dim), jnp.float32)
    params = init_params(kp, dim, in_dim, num_heads, mlp_ratio)

    gen = _tpu_generation()
    # v7x (2 TCs/chip): keep >= 2 parallel grid steps so both cores get work.
    # v5e/v6e (1 TC) or unknown: fold the whole batch into one grid step.
    batch_per_step = 1 if gen >= 7 else B
    exp_bf16 = gen in (6, 7)     # bf16 EUP only on v6e/v7x; v5e stays f32

    prep = prepare_block_params(params, num_heads=num_heads, n_tok=N,
                                batch_per_step=batch_per_step)
    fwd = jax.jit(functools.partial(transformer_block_forward,
                                    num_heads=num_heads,
                                    batch_per_step=batch_per_step,
                                    exp_bf16=exp_bf16))
    out = fwd(x, prep)
    jax.block_until_ready(out)

    assert out.shape == (B, N, in_dim), out.shape
    assert bool(jnp.all(jnp.isfinite(out)))

    ref = reference_block(x, params, num_heads)
    max_err = float(jnp.max(jnp.abs(out - ref)))
    # bf16 matmul operands (+ bf16 exp on v6e/v7x) + approx reciprocal vs f32 ref.
    assert max_err < 2e-2, f"max abs err {max_err}"

    print("KERNEL_OK")
</pallas_src>

<mosaic_0001>
module attributes {stable_mosaic.version = 11 : i64} {
  func.func @kernel(%arg0: i32, %arg1: memref<128x32xf32, #tpu.memory_space<vmem>>, %arg2: memref<512x64xbf16, #tpu.memory_space<vmem>>, %arg3: memref<128x512xbf16, #tpu.memory_space<vmem>>, %arg4: memref<1x32xf32, #tpu.memory_space<vmem>>, %arg5: memref<1x32xf32, #tpu.memory_space<vmem>>, %arg6: memref<32x192xbf16, #tpu.memory_space<vmem>>, %arg7: memref<64x64xbf16, #tpu.memory_space<vmem>>, %arg8: memref<1x64xf32, #tpu.memory_space<vmem>>, %arg9: memref<1x64xf32, #tpu.memory_space<vmem>>, %arg10: memref<1x64xf32, #tpu.memory_space<vmem>>, %arg11: memref<64x64xbf16, #tpu.memory_space<vmem>>, %arg12: memref<1x64xf32, #tpu.memory_space<vmem>>, %arg13: memref<64x64xbf16, #tpu.memory_space<vmem>>, %arg14: memref<1x64xf32, #tpu.memory_space<vmem>>, %arg15: memref<128x64xf32, #tpu.memory_space<vmem>>) attributes {dimension_semantics = [#tpu.dimension_semantics<parallel>], iteration_bounds = array<i64: 1>, scalar_prefetch = 0 : i64, scratch_operands = 0 : i64, tpu.core_type = #tpu.core_type<tc>, window_params = [{transform_indices = @transform_0, window_bounds = array<i64: 128, 32>}, {pipeline_mode = #tpu.pipeline_mode<synchronous>, transform_indices = @transform_1, window_bounds = array<i64: 512, 64>}, {pipeline_mode = #tpu.pipeline_mode<synchronous>, transform_indices = @transform_2, window_bounds = array<i64: 128, 512>}, {pipeline_mode = #tpu.pipeline_mode<synchronous>, transform_indices = @transform_3, window_bounds = array<i64: 1, 32>}, {pipeline_mode = #tpu.pipeline_mode<synchronous>, transform_indices = @transform_4, window_bounds = array<i64: 1, 32>}, {pipeline_mode = #tpu.pipeline_mode<synchronous>, transform_indices = @transform_5, window_bounds = array<i64: 32, 192>}, {pipeline_mode = #tpu.pipeline_mode<synchronous>, transform_indices = @transform_6, window_bounds = array<i64: 64, 64>}, {pipeline_mode = #tpu.pipeline_mode<synchronous>, transform_indices = @transform_7, window_bounds = array<i64: 1, 64>}, {pipeline_mode = #tpu.pipeline_mode<synchronous>, transform_indices = @transform_8, window_bounds = array<i64: 1, 64>}, {pipeline_mode = #tpu.pipeline_mode<synchronous>, transform_indices = @transform_9, window_bounds = array<i64: 1, 64>}, {pipeline_mode = #tpu.pipeline_mode<synchronous>, transform_indices = @transform_10, window_bounds = array<i64: 64, 64>}, {pipeline_mode = #tpu.pipeline_mode<synchronous>, transform_indices = @transform_11, window_bounds = array<i64: 1, 64>}, {pipeline_mode = #tpu.pipeline_mode<synchronous>, transform_indices = @transform_12, window_bounds = array<i64: 64, 64>}, {pipeline_mode = #tpu.pipeline_mode<synchronous>, transform_indices = @transform_13, window_bounds = array<i64: 1, 64>}, {transform_indices = @transform_14, window_bounds = array<i64: 128, 64>}]} {
    %c0 = arith.constant 0 : index
    %c0_0 = arith.constant 0 : index
    %0 = vector.load %arg1[%c0, %c0_0] : memref<128x32xf32, #tpu.memory_space<vmem>>, vector<128x32xf32>
    %cst = arith.constant dense<0.000000e+00> : vector<128xf32>
    %1 = vector.multi_reduction <add>, %0, %cst [1] : vector<128x32xf32> to vector<128xf32>
    %2 = vector.shape_cast %1 : vector<128xf32> to vector<128x1xf32>
    %cst_1 = arith.constant 3.200000e+01 : f32
    %3 = vector.broadcast %cst_1 : f32 to vector<128x1xf32>
    %4 = arith.divf %2, %3 : vector<128x1xf32>
    %5 = vector.broadcast %4 : vector<128x1xf32> to vector<128x32xf32>
    %6 = arith.subf %0, %5 : vector<128x32xf32>
    %7 = arith.mulf %6, %6 : vector<128x32xf32>
    %cst_2 = arith.constant dense<0.000000e+00> : vector<128xf32>
    %8 = vector.multi_reduction <add>, %7, %cst_2 [1] : vector<128x32xf32> to vector<128xf32>
    %9 = vector.shape_cast %8 : vector<128xf32> to vector<128x1xf32>
    %cst_3 = arith.constant 3.200000e+01 : f32
    %10 = vector.broadcast %cst_3 : f32 to vector<128x1xf32>
    %11 = arith.divf %9, %10 : vector<128x1xf32>
    %12 = vector.broadcast %4 : vector<128x1xf32> to vector<128x32xf32>
    %13 = arith.subf %0, %12 : vector<128x32xf32>
    %cst_4 = arith.constant 9.99999974E-6 : f32
    %14 = vector.broadcast %cst_4 : f32 to vector<128x1xf32>
    %15 = arith.addf %11, %14 : vector<128x1xf32>
    %16 = math.rsqrt %15 : vector<128x1xf32>
    %17 = vector.broadcast %16 : vector<128x1xf32> to vector<128x32xf32>
    %18 = arith.mulf %13, %17 : vector<128x32xf32>
    %c0_5 = arith.constant 0 : index
    %c0_6 = arith.constant 0 : index
    %19 = vector.load %arg4[%c0_5, %c0_6] : memref<1x32xf32, #tpu.memory_space<vmem>>, vector<1x32xf32>
    %20 = vector.broadcast %19 : vector<1x32xf32> to vector<128x32xf32>
    %21 = arith.mulf %18, %20 : vector<128x32xf32>
    %c0_7 = arith.constant 0 : index
    %c0_8 = arith.constant 0 : index
    %22 = vector.load %arg5[%c0_7, %c0_8] : memref<1x32xf32, #tpu.memory_space<vmem>>, vector<1x32xf32>
    %23 = vector.broadcast %22 : vector<1x32xf32> to vector<128x32xf32>
    %24 = arith.addf %21, %23 : vector<128x32xf32>
    %25 = arith.truncf %24 : vector<128x32xf32> to vector<128x32xbf16>
    %c0_9 = arith.constant 0 : index
    %c0_10 = arith.constant 0 : index
    %26 = vector.load %arg6[%c0_9, %c0_10] : memref<32x192xbf16, #tpu.memory_space<vmem>>, vector<32x192xbf16>
    %cst_11 = arith.constant dense<0.000000e+00> : vector<128x192xf32>
    %27 = tpu.matmul %25, %26, %cst_11 {dimension_numbers = #tpu.dot_dimension_numbers<[1], [0], [0], [1], [0, 0, 1, 1], [], []>} : vector<128x32xbf16>, vector<32x192xbf16>, vector<128x192xf32> -> vector<128x192xf32>
    %28 = vector.extract_strided_slice %27 {offsets = [0, 0], sizes = [128, 64], strides = [1, 1]} : vector<128x192xf32> to vector<128x64xf32>
    %29 = vector.extract_strided_slice %27 {offsets = [0, 64], sizes = [128, 64], strides = [1, 1]} : vector<128x192xf32> to vector<128x64xf32>
    %30 = vector.extract_strided_slice %27 {offsets = [0, 128], sizes = [128, 64], strides = [1, 1]} : vector<128x192xf32> to vector<128x64xf32>
    %c0_12 = arith.constant 0 : index
    %c0_13 = arith.constant 0 : index
    %31 = vector.load %arg2[%c0_12, %c0_13] : memref<512x64xbf16, #tpu.memory_space<vmem>>, vector<512x64xbf16>
    %32 = arith.truncf %29 : vector<128x64xf32> to vector<128x64xbf16>
    %33 = vector.shape_cast %32 : vector<128x64xbf16> to vector<1x128x64xbf16>
    %34 = vector.shape_cast %33 : vector<1x128x64xbf16> to vector<1x128x64xbf16>
    %35 = vector.broadcast %34 : vector<1x128x64xbf16> to vector<4x128x64xbf16>
    %36 = vector.shape_cast %35 : vector<4x128x64xbf16> to vector<512x64xbf16>
    %37 = arith.mulf %36, %31 : vector<512x64xbf16>
    %38 = arith.truncf %30 : vector<128x64xf32> to vector<128x64xbf16>
    %39 = vector.shape_cast %38 : vector<128x64xbf16> to vector<1x128x64xbf16>
    %40 = vector.shape_cast %39 : vector<1x128x64xbf16> to vector<1x128x64xbf16>
    %41 = vector.broadcast %40 : vector<1x128x64xbf16> to vector<4x128x64xbf16>
    %42 = vector.shape_cast %41 : vector<4x128x64xbf16> to vector<512x64xbf16>
    %43 = arith.mulf %42, %31 : vector<512x64xbf16>
    %44 = arith.truncf %28 : vector<128x64xf32> to vector<128x64xbf16>
    %cst_14 = arith.constant dense<0.000000e+00> : vector<128x512xf32>
    %45 = tpu.matmul %44, %37, %cst_14 {dimension_numbers = #tpu.dot_dimension_numbers<[1], [1], [0], [0], [0, 0, 1, 0], [], []>} : vector<128x64xbf16>, vector<512x64xbf16>, vector<128x512xf32> -> vector<128x512xf32>
    %c0_15 = arith.constant 0 : index
    %c0_16 = arith.constant 0 : index
    %46 = vector.load %arg3[%c0_15, %c0_16] : memref<128x512xbf16, #tpu.memory_space<vmem>>, vector<128x512xbf16>
    %47 = arith.extf %46 : vector<128x512xbf16> to vector<128x512xf32>
    %48 = arith.addf %45, %47 : vector<128x512xf32>
    %cst_17 = arith.constant dense<0xFF800000> : vector<128xf32>
    %49 = vector.multi_reduction <maximumf>, %48, %cst_17 [1] : vector<128x512xf32> to vector<128xf32>
    %50 = vector.shape_cast %49 : vector<128xf32> to vector<128x1xf32>
    %51 = vector.broadcast %50 : vector<128x1xf32> to vector<128x512xf32>
    %52 = arith.subf %48, %51 : vector<128x512xf32>
    %53 = math.exp %52 : vector<128x512xf32>
    %54 = arith.truncf %53 : vector<128x512xf32> to vector<128x512xbf16>
    %55 = tpu.concatenate %43, %31 in 1 : vector<512x64xbf16>, vector<512x64xbf16> -> vector<512x128xbf16>
    %cst_18 = arith.constant dense<0.000000e+00> : vector<128x128xf32>
    %56 = tpu.matmul %54, %55, %cst_18 {dimension_numbers = #tpu.dot_dimension_numbers<[1], [0], [0], [1], [0, 0, 1, 1], [], []>} : vector<128x512xbf16>, vector<512x128xbf16>, vector<128x128xf32> -> vector<128x128xf32>
    %57 = vector.extract_strided_slice %56 {offsets = [0, 0], sizes = [128, 64], strides = [1, 1]} : vector<128x128xf32> to vector<128x64xf32>
    %58 = vector.extract_strided_slice %56 {offsets = [0, 64], sizes = [128, 64], strides = [1, 1]} : vector<128x128xf32> to vector<128x64xf32>
    %cst_19 = arith.constant 1.000000e-30 : f32
    %59 = vector.broadcast %cst_19 : f32 to vector<128x64xf32>
    %60 = arith.maximumf %58, %59 : vector<128x64xf32>
    %61 = tpu.reciprocal %60 {approx = true} : vector<128x64xf32> -> vector<128x64xf32>
    %62 = arith.mulf %57, %61 : vector<128x64xf32>
    %63 = arith.truncf %62 : vector<128x64xf32> to vector<128x64xbf16>
    %c0_20 = arith.constant 0 : index
    %c0_21 = arith.constant 0 : index
    %64 = vector.load %arg7[%c0_20, %c0_21] : memref<64x64xbf16, #tpu.memory_space<vmem>>, vector<64x64xbf16>
    %cst_22 = arith.constant dense<0.000000e+00> : vector<128x64xf32>
    %65 = tpu.matmul %63, %64, %cst_22 {dimension_numbers = #tpu.dot_dimension_numbers<[1], [0], [0], [1], [0, 0, 1, 1], [], []>} : vector<128x64xbf16>, vector<64x64xbf16>, vector<128x64xf32> -> vector<128x64xf32>
    %c0_23 = arith.constant 0 : index
    %c0_24 = arith.constant 0 : index
    %66 = vector.load %arg8[%c0_23, %c0_24] : memref<1x64xf32, #tpu.memory_space<vmem>>, vector<1x64xf32>
    %67 = vector.broadcast %66 : vector<1x64xf32> to vector<128x64xf32>
    %68 = arith.addf %65, %67 : vector<128x64xf32>
    %69 = arith.addf %30, %68 : vector<128x64xf32>
    %cst_25 = arith.constant dense<0.000000e+00> : vector<128xf32>
    %70 = vector.multi_reduction <add>, %69, %cst_25 [1] : vector<128x64xf32> to vector<128xf32>
    %71 = vector.shape_cast %70 : vector<128xf32> to vector<128x1xf32>
    %cst_26 = arith.constant 6.400000e+01 : f32
    %72 = vector.broadcast %cst_26 : f32 to vector<128x1xf32>
    %73 = arith.divf %71, %72 : vector<128x1xf32>
    %74 = vector.broadcast %73 : vector<128x1xf32> to vector<128x64xf32>
    %75 = arith.subf %69, %74 : vector<128x64xf32>
    %76 = arith.mulf %75, %75 : vector<128x64xf32>
    %cst_27 = arith.constant dense<0.000000e+00> : vector<128xf32>
    %77 = vector.multi_reduction <add>, %76, %cst_27 [1] : vector<128x64xf32> to vector<128xf32>
    %78 = vector.shape_cast %77 : vector<128xf32> to vector<128x1xf32>
    %cst_28 = arith.constant 6.400000e+01 : f32
    %79 = vector.broadcast %cst_28 : f32 to vector<128x1xf32>
    %80 = arith.divf %78, %79 : vector<128x1xf32>
    %81 = vector.broadcast %73 : vector<128x1xf32> to vector<128x64xf32>
    %82 = arith.subf %69, %81 : vector<128x64xf32>
    %cst_29 = arith.constant 9.99999974E-6 : f32
    %83 = vector.broadcast %cst_29 : f32 to vector<128x1xf32>
    %84 = arith.addf %80, %83 : vector<128x1xf32>
    %85 = math.rsqrt %84 : vector<128x1xf32>
    %86 = vector.broadcast %85 : vector<128x1xf32> to vector<128x64xf32>
    %87 = arith.mulf %82, %86 : vector<128x64xf32>
    %c0_30 = arith.constant 0 : index
    %c0_31 = arith.constant 0 : index
    %88 = vector.load %arg9[%c0_30, %c0_31] : memref<1x64xf32, #tpu.memory_space<vmem>>, vector<1x64xf32>
    %89 = vector.broadcast %88 : vector<1x64xf32> to vector<128x64xf32>
    %90 = arith.mulf %87, %89 : vector<128x64xf32>
    %c0_32 = arith.constant 0 : index
    %c0_33 = arith.constant 0 : index
    %91 = vector.load %arg10[%c0_32, %c0_33] : memref<1x64xf32, #tpu.memory_space<vmem>>, vector<1x64xf32>
    %92 = vector.broadcast %91 : vector<1x64xf32> to vector<128x64xf32>
    %93 = arith.addf %90, %92 : vector<128x64xf32>
    %94 = arith.truncf %93 : vector<128x64xf32> to vector<128x64xbf16>
    %c0_34 = arith.constant 0 : index
    %c0_35 = arith.constant 0 : index
    %95 = vector.load %arg11[%c0_34, %c0_35] : memref<64x64xbf16, #tpu.memory_space<vmem>>, vector<64x64xbf16>
    %cst_36 = arith.constant dense<0.000000e+00> : vector<128x64xf32>
    %96 = tpu.matmul %94, %95, %cst_36 {dimension_numbers = #tpu.dot_dimension_numbers<[1], [0], [0], [1], [0, 0, 1, 1], [], []>} : vector<128x64xbf16>, vector<64x64xbf16>, vector<128x64xf32> -> vector<128x64xf32>
    %c0_37 = arith.constant 0 : index
    %c0_38 = arith.constant 0 : index
    %97 = vector.load %arg12[%c0_37, %c0_38] : memref<1x64xf32, #tpu.memory_space<vmem>>, vector<1x64xf32>
    %98 = vector.broadcast %97 : vector<1x64xf32> to vector<128x64xf32>
    %99 = arith.addf %96, %98 : vector<128x64xf32>
    %cst_39 = arith.constant 0.000000e+00 : f32
    %100 = vector.broadcast %cst_39 : f32 to vector<128x64xf32>
    %101 = arith.maximumf %99, %100 : vector<128x64xf32>
    %102 = arith.truncf %101 : vector<128x64xf32> to vector<128x64xbf16>
    %c0_40 = arith.constant 0 : index
    %c0_41 = arith.constant 0 : index
    %103 = vector.load %arg13[%c0_40, %c0_41] : memref<64x64xbf16, #tpu.memory_space<vmem>>, vector<64x64xbf16>
    %cst_42 = arith.constant dense<0.000000e+00> : vector<128x64xf32>
    %104 = tpu.matmul %102, %103, %cst_42 {dimension_numbers = #tpu.dot_dimension_numbers<[1], [0], [0], [1], [0, 0, 1, 1], [], []>} : vector<128x64xbf16>, vector<64x64xbf16>, vector<128x64xf32> -> vector<128x64xf32>
    %c0_43 = arith.constant 0 : index
    %c0_44 = arith.constant 0 : index
    %105 = vector.load %arg14[%c0_43, %c0_44] : memref<1x64xf32, #tpu.memory_space<vmem>>, vector<1x64xf32>
    %106 = vector.broadcast %105 : vector<1x64xf32> to vector<128x64xf32>
    %107 = arith.addf %104, %106 : vector<128x64xf32>
    %108 = arith.addf %69, %107 : vector<128x64xf32>
    %c0_45 = arith.constant 0 : index
    %c0_46 = arith.constant 0 : index
    %109 = vector.load %arg15[%c0_45, %c0_46] : memref<128x64xf32, #tpu.memory_space<vmem>>, vector<128x64xf32>
    tpu.vector_store %arg15[%c0_45, %c0_46], %108 {strides = array<i32>} : memref<128x64xf32, #tpu.memory_space<vmem>>, vector<128x64xf32>,
    return
  }
  func.func @transform_0(%arg0: i32) -> (i32, i32) {
    %c0_i32 = arith.constant 0 : i32
    %c0_i32_0 = arith.constant 0 : i32
    return %arg0, %c0_i32 : i32, i32
  }
  func.func @transform_1(%arg0: i32) -> (i32, i32) {
    %c0_i32 = arith.constant 0 : i32
    %c0_i32_0 = arith.constant 0 : i32
    %c0_i32_1 = arith.constant 0 : i32
    return %c0_i32, %c0_i32_0 : i32, i32
  }
  func.func @transform_2(%arg0: i32) -> (i32, i32) {
    %c0_i32 = arith.constant 0 : i32
    %c0_i32_0 = arith.constant 0 : i32
    %c0_i32_1 = arith.constant 0 : i32
    return %c0_i32, %c0_i32_0 : i32, i32
  }
  func.func @transform_3(%arg0: i32) -> (i32, i32) {
    %c0_i32 = arith.constant 0 : i32
    %c0_i32_0 = arith.constant 0 : i32
    %c0_i32_1 = arith.constant 0 : i32
    return %c0_i32, %c0_i32_0 : i32, i32
  }
  func.func @transform_4(%arg0: i32) -> (i32, i32) {
    %c0_i32 = arith.constant 0 : i32
    %c0_i32_0 = arith.constant 0 : i32
    %c0_i32_1 = arith.constant 0 : i32
    return %c0_i32, %c0_i32_0 : i32, i32
  }
  func.func @transform_5(%arg0: i32) -> (i32, i32) {
    %c0_i32 = arith.constant 0 : i32
    %c0_i32_0 = arith.constant 0 : i32
    %c0_i32_1 = arith.constant 0 : i32
    return %c0_i32, %c0_i32_0 : i32, i32
  }
  func.func @transform_6(%arg0: i32) -> (i32, i32) {
    %c0_i32 = arith.constant 0 : i32
    %c0_i32_0 = arith.constant 0 : i32
    %c0_i32_1 = arith.constant 0 : i32
    return %c0_i32, %c0_i32_0 : i32, i32
  }
  func.func @transform_7(%arg0: i32) -> (i32, i32) {
    %c0_i32 = arith.constant 0 : i32
    %c0_i32_0 = arith.constant 0 : i32
    %c0_i32_1 = arith.constant 0 : i32
    return %c0_i32, %c0_i32_0 : i32, i32
  }
  func.func @transform_8(%arg0: i32) -> (i32, i32) {
    %c0_i32 = arith.constant 0 : i32
    %c0_i32_0 = arith.constant 0 : i32
    %c0_i32_1 = arith.constant 0 : i32
    return %c0_i32, %c0_i32_0 : i32, i32
  }
  func.func @transform_9(%arg0: i32) -> (i32, i32) {
    %c0_i32 = arith.constant 0 : i32
    %c0_i32_0 = arith.constant 0 : i32
    %c0_i32_1 = arith.constant 0 : i32
    return %c0_i32, %c0_i32_0 : i32, i32
  }
  func.func @transform_10(%arg0: i32) -> (i32, i32) {
    %c0_i32 = arith.constant 0 : i32
    %c0_i32_0 = arith.constant 0 : i32
    %c0_i32_1 = arith.constant 0 : i32
    return %c0_i32, %c0_i32_0 : i32, i32
  }
  func.func @transform_11(%arg0: i32) -> (i32, i32) {
    %c0_i32 = arith.constant 0 : i32
    %c0_i32_0 = arith.constant 0 : i32
    %c0_i32_1 = arith.constant 0 : i32
    return %c0_i32, %c0_i32_0 : i32, i32
  }
  func.func @transform_12(%arg0: i32) -> (i32, i32) {
    %c0_i32 = arith.constant 0 : i32
    %c0_i32_0 = arith.constant 0 : i32
    %c0_i32_1 = arith.constant 0 : i32
    return %c0_i32, %c0_i32_0 : i32, i32
  }
  func.func @transform_13(%arg0: i32) -> (i32, i32) {
    %c0_i32 = arith.constant 0 : i32
    %c0_i32_0 = arith.constant 0 : i32
    %c0_i32_1 = arith.constant 0 : i32
    return %c0_i32, %c0_i32_0 : i32, i32
  }
  func.func @transform_14(%arg0: i32) -> (i32, i32) {
    %c0_i32 = arith.constant 0 : i32
    %c0_i32_0 = arith.constant 0 : i32
    return %arg0, %c0_i32 : i32, i32
  }
}

</mosaic_0001>

<bundles_post_ra>
// kernel: transformer_block_forward.1
= control target key start
LH: loop header
LB: loop body
LE: loop exit
PB: predicated region body
PF: predicated region fallthrough
CT: control target
= control target key end

     0   :  { %vm65_vm0 = vcmask 261120   ;;  %s7275_s0 = inlined_call_operand.vmem [shape: f32[128,32], index: 0, kind: input, shape index: {}]   ;;  %s7276_s1 = inlined_call_operand.vmem [shape: bf16[512,64], index: 1, kind: input, shape index: {}]   ;;  %s7277_s2 = inlined_call_operand.vmem [shape: bf16[128,512], index: 2, kind: input, shape index: {}]   ;;  %s7278_s3 = inlined_call_operand.vmem [shape: f32[1,32], index: 3, kind: input, shape index: {}]   ;;  %s7279_s4 = inlined_call_operand.vmem [shape: f32[1,32], index: 4, kind: input, shape index: {}]   ;;  %s7280_s5 = inlined_call_operand.vmem [shape: bf16[32,192], index: 5, kind: input, shape index: {}]   ;;  %s7281_s6 = inlined_call_operand.vmem [shape: bf16[64,64], index: 6, kind: input, shape index: {}]   ;;  %s7282_s7 = inlined_call_operand.vmem [shape: f32[1,64], index: 7, kind: input, shape index: {}]   ;;  %s7283_s8 = inlined_call_operand.vmem [shape: f32[1,64], index: 8, kind: input, shape index: {}]   ;;  %s7284_s9 = inlined_call_operand.vmem [shape: f32[1,64], index: 9, kind: input, shape index: {}]   ;;  %s7285_s10 = inlined_call_operand.vmem [shape: bf16[64,64], index: 10, kind: input, shape index: {}]   ;;  %s7286_s11 = inlined_call_operand.vmem [shape: f32[1,64], index: 11, kind: input, shape index: {}]   ;;  %s7287_s12 = inlined_call_operand.vmem [shape: bf16[64,64], index: 12, kind: input, shape index: {}]   ;;  %s7288_s13 = inlined_call_operand.vmem [shape: f32[1,64], index: 13, kind: input, shape index: {}]   ;;  %s7289_s14 = inlined_call_operand.hbm [shape: f32[128,64], index: 14, kind: output, shape index: {}]  }
   0x1   :  { %v57_v0 = vld [vmem:[%s7275_s0 + $0x40] sm:$0xff]  ;;  %v59_v4 = vld [vmem:[%s7275_s0 + $0x50] sm:$0xff]  ;;  %v58_v6 = vld [vmem:[%s7275_s0 + $0x48] sm:$0xff] }
   0x2   :  { %v4592_v1 = vld [vmem:[%s7275_s0] sm:$0xff]  ;;  %v90_v2 = vsel %vm65_vm0, %v57_v0, 0.0  ;;  %v96_v5 = vsel %vm65_vm0, %v59_v4, 0.0  ;;  %v50_v7 = vld [vmem:[%s7275_s0 + $0x8] sm:$0xff]  ;;  %v60_v8 = vld [vmem:[%s7275_s0 + $0x58] sm:$0xff] }
   0x3   :  { %v66_v3 = vsel %vm65_vm0, %v4592_v1, 0.0  ;;  %91 = vadd.xlane.f32.xlu0 %v90_v2  ;;  %97 = vadd.xlane.f32.xlu1 %v96_v5 }
   0x4   :  { %67 = vadd.xlane.f32.xlu2 %v66_v3 }
   0x5   :  { %19 = vsyncpa [#allocation3], 0  ;;  %v93_v9 = vsel %vm65_vm0, %v58_v6, 0.0  ;;  %v69_v10 = vsel %vm65_vm0, %v50_v7, 0.0  ;;  %v99_v11 = vsel %vm65_vm0, %v60_v8, 0.0  ;;  %v4616_v12 = vld [vmem:[%s7275_s0 + $0x60] sm:$0xff] }
   0x6   :  { %v4621_v13 = vld [vmem:[%s7275_s0 + $0x68] sm:$0xff]  ;;  %v102_v14 = vsel %vm65_vm0, %v4616_v12, 0.0  ;;  %v4630_v16 = vld [vmem:[%s7275_s0 + $0x10] sm:$0xff]  ;;  %v4637_v18 = vld [vmem:[%s7275_s0 + $0x78] sm:$0xff]  ;;  %v4505_v20 = vmov 32.0   ;;  %s4506_s26 = smov 64  }
   0x7   :  { %v105_v15 = vsel %vm65_vm0, %v4621_v13, 0.0  ;;  %v72_v17 = vsel %vm65_vm0, %v4630_v16, 0.0  ;;  %v111_v19 = vsel %vm65_vm0, %v4637_v18, 0.0  ;;  %4251 = vrcp.f32 %v4505_v20  ;;  %v4644_v21 = vld [vmem:[%s7275_s0 + $0x20] sm:$0xff]  ;;  %v4662_v41 = vld [vmem:[%s7275_s0 + $0x18] sm:$0xff]  ;;  %v4684_v53 = vld [vmem:[%s7275_s0 + $0x70] sm:$0xff] }
   0x8   :  { %v78_v22 = vsel %vm65_vm0, %v4644_v21, 0.0  ;;  %v75_v46 = vsel %vm65_vm0, %v4662_v41, 0.0  ;;  %v4689_v54 = vld [vmem:[%s7275_s0 + $0x30] sm:$0xff]  ;;  %v108_v56 = vsel %vm65_vm0, %v4684_v53, 0.0  ;;  %v4705_v63 = vld [vmem:[%s7275_s0 + $0x28] sm:$0xff] }
   0x9   :  { %v84_v58 = vsel %vm65_vm0, %v4689_v54, 0.0  ;;  %v81_v5 = vsel %vm65_vm0, %v4705_v63, 0.0 }
   0xb   :  { %94 = vadd.xlane.f32.xlu0 %v93_v9  ;;  %100 = vadd.xlane.f32.xlu1 %v99_v11 }
   0xc   :  { %70 = vadd.xlane.f32.xlu2 %v69_v10 }
   0xd   :  { %v4252_v23 = vpop.eup %4251 }
   0xe   :  { %v115_v24 = vmul.f32 32.0, %v4252_v23  ;;  %vm119_vm1 = vweird.f32 %v4252_v23 }
  0x10   :  { %v116_v25 = vsub.f32 1.0, %v115_v24 }
  0x12   :  { %v117_v26 = vmul.f32 %v4252_v23, %v116_v25 }
  0x13   :  { %103 = vadd.xlane.f32.xlu0 %v102_v14  ;;  %106 = vadd.xlane.f32.xlu1 %v105_v15  ;;  %v4732_v15 = vld [vmem:[%s7275_s0 + $0x38] sm:$0xff] }
  0x14   :  { %v118_v27 = vadd.f32 %v4252_v23, %v117_v26 }
  0x16   :  { %v4648_v28 = vsel %vm119_vm1, %v4252_v23, %v118_v27  ;;  %v3774_v27 = vld [vmem:[%s7280_s5 + $0x10] sm:$0xf] }
  0x1b   :  { %73 = vadd.xlane.f32.xlu1 %v72_v17 }
  0x23   :  { %112 = vadd.xlane.f32.xlu1 %v111_v19 }
  0x2b   :  { %79 = vadd.xlane.f32.xlu1 %v78_v22 }
  0x76   :  { %v92_v29 = vpop.xlane.xlu0 %91  ;;  %v98_v33 = vpop.xlane.xlu1 %97 }
  0x77   :  { %v68_v30 = vpop.xlane.xlu2 %67  ;;  %v129_v31 = vmul.f32 %v4648_v28, %v92_v29  ;;  %v131_v40 = vmul.f32 %v4648_v28, %v98_v33  ;;  %v4031_v29 = vld [vmem:[%s7280_s5 + $0x14] sm:$0xf0] }
  0x78   :  { %v121_v60 = vmul.f32 %v4648_v28, %v68_v30 }
  0x79   :  { %v4651_v32 = vsub.f32 %v57_v0, %v129_v31  ;;  %v4668_v44 = vsub.f32 %v59_v4, %v131_v40 }
  0x7a   :  { %v4708_v2 = vsub.f32 %v4592_v1, %v121_v60 }
  0x7b   :  { %v161_v34 = vmul.f32 %v4651_v32, %v4651_v32  ;;  %v163_v52 = vmul.f32 %v4668_v44, %v4668_v44 }
  0x7d   :  { %v193_v35 = vsel %vm65_vm0, %v161_v34, 0.0  ;;  %v199_v57 = vsel %vm65_vm0, %v163_v52, 0.0  ;;  %v3766_v34 = vld [vmem:[%s7280_s5] sm:$0xf] }
  0x7e   :  { %v95_v36 = vpop.xlane.xlu0 %94  ;;  %194 = vadd.xlane.f32.xlu2 %v193_v35  ;;  %v101_v48 = vpop.xlane.xlu1 %100  ;;  %v4029_v35 = vld [vmem:[%s7280_s5 + $0x4] sm:$0xf0] }
  0x7f   :  { %v71_v37 = vpop.xlane.xlu2 %70  ;;  %v130_v38 = vmul.f32 %v4648_v28, %v95_v36  ;;  %v132_v51 = vmul.f32 %v4648_v28, %v101_v48 }
  0x80   :  { %v122_v39 = vmul.f32 %v4648_v28, %v71_v37  ;;  %v3767_v37 = vor.u32 %v4029_v35, %v3766_v34 }
  0x81   :  { %v4664_v42 = vsub.f32 %v58_v6, %v130_v38  ;;  %v4691_v55 = vsub.f32 %v60_v8, %v132_v51  ;;  %v153_v8 = vmul.f32 %v4708_v2, %v4708_v2 }
  0x82   :  { %v4666_v43 = vsub.f32 %v50_v7, %v122_v39 }
  0x83   :  { %v162_v45 = vmul.f32 %v4664_v42, %v4664_v42  ;;  %v164_v61 = vmul.f32 %v4691_v55, %v4691_v55  ;;  %v169_v11 = vsel %vm65_vm0, %v153_v8, 0.0 }
  0x84   :  { %v154_v47 = vmul.f32 %v4666_v43, %v4666_v43 }
  0x85   :  { %v196_v49 = vsel %vm65_vm0, %v162_v45, 0.0  ;;  %v202_v3 = vsel %vm65_vm0, %v164_v61, 0.0 }
  0x86   :  { %v172_v50 = vsel %vm65_vm0, %v154_v47, 0.0  ;;  %197 = vadd.xlane.f32.xlu0 %v196_v49  ;;  %76 = vadd.xlane.f32.xlu2 %v75_v46  ;;  %v104_v59 = vpop.xlane.xlu0 %103  ;;  %v107_v0 = vpop.xlane.xlu1 %106 }
  0x87   :  { %173 = vadd.xlane.f32.xlu1 %v172_v50  ;;  %v133_v62 = vmul.f32 %v4648_v28, %v104_v59  ;;  %v134_v6 = vmul.f32 %v4648_v28, %v107_v0 }
  0x89   :  { %v4712_v4 = vsub.f32 %v4616_v12, %v133_v62  ;;  %v4722_v9 = vsub.f32 %v4621_v13, %v134_v6  ;;  %v87_v13 = vsel %vm65_vm0, %v4732_v15, 0.0 }
  0x8b   :  { %v165_v7 = vmul.f32 %v4712_v4, %v4712_v4  ;;  %v166_v14 = vmul.f32 %v4722_v9, %v4722_v9 }
  0x8d   :  { %v205_v10 = vsel %vm65_vm0, %v165_v7, 0.0  ;;  %v208_v19 = vsel %vm65_vm0, %v166_v14, 0.0 }
  0x8e   :  { %109 = vadd.xlane.f32.xlu0 %v108_v56  ;;  %200 = vadd.xlane.f32.xlu2 %v199_v57  ;;  %v74_v1 = vpop.xlane.xlu1 %73 }
  0x8f   :  { %85 = vadd.xlane.f32.xlu1 %v84_v58  ;;  %v123_v12 = vmul.f32 %v4648_v28, %v74_v1 }
  0x91   :  { %v4735_v17 = vsub.f32 %v4630_v16, %v123_v12 }
  0x93   :  { %v155_v23 = vmul.f32 %v4735_v17, %v4735_v17 }
  0x95   :  { %v175_v25 = vsel %vm65_vm0, %v155_v23, 0.0 }
  0x96   :  { %203 = vadd.xlane.f32.xlu0 %v202_v3  ;;  %82 = vadd.xlane.f32.xlu2 %v81_v5  ;;  %v113_v20 = vpop.xlane.xlu1 %112 }
  0x97   :  { %v136_v22 = vmul.f32 %v4648_v28, %v113_v20 }
  0x99   :  { %v4744_v24 = vsub.f32 %v4637_v18, %v136_v22  ;;  %v3775_v18 = vor.u32 %v4031_v29, %v3774_v27 }
  0x9b   :  { %v168_v16 = vmul.f32 %v4744_v24, %v4744_v24  ;;  %4076 = vmatpush.bf16.msra.mxu1 %v3775_v18  ;;  %527 = vmatpush.bf16.msra.mxu0 %v3775_v18 }
  0x9d   :  { %v214_v26 = vsel %vm65_vm0, %v168_v16, 0.0 }
  0x9e   :  { %206 = vadd.xlane.f32.xlu2 %v205_v10  ;;  %170 = vadd.xlane.f32.xlu0 %v169_v11  ;;  %v80_v30 = vpop.xlane.xlu1 %79 }
  0x9f   :  { %4077 = vmatpush.bf16.msra.mxu1 %v3767_v37  ;;  %528 = vmatpush.bf16.msra.mxu0 %v3767_v37  ;;  %v125_v40 = vmul.f32 %v4648_v28, %v80_v30 }
  0xa1   :  { %v4771_v56 = vsub.f32 %v4644_v21, %v125_v40 }
  0xa3   :  { %v157_v5 = vmul.f32 %v4771_v56, %v4771_v56 }
  0xa6   :  { %88 = vadd.xlane.f32.xlu2 %v87_v13  ;;  %209 = vadd.xlane.f32.xlu0 %v208_v19  ;;  %v181_v13 = vsel %vm65_vm0, %v157_v5, 0.0 }
  0xae   :  { %176 = vadd.xlane.f32.xlu0 %v175_v25 }
  0xb6   :  { %215 = vadd.xlane.f32.xlu0 %v214_v26 }
  0xf1   :  { %v195_v31 = vpop.xlane.xlu2 %194 }
  0xf2   :  { %v225_v33 = vmul.f32 %v195_v31, %v4648_v28 }
  0xf4   :  { %v241_v36 = vadd.f32 1e-05, %v225_v33 }
  0xf6   :  { %4253 = vrsqrt.f32 %v241_v36  ;;  %vm335_vm3 = vweird.f32 %v241_v36 }
  0xf9   :  { %v198_v38 = vpop.xlane.xlu0 %197  ;;  %v77_v39 = vpop.xlane.xlu2 %76 }
  0xfa   :  { %v226_v45 = vmul.f32 %v198_v38, %v4648_v28  ;;  %v174_v46 = vpop.xlane.xlu1 %173  ;;  %v124_v47 = vmul.f32 %v4648_v28, %v77_v39  ;;  %v4821_v38 = vld [vmem:[%s7278_s3] ss:$0 sm:$0xff] }
  0xfb   :  { %v218_v48 = vmul.f32 %v174_v46, %v4648_v28 }
  0xfc   :  { %v4254_v49 = vpop.eup %4253  ;;  %v242_v50 = vadd.f32 1e-05, %v226_v45  ;;  %v4768_v51 = vsub.f32 %v4662_v41, %v124_v47 }
  0xfd   :  { %v330_v52 = vmul.f32 %v4254_v49, %v241_v36  ;;  %v4773_v57 = vadd.f32 1e-05, %v218_v48  ;;  %vm336_vm2 = vweird.f32 %v4254_v49 }
  0xfe   :  { %4255 = vrsqrt.f32 %v242_v50  ;;  %v156_v58 = vmul.f32 %v4768_v51, %v4768_v51  ;;  %vm4800_vm4 = vmor %vm335_vm3, %vm336_vm2  ;;  %vm345_vm6 = vweird.f32 %v242_v50 }
  0xff   :  { %v331_v59 = vmul.f32 %v4254_v49, %v330_v52  ;;  %4257 = vrsqrt.f32 %v4773_v57  ;;  %v4840_v52 = vld [vmem:[%s7279_s4] ss:$0 sm:$0xff]  ;;  %vm265_vm13 = vweird.f32 %v4773_v57 }
 0x100   :  { %v178_v60 = vsel %vm65_vm0, %v156_v58, 0.0 }
 0x101   :  { %v332_v61 = vmul.f32 0.5, %v331_v59  ;;  %v110_v62 = vpop.xlane.xlu0 %109  ;;  %179 = vadd.xlane.f32.xlu1 %v178_v60  ;;  %v201_v0 = vpop.xlane.xlu2 %200 }
 0x102   :  { %v135_v41 = vmul.f32 %v4648_v28, %v110_v62  ;;  %v86_v3 = vpop.xlane.xlu1 %85  ;;  %v227_v21 = vmul.f32 %v201_v0, %v4648_v28 }
 0x103   :  { %v333_v6 = vsub.f32 1.5, %v332_v61  ;;  %v127_v7 = vmul.f32 %v4648_v28, %v86_v3 }
 0x104   :  { %v4256_v8 = vpop.eup %4255  ;;  %v4785_v1 = vsub.f32 %v4684_v53, %v135_v41  ;;  %v4787_v10 = vadd.f32 1e-05, %v227_v21 }
 0x105   :  { %v334_v11 = vmul.f32 %v4254_v49, %v333_v6  ;;  %v340_v12 = vmul.f32 %v4256_v8, %v242_v50  ;;  %v4790_v14 = vsub.f32 %v4689_v54, %v127_v7  ;;  %v4798_v22 = vpop.eup %4257  ;;  %vm346_vm5 = vweird.f32 %v4256_v8 }
 0x106   :  { %4259 = vrsqrt.f32 %v4787_v10  ;;  %v167_v20 = vmul.f32 %v4785_v1, %v4785_v1  ;;  %v260_v33 = vmul.f32 %v4798_v22, %v4773_v57  ;;  %vm347_vm7 = vmor %vm345_vm6, %vm346_vm5  ;;  %vm355_vm8 = vweird.f32 %v4787_v10 }
 0x107   :  { %v341_v19 = vmul.f32 %v4256_v8, %v340_v12  ;;  %v159_v53 = vmul.f32 %v4790_v14, %v4790_v14  ;;  %v338_v54 = vsel %vm4800_vm4, %v4254_v49, %v334_v11  ;;  %vm266_vm14 = vweird.f32 %v4798_v22 }
 0x108   :  { %v211_v26 = vsel %vm65_vm0, %v167_v20, 0.0  ;;  %v417_v37 = vmul.f32 %v338_v54, %v4651_v32  ;;  %v261_v46 = vmul.f32 %v4798_v22, %v260_v33  ;;  %v4873_v54 = vld [vmem:[%s7276_s1 + $0xb8] sm:$0xff]   ;;  %vm4897_vm1 = vmor %vm265_vm13, %vm266_vm14 }
 0x109   :  { %v342_v25 = vmul.f32 0.5, %v341_v19  ;;  %v204_v16 = vpop.xlane.xlu0 %203  ;;  %v187_v27 = vsel %vm65_vm0, %v159_v53, 0.0  ;;  %182 = vadd.xlane.f32.xlu1 %v181_v13  ;;  %v83_v29 = vpop.xlane.xlu2 %82  ;;  %212 = vadd.xlane.f32.xlu2 %v211_v26  ;;  %v7329_v33 = vunpack.c.h.bf16 %v4873_v54 }
 0x10a   :  { %v228_v30 = vmul.f32 %v204_v16, %v4648_v28  ;;  %188 = vadd.xlane.f32.xlu0 %v187_v27  ;;  %v126_v18 = vmul.f32 %v4648_v28, %v83_v29  ;;  %v437_v50 = vmul.f32 %v4821_v38, %v417_v37  ;;  %v262_v3 = vmul.f32 0.5, %v261_v46 }
 0x10b   :  { %v343_v31 = vsub.f32 1.5, %v342_v25 }
 0x10c   :  { %v4812_v34 = vpop.eup %4259  ;;  %v244_v35 = vadd.f32 1e-05, %v228_v30  ;;  %v4815_v36 = vsub.f32 %v4705_v63, %v126_v18  ;;  %v4830_v63 = vld [vmem:[%s7276_s1 + $0x78] sm:$0xff]   ;;  %v263_v53 = vsub.f32 1.5, %v262_v3 }
 0x10d   :  { %v344_v39 = vmul.f32 %v4256_v8, %v343_v31  ;;  %v350_v40 = vmul.f32 %v4812_v34, %v4787_v10  ;;  %v7338_v61 = vunpack.c.l.bf16 %v4830_v63  ;;  %vm356_vm9 = vweird.f32 %v4812_v34 }
 0x10e   :  { %4261 = vrsqrt.f32 %v244_v35  ;;  %v158_v45 = vmul.f32 %v4815_v36, %v4815_v36  ;;  %vm4856_vm10 = vmor %vm355_vm8, %vm356_vm9  ;;  %vm365_vm11 = vweird.f32 %v244_v35  ;;  %v7328_v31 = vunpack.c.l.bf16 %v4873_v54 }
 0x10f   :  { %v348_v32 = vsel %vm347_vm7, %v4256_v8, %v344_v39  ;;  %v351_v47 = vmul.f32 %v4812_v34, %v350_v40  ;;  %v457_v8 = vadd.f32 %v4840_v52, %v437_v50 }
 0x110   :  { %v184_v48 = vsel %vm65_vm0, %v158_v45, 0.0  ;;  %v418_v49 = vmul.f32 %v348_v32, %v4664_v42  ;;  %v7339_v42 = vunpack.c.h.bf16 %v4830_v63  ;;  %v4104_v50 = vpack.i.bf16 %v7329_v33, %v7328_v31 }
 0x111   :  { %v352_v58 = vmul.f32 0.5, %v351_v47  ;;  %v171_v59 = vpop.xlane.xlu0 %170  ;;  %v207_v60 = vpop.xlane.xlu2 %206  ;;  %185 = vadd.xlane.f32.xlu2 %v184_v48 }
 0x112   :  { %v217_v62 = vmul.f32 %v171_v59, %v4648_v28  ;;  %v229_v0 = vmul.f32 %v207_v60, %v4648_v28  ;;  %v438_v41 = vmul.f32 %v4821_v38, %v418_v49  ;;  %v4089_v23 = vpack.i.bf16 %v7339_v42, %v7338_v61 }
 0x113   :  { %v353_v21 = vsub.f32 1.5, %v352_v58  ;;  %v4917_v58 = vld [vmem:[%s7276_s1 + $0x38] sm:$0xff]  }
 0x114   :  { %v4262_v5 = vpop.eup %4261  ;;  %v4849_v6 = vadd.f32 1e-05, %v217_v62  ;;  %v4851_v7 = vadd.f32 1e-05, %v229_v0  ;;  %v458_v11 = vadd.f32 %v4840_v52, %v438_v41 }
 0x115   :  { %v354_v12 = vmul.f32 %v4812_v34, %v353_v21  ;;  %v360_v13 = vmul.f32 %v4262_v5, %v244_v35  ;;  %vm366_vm12 = vweird.f32 %v4262_v5 }
 0x116   :  { %4263 = vrsqrt.f32 %v4849_v6  ;;  %v4861_v10 = vpack.c.bf16 %v458_v11, %v457_v8  ;;  %vm4885_vm15 = vmor %vm365_vm11, %vm366_vm12  ;;  %vm255_vm2 = vweird.f32 %v4849_v6  ;;  %v7332_v8 = vunpack.c.l.bf16 %v4917_v58 }
 0x117   :  { %v361_v20 = vmul.f32 %v4262_v5, %v360_v13  ;;  %4265 = vrsqrt.f32 %v4851_v7  ;;  %v358_v25 = vsel %vm4856_vm10, %v4812_v34, %v354_v12  ;;  %v264_v34 = vmul.f32 %v4798_v22, %v263_v53 }
 0x118   :  { %3784 = vmatmul.msk.bf16.vlgmr.msra.gmra.mxu1 %vm65_vm0, %v4861_v10  ;;  %v419_v40 = vmul.f32 %v358_v25, %v4668_v44  ;;  %vm375_vm4 = vweird.f32 %v4851_v7 }
 0x119   :  { %v362_v16 = vmul.f32 0.5, %v361_v20  ;;  %v210_v26 = vpop.xlane.xlu0 %209  ;;  %v89_v27 = vpop.xlane.xlu2 %88  ;;  %v268_v59 = vsel %vm4897_vm1, %v4798_v22, %v264_v34  ;;  %v4931_v22 = vld [vmem:[%s7276_s1 + $0x68] sm:$0xff]   ;;  %v4964_v34 = vld [vmem:[%s7276_s1 + $0x70] sm:$0xff]  }
 0x11a   :  { %v230_v29 = vmul.f32 %v210_v26, %v4648_v28  ;;  %v128_v30 = vmul.f32 %v4648_v28, %v89_v27  ;;  %v439_v0 = vmul.f32 %v4821_v38, %v419_v40  ;;  %v410_v53 = vmul.f32 %v268_v59, %v4666_v43 }
 0x11b   :  { %v363_v18 = vsub.f32 1.5, %v362_v16  ;;  %v7312_v16 = vunpack.c.l.bf16 %v4931_v22 }
 0x11c   :  { %v4264_v37 = vpop.eup %4263  ;;  %v4889_v39 = vadd.f32 1e-05, %v230_v29  ;;  %v4892_v57 = vsub.f32 %v4732_v15, %v128_v30  ;;  %v459_v19 = vadd.f32 %v4840_v52, %v439_v0  ;;  %v7313_v29 = vunpack.c.h.bf16 %v4931_v22 }
 0x11d   :  { %v4895_v45 = vpop.eup %4265  ;;  %v364_v46 = vmul.f32 %v4262_v5, %v363_v18  ;;  %v250_v47 = vmul.f32 %v4264_v37, %v4849_v6  ;;  %vm256_vm3 = vweird.f32 %v4264_v37  ;;  %v430_v40 = vmul.f32 %v4821_v38, %v410_v53 }
 0x11e   :  { %v370_v48 = vmul.f32 %v4895_v45, %v4851_v7  ;;  %4267 = vrsqrt.f32 %v4889_v39  ;;  %4090 = vrot.lane.b32.xlu0 %v4089_v23, %s4506_s26  ;;  %v160_v49 = vmul.f32 %v4892_v57, %v4892_v57  ;;  %vm376_vm5 = vweird.f32 %v4895_v45  ;;  %vm4937_vm6 = vmor %vm255_vm2, %vm256_vm3 }
 0x11f   :  { %v368_v44 = vsel %vm4885_vm15, %v4262_v5, %v364_v46  ;;  %v251_v15 = vmul.f32 %v4264_v37, %v250_v47  ;;  %vm4947_vm7 = vmor %vm375_vm4, %vm376_vm5  ;;  %vm385_vm8 = vweird.f32 %v4889_v39 }
 0x120   :  { %v371_v60 = vmul.f32 %v4895_v45, %v370_v48  ;;  %v420_v62 = vmul.f32 %v368_v44, %v4691_v55  ;;  %v190_v3 = vsel %vm65_vm0, %v160_v49, 0.0  ;;  %v7335_v55 = vunpack.c.h.bf16 %v4917_v58 }
 0x121   :  { %v252_v41 = vmul.f32 0.5, %v251_v15  ;;  %191 = vadd.xlane.f32.xlu1 %v190_v3  ;;  %v7331_v48 = vunpack.c.h.bf16 %v4964_v34  ;;  %v450_v15 = vadd.f32 %v4840_v52, %v430_v40  ;;  %v5002_v3 = vld [vmem:[%s7276_s1 + $0xf8] sm:$0xff]  }
 0x122   :  { %v372_v21 = vmul.f32 0.5, %v371_v60  ;;  %v440_v5 = vmul.f32 %v4821_v38, %v420_v62  ;;  %v4084_v43 = vpack.i.bf16 %v7335_v55, %v7332_v8  ;;  %v7318_v12 = vunpack.c.l.bf16 %v5002_v3 }
 0x123   :  { %v253_v11 = vsub.f32 1.5, %v252_v41 }
 0x124   :  { %v4268_v6 = vpop.eup %4267  ;;  %v373_v13 = vsub.f32 1.5, %v372_v21  ;;  %v460_v20 = vadd.f32 %v4840_v52, %v440_v5  ;;  %v5011_v5 = vld [vmem:[%s7276_s1 + $0x30] sm:$0xff]  }
 0x125   :  { %v254_v23 = vmul.f32 %v4264_v37, %v253_v11  ;;  %v380_v25 = vmul.f32 %v4268_v6, %v4889_v39  ;;  %vm386_vm9 = vweird.f32 %v4268_v6 }
 0x126   :  { %v374_v7 = vmul.f32 %v4895_v45, %v373_v13  ;;  %4105 = vrot.lane.b32.xlu0 %v4104_v50, %s4506_s26  ;;  %v4952_v27 = vpack.c.bf16 %v460_v20, %v459_v19  ;;  %vm387_vm10 = vmor %vm385_vm8, %vm386_vm9  ;;  %v7316_v13 = vunpack.c.l.bf16 %v5011_v5  ;;  %v7317_v19 = vunpack.c.h.bf16 %v5011_v5  ;;  %v5026_v20 = vld [vmem:[%s7276_s1 + $0xe8] sm:$0xff]  }
 0x127   :  { %v258_v30 = vsel %vm4937_vm6, %v4264_v37, %v254_v23  ;;  %v381_v18 = vmul.f32 %v4268_v6, %v380_v25  ;;  %v4119_v37 = vpack.i.bf16 %v7313_v29, %v7312_v16  ;;  %7441 = vst [vmem:[#allocation5_spill] sm:$0xff] %v5026_v20  ;;  %v7293_v26 = vunpack.c.h.bf16 %v5026_v20 }
 0x128   :  { %3785 = vmatmul.msk.bf16.gmra.mxu1 %vm65_vm0, %v4952_v27  ;;  %v409_v35 = vmul.f32 %v258_v30, %v4708_v2  ;;  %v378_v32 = vsel %vm4947_vm7, %v4895_v45, %v374_v7  ;;  %v7330_v2 = vunpack.c.l.bf16 %v4964_v34  ;;  %v4985_v45 = vld [vmem:[%s7276_s1 + $0x20] sm:$0xff]   ;;  %v7292_v7 = vunpack.c.l.bf16 %v5026_v20 }
 0x129   :  { %v382_v46 = vmul.f32 0.5, %v381_v18  ;;  %4085 = vrot.lane.b32.xlu2 %v4084_v43, %s4506_s26  ;;  %v421_v49 = vmul.f32 %v378_v32, %v4712_v4  ;;  %v7298_v60 = vunpack.c.l.bf16 %v4985_v45  ;;  %v7303_v62 = vunpack.c.h.bf16 %v4985_v45  ;;  %v5046_v18 = vld [vmem:[%s7276_s1 + $0xb0] sm:$0xff]  }
 0x12a   :  { %v429_v47 = vmul.f32 %v4821_v38, %v409_v35  ;;  %v4099_v0 = vpack.i.bf16 %v7331_v48, %v7330_v2  ;;  %v4094_v30 = vpack.i.bf16 %v7317_v19, %v7316_v13  ;;  %v5053_v35 = vld [vmem:[%s7276_s1 + $0x28] sm:$0xff]   ;;  %v4149_v40 = vpack.i.bf16 %v7293_v26, %v7292_v7 }
 0x12b   :  { %v383_v44 = vsub.f32 1.5, %v382_v46  ;;  %v441_v21 = vmul.f32 %v4821_v38, %v421_v49  ;;  %v4134_v11 = vpack.i.bf16 %v7303_v62, %v7298_v60  ;;  %v7324_v32 = vunpack.c.l.bf16 %v5046_v18  ;;  %v5156_v60 = vld [vmem:[%s7276_s1 + $0xe0] sm:$0xff]  }
 0x12c   :  { %v449_v39 = vadd.f32 %v4840_v52, %v429_v47  ;;  %v7325_v46 = vunpack.c.h.bf16 %v5046_v18  ;;  %v7315_v47 = vunpack.c.h.bf16 %v5053_v35  ;;  %7448 = vst [vmem:[#allocation12_spill] sm:$0xff] %v5156_v60 }
 0x12d   :  { %v384_v50 = vmul.f32 %v4268_v6, %v383_v44  ;;  %v461_v53 = vadd.f32 %v4840_v52, %v441_v21  ;;  %v5068_v44 = vld [vmem:[%s7276_s1 + $0xa0] sm:$0xff]  }
 0x12e   :  { %4120 = vrot.lane.b32.xlu0 %v4119_v37, %s4506_s26  ;;  %v4991_v59 = vpack.c.bf16 %v450_v15, %v449_v39  ;;  %v7314_v37 = vunpack.c.l.bf16 %v5053_v35  ;;  %7442 = vst [vmem:[#allocation6_spill] sm:$0xff] %v5068_v44  ;;  %v7290_v39 = vunpack.c.l.bf16 %v5068_v44  ;;  %v7291_v15 = vunpack.c.h.bf16 %v5068_v44 }
 0x12f   :  { %v388_v41 = vsel %vm387_vm10, %v4268_v6, %v384_v50  ;;  %v4124_v49 = vpack.i.bf16 %v7325_v46, %v7324_v32 }
 0x130   :  { %3780 = vmatmul.msk.bf16.vlgmr.msra.gmra.mxu0 %vm65_vm0, %v4991_v59  ;;  %v422_v4 = vmul.f32 %v388_v41, %v4722_v9  ;;  %v7323_v9 = vunpack.c.h.bf16 %v5002_v3  ;;  %v4114_v50 = vpack.i.bf16 %v7315_v47, %v7314_v37  ;;  %v5089_v41 = vld [vmem:[%s7276_s1 + $0xf0] sm:$0xff]   ;;  %v5212_v37 = vld [vmem:[%s7276_s1 + $0x80] sm:$0xff]  }
 0x131   :  { %4100 = vrot.lane.b32.xlu2 %v4099_v0, %s4506_s26  ;;  %v5084_v0 = vld [vmem:[%s7276_s1 + $0x60] sm:$0xff]   ;;  %7443 = vst [vmem:[#allocation7_spill] sm:$0xff] %v5089_v41  ;;  %v7346_v47 = vunpack.c.h.bf16 %v5212_v37 }
 0x132   :  { %v442_v6 = vmul.f32 %v4821_v38, %v422_v4  ;;  %v4109_v43 = vpack.i.bf16 %v7323_v9, %v7318_v12  ;;  %v4164_v4 = vpack.i.bf16 %v7291_v15, %v7290_v39  ;;  %v7304_v21 = vunpack.c.l.bf16 %v5084_v0  ;;  %v5234_v12 = vld [vmem:[%s7276_s1 + $0xd8] sm:$0xff]  }
 0x133   :  { %v7340_v9 = vunpack.c.h.bf16 %v5234_v12 }
 0x134   :  { %v462_v23 = vadd.f32 %v4840_v52, %v442_v6  ;;  %v7294_v6 = vunpack.c.l.bf16 %v5089_v41 }
 0x136   :  { %4135 = vrot.lane.b32.xlu0 %v4134_v11, %s4506_s26  ;;  %v5031_v25 = vpack.c.bf16 %v462_v23, %v461_v53  ;;  %v7307_v11 = vunpack.c.h.bf16 %v5084_v0  ;;  %v7295_v53 = vunpack.c.h.bf16 %v5089_v41  ;;  %v5104_v23 = vld [vmem:[%s7276_s1 + $0x50] sm:$0xff]  }
 0x137   :  { %7444 = vst [vmem:[#allocation8_spill] sm:$0xff] %v5104_v23 }
 0x138   :  { %3786 = vmatmul.msk.bf16.gmra.mxu1 %vm65_vm0, %v5031_v25 }
 0x139   :  { %4110 = vrot.lane.b32.xlu2 %v4109_v43, %s4506_s26  ;;  %v7296_v43 = vunpack.c.l.bf16 %v5104_v23 }
 0x13a   :  { %4095 = vrot.lane.b32.xlu1 %v4094_v30, %s4506_s26  ;;  %v7297_v30 = vunpack.c.h.bf16 %v5104_v23 }
 0x13c   :  { %v4179_v39 = vpack.i.bf16 %v7297_v30, %v7296_v43 }
 0x13e   :  { %4150 = vrot.lane.b32.xlu0 %v4149_v40, %s4506_s26  ;;  %v4139_v40 = vpack.i.bf16 %v7307_v11, %v7304_v21  ;;  %v5176_v21 = vld [vmem:[%s7276_s1 + $0x88] sm:$0xff]   ;;  %v5192_v11 = vld [vmem:[%s7276_s1 + $0x98] sm:$0xff]  }
 0x13f   :  { %7450 = vst [vmem:[#allocation14_spill] sm:$0xff] %v5192_v11 }
 0x141   :  { %4125 = vrot.lane.b32.xlu2 %v4124_v49, %s4506_s26  ;;  %v4129_v49 = vpack.i.bf16 %v7295_v53, %v7294_v6  ;;  %v5140_v53 = vld [vmem:[%s7276_s1 + $0x48] sm:$0xff]  }
 0x142   :  { %4115 = vrot.lane.b32.xlu1 %v4114_v50, %s4506_s26  ;;  %v5120_v50 = vld [vmem:[%s7276_s1 + $0x18] sm:$0xff]   ;;  %7447 = vst [vmem:[#allocation11_spill] sm:$0xff] %v5140_v53  ;;  %v7305_v43 = vunpack.c.l.bf16 %v5140_v53 }
 0x143   :  { %7445 = vst [vmem:[#allocation9_spill] sm:$0xff] %v5120_v50  ;;  %v7299_v15 = vunpack.c.l.bf16 %v5120_v50  ;;  %v7300_v7 = vunpack.c.h.bf16 %v5120_v50 }
 0x146   :  { %4165 = vrot.lane.b32.xlu0 %v4164_v4, %s4506_s26  ;;  %v5125_v4 = vld [vmem:[%s7276_s1 + $0xa8] sm:$0xff]  }
 0x147   :  { %7446 = vst [vmem:[#allocation10_spill] sm:$0xff] %v5125_v4  ;;  %v7301_v26 = vunpack.c.l.bf16 %v5125_v4  ;;  %v7302_v6 = vunpack.c.h.bf16 %v5125_v4 }
 0x149   :  { %4140 = vrot.lane.b32.xlu2 %v4139_v40, %s4506_s26  ;;  %v7306_v40 = vunpack.c.h.bf16 %v5140_v53  ;;  %v4144_v30 = vpack.i.bf16 %v7302_v6, %v7301_v26  ;;  %v7309_v26 = vunpack.c.h.bf16 %v5156_v60 }
 0x14a   :  { %4130 = vrot.lane.b32.xlu1 %v4129_v49, %s4506_s26  ;;  %v4154_v49 = vpack.i.bf16 %v7300_v7, %v7299_v15  ;;  %v7308_v7 = vunpack.c.l.bf16 %v5156_v60 }
 0x14b   :  { %v4199_v15 = vpack.i.bf16 %v7306_v40, %v7305_v43  ;;  %v7345_v43 = vunpack.c.l.bf16 %v5176_v21 }
 0x14e   :  { %4180 = vrot.lane.b32.xlu0 %v4179_v39, %s4506_s26  ;;  %v5161_v39 = vld [vmem:[%s7276_s1 + $0x58] sm:$0xff]  }
 0x14f   :  { %7449 = vst [vmem:[#allocation13_spill] sm:$0xff] %v5161_v39  ;;  %v7310_v6 = vunpack.c.l.bf16 %v5161_v39  ;;  %v7311_v62 = vunpack.c.h.bf16 %v5161_v39 }
 0x151   :  { %4155 = vrot.lane.b32.xlu2 %v4154_v49, %s4506_s26  ;;  %v7344_v49 = vunpack.c.h.bf16 %v5176_v21  ;;  %v4159_v40 = vpack.i.bf16 %v7311_v62, %v7310_v6  ;;  %v7320_v6 = vunpack.c.h.bf16 %v5192_v11  ;;  %v177_v62 = vpop.xlane.xlu0 %176 }
 0x152   :  { %4145 = vrot.lane.b32.xlu1 %v4144_v30, %s4506_s26  ;;  %v4169_v30 = vpack.i.bf16 %v7309_v26, %v7308_v7  ;;  %v7319_v26 = vunpack.c.l.bf16 %v5192_v11  ;;  %v219_v13 = vmul.f32 %v177_v62, %v4648_v28 }
 0x153   :  { %v4224_v7 = vpack.i.bf16 %v7344_v49, %v7345_v43 }
 0x156   :  { %4200 = vrot.lane.b32.xlu0 %v4199_v15, %s4506_s26  ;;  %v5197_v15 = vld [vmem:[%s7276_s1 + $0x10] sm:$0xff]  }
 0x157   :  { %7451 = vst [vmem:[#allocation15_spill] sm:$0xff] %v5197_v15  ;;  %v7321_v16 = vunpack.c.l.bf16 %v5197_v15  ;;  %v7322_v29 = vunpack.c.h.bf16 %v5197_v15 }
 0x159   :  { %4170 = vrot.lane.b32.xlu2 %v4169_v30, %s4506_s26  ;;  %v7347_v30 = vunpack.c.l.bf16 %v5212_v37  ;;  %v4174_v19 = vpack.i.bf16 %v7322_v29, %v7321_v16  ;;  %v235_v16 = vadd.f32 1e-05, %v219_v13  ;;  %v7341_v29 = vunpack.c.l.bf16 %v5234_v12  ;;  %v216_v32 = vpop.xlane.xlu0 %215 }
 0x15a   :  { %4160 = vrot.lane.b32.xlu1 %v4159_v40, %s4506_s26  ;;  %v4184_v40 = vpack.i.bf16 %v7320_v6, %v7319_v26 }
 0x15b   :  { %v4234_v62 = vpack.i.bf16 %v7346_v47, %v7347_v30  ;;  %4269 = vrsqrt.f32 %v235_v16  ;;  %v4189_v13 = vpack.i.bf16 %v7340_v9, %v7341_v29  ;;  %vm275_vm11 = vweird.f32 %v235_v16 }
 0x15e   :  { %4225 = vrot.lane.b32.xlu0 %v4224_v7, %s4506_s26  ;;  %v5229_v7 = vld [vmem:[%s7276_s1 + $0x90] sm:$0xff]  }
 0x15f   :  { %7452 = vst [vmem:[#allocation16_spill] sm:$0xff] %v5229_v7  ;;  %v7326_v26 = vunpack.c.l.bf16 %v5229_v7  ;;  %v7327_v6 = vunpack.c.h.bf16 %v5229_v7 }
 0x161   :  { %4185 = vrot.lane.b32.xlu2 %v4184_v40, %s4506_s26  ;;  %v4204_v46 = vpack.i.bf16 %v7327_v6, %v7326_v26  ;;  %v232_v40 = vmul.f32 %v216_v32, %v4648_v28  ;;  %v4270_v32 = vpop.eup %4269 }
 0x162   :  { %4175 = vrot.lane.b32.xlu1 %v4174_v19, %s4506_s26  ;;  %v5258_v19 = vld [vmem:[%s7276_s1] sm:$0xff]   ;;  %v270_v8 = vmul.f32 %v4270_v32, %v235_v16  ;;  %vm276_vm12 = vweird.f32 %v4270_v32 }
 0x163   :  { %7453 = vst [vmem:[#allocation17_spill] sm:$0xff] %v5258_v19  ;;  %v7333_v26 = vunpack.c.l.bf16 %v5258_v19  ;;  %v7334_v6 = vunpack.c.h.bf16 %v5258_v19  ;;  %v5272_v2 = vadd.f32 1e-05, %v232_v40  ;;  %vm5321_vm13 = vmor %vm275_vm11, %vm276_vm12 }
 0x165   :  { %v4214_v48 = vpack.i.bf16 %v7334_v6, %v7333_v26  ;;  %4271 = vrsqrt.f32 %v5272_v2  ;;  %v271_v6 = vmul.f32 %v4270_v32, %v270_v8  ;;  %vm405_vm1 = vweird.f32 %v5272_v2 }
 0x166   :  { %4235 = vrot.lane.b32.xlu0 %v4234_v62, %s4506_s26  ;;  %v5264_v62 = vld [vmem:[%s7276_s1 + $0x8] sm:$0xff]  }
 0x167   :  { %7454 = vst [vmem:[#allocation18_spill] sm:$0xff] %v5264_v62  ;;  %v7336_v31 = vunpack.c.l.bf16 %v5264_v62  ;;  %v7337_v33 = vunpack.c.h.bf16 %v5264_v62  ;;  %v272_v9 = vmul.f32 0.5, %v271_v6 }
 0x169   :  { %4205 = vrot.lane.b32.xlu2 %v4204_v46, %s4506_s26  ;;  %v4194_v46 = vpack.i.bf16 %v7337_v33, %v7336_v31 }
 0x16a   :  { %4190 = vrot.lane.b32.xlu1 %v4189_v13, %s4506_s26  ;;  %v5286_v13 = vld [vmem:[%s7276_s1 + $0xd0] sm:$0xff]  }
 0x16b   :  { %v7343_v40 = vunpack.c.l.bf16 %v5286_v13  ;;  %v7342_v26 = vunpack.c.h.bf16 %v5286_v13  ;;  %v5293_v33 = vpop.eup %4271 }
 0x16c   :  { %v400_v8 = vmul.f32 %v5293_v33, %v5272_v2  ;;  %vm406_vm2 = vweird.f32 %v5293_v33  ;;  %v4028_v2 = vld [vmem:[%s7280_s5 + $0x4] sm:$0xf] }
 0x16d   :  { %v4209_v42 = vpack.i.bf16 %v7342_v26, %v7343_v40  ;;  %vm5358_vm4 = vmor %vm405_vm1, %vm406_vm2 }
 0x16e   :  { %v401_v26 = vmul.f32 %v5293_v33, %v400_v8 }
 0x170   :  { %v402_v16 = vmul.f32 0.5, %v401_v26  ;;  %v3776_v26 = vld [vmem:[%s7280_s5 + $0x18] sm:$0xf0] }
 0x171   :  { %4215 = vrot.lane.b32.xlu2 %v4214_v48, %s4506_s26  ;;  %v5302_v48 = vld [vmem:[%s7276_s1 + $0x40] sm:$0xff]  }
 0x172   :  { %4195 = vrot.lane.b32.xlu1 %v4194_v46, %s4506_s26  ;;  %7455 = vst [vmem:[#allocation19_spill] sm:$0xff] %v5302_v48  ;;  %v273_v46 = vsub.f32 1.5, %v272_v9 }
 0x174   :  { %v180_v55 = vpop.xlane.xlu1 %179  ;;  %v274_v7 = vmul.f32 %v4270_v32, %v273_v46 }
 0x175   :  { %v220_v31 = vmul.f32 %v180_v55, %v4648_v28  ;;  %v7352_v55 = vunpack.c.l.bf16 %v5302_v48 }
 0x177   :  { %v236_v61 = vadd.f32 1e-05, %v220_v31  ;;  %v7353_v31 = vunpack.c.h.bf16 %v5302_v48 }
 0x179   :  { %4273 = vrsqrt.f32 %v236_v61  ;;  %v4219_v9 = vpack.i.bf16 %v7353_v31, %v7352_v55  ;;  %vm285_vm14 = vweird.f32 %v236_v61 }
 0x17a   :  { %4210 = vrot.lane.b32.xlu1 %v4209_v42, %s4506_s26 }
 0x17c   :  { %v183_v29 = vpop.xlane.xlu1 %182  ;;  %v213_v49 = vpop.xlane.xlu2 %212 }
 0x17d   :  { %v189_v6 = vpop.xlane.xlu0 %188  ;;  %v221_v40 = vmul.f32 %v183_v29, %v4648_v28  ;;  %v231_v43 = vmul.f32 %v213_v49, %v4648_v28 }
 0x17e   :  { %v223_v30 = vmul.f32 %v189_v6, %v4648_v28 }
 0x17f   :  { %v4274_v47 = vpop.eup %4273  ;;  %v5313_v42 = vadd.f32 1e-05, %v221_v40  ;;  %v5319_v19 = vadd.f32 1e-05, %v231_v43  ;;  %v278_v40 = vsel %vm5321_vm13, %v4270_v32, %v274_v7  ;;  %v4030_v43 = vld [vmem:[%s7280_s5 + $0x14] sm:$0xf] }
 0x180   :  { %v280_v8 = vmul.f32 %v4274_v47, %v236_v61  ;;  %v5326_v6 = vadd.f32 1e-05, %v223_v30  ;;  %vm286_vm15 = vweird.f32 %v4274_v47  ;;  %v403_v30 = vsub.f32 1.5, %v402_v16 }
 0x181   :  { %4275 = vrsqrt.f32 %v5313_v42  ;;  %v3779_v55 = vor.u32 %v4030_v43, %v3776_v26  ;;  %vm5343_vm3 = vmor %vm285_vm14, %vm286_vm15  ;;  %v411_v7 = vmul.f32 %v278_v40, %v4735_v17  ;;  %vm295_vm6 = vweird.f32 %v5313_v42 }
 0x182   :  { %v281_v49 = vmul.f32 %v4274_v47, %v280_v8  ;;  %4277 = vrsqrt.f32 %v5319_v19  ;;  %4220 = vrot.lane.b32.xlu1 %v4219_v9, %s4506_s26  ;;  %v404_v43 = vmul.f32 %v5293_v33, %v403_v30  ;;  %vm395_vm8 = vweird.f32 %v5319_v19 }
 0x183   :  { %576 = vmatpush.bf16.msrb.mxu1 %v3779_v55  ;;  %4279 = vrsqrt.f32 %v5326_v6  ;;  %vm315_vm14 = vweird.f32 %v5326_v6 }
 0x184   :  { %v282_v46 = vmul.f32 0.5, %v281_v49  ;;  %v186_v8 = vpop.xlane.xlu2 %185  ;;  %v3768_v49 = vld [vmem:[%s7280_s5 + $0x8] sm:$0xf0] }
 0x185   :  { %v222_v9 = vmul.f32 %v186_v8, %v4648_v28  ;;  %v3771_v17 = vor.u32 %v4028_v2, %v3768_v49  ;;  %v408_v2 = vsel %vm5358_vm4, %v5293_v33, %v404_v43 }
 0x186   :  { %v283_v31 = vsub.f32 1.5, %v282_v46 }
 0x187   :  { %v5339_v48 = vpop.eup %4275  ;;  %v238_v16 = vadd.f32 1e-05, %v222_v9  ;;  %v431_v9 = vmul.f32 %v4821_v38, %v411_v7  ;;  %577 = vmatpush.bf16.msrb.mxu1 %v3771_v17 }
 0x188   :  { %v284_v32 = vmul.f32 %v4274_v47, %v283_v31  ;;  %v290_v29 = vmul.f32 %v5339_v48, %v5313_v42  ;;  %v4278_v46 = vpop.eup %4277  ;;  %vm296_vm7 = vweird.f32 %v5339_v48 }
 0x189   :  { %v390_v26 = vmul.f32 %v4278_v46, %v5319_v19  ;;  %4281 = vrsqrt.f32 %v238_v16  ;;  %v5374_v61 = vpop.eup %4279  ;;  %v451_v60 = vadd.f32 %v4840_v52, %v431_v9  ;;  %vm396_vm5 = vweird.f32 %v4278_v46  ;;  %vm5391_vm10 = vmor %vm295_vm6, %vm296_vm7 }
 0x18a   :  { %v288_v31 = vsel %vm5343_vm3, %v4274_v47, %v284_v32  ;;  %v291_v40 = vmul.f32 %v5339_v48, %v290_v29  ;;  %v310_v33 = vmul.f32 %v5374_v61, %v5326_v6  ;;  %vm397_vm9 = vmor %vm395_vm8, %vm396_vm5  ;;  %vm305_vm11 = vweird.f32 %v238_v16 }
 0x18b   :  { %v412_v8 = vmul.f32 %v288_v31, %v4768_v51  ;;  %v391_v30 = vmul.f32 %v4278_v46, %v390_v26  ;;  %v424_v31 = vmul.f32 %v408_v2, %v4744_v24  ;;  %vm316_vm15 = vweird.f32 %v5374_v61 }
 0x18c   :  { %v292_v53 = vmul.f32 0.5, %v291_v40  ;;  %v5371_v49 = vpop.permute.xlu2 %4085  ;;  %v311_v9 = vmul.f32 %v5374_v61, %v310_v33  ;;  %vm317_vm1 = vmor %vm315_vm14, %vm316_vm15 }
 0x18d   :  { %v432_v47 = vmul.f32 %v4821_v38, %v412_v8  ;;  %v392_v32 = vmul.f32 0.5, %v391_v30  ;;  %v444_v2 = vmul.f32 %v4821_v38, %v424_v31 }
 0x18e   :  { %v293_v29 = vsub.f32 1.5, %v292_v53 }
 0x18f   :  { %v452_v51 = vadd.f32 %v4840_v52, %v432_v47  ;;  %v393_v7 = vsub.f32 1.5, %v392_v32  ;;  %v4282_v55 = vpop.eup %4281 }
 0x190   :  { %v5378_v17 = vpop.permute.xlu0 %4090  ;;  %v300_v40 = vmul.f32 %v4282_v55, %v238_v16  ;;  %v294_v26 = vmul.f32 %v5339_v48, %v293_v29  ;;  %vm306_vm12 = vweird.f32 %v4282_v55 }
 0x191   :  { %v5385_v43 = vpack.c.bf16 %v452_v51, %v451_v60  ;;  %v394_v53 = vmul.f32 %v4278_v46, %v393_v7  ;;  %vm307_vm13 = vmor %vm305_vm11, %vm306_vm12 }
 0x192   :  { %v301_v42 = vmul.f32 %v4282_v55, %v300_v40  ;;  %v298_v51 = vsel %vm5391_vm10, %v5339_v48, %v294_v26  ;;  %v464_v40 = vadd.f32 %v4840_v52, %v444_v2 }
 0x193   :  { %3781 = vmatmul.msk.bf16.gmra.mxu0 %vm65_vm0, %v5385_v43  ;;  %v398_v8 = vsel %vm397_vm9, %v4278_v46, %v394_v53  ;;  %v5406_v46 = vld [vmem:[%s7276_s1 + $0xc8] sm:$0xff]   ;;  %v413_v48 = vmul.f32 %v298_v51, %v4771_v56 }
 0x194   :  { %v192_v60 = vpop.xlane.xlu1 %191  ;;  %v5396_v30 = vpop.permute.xlu2 %4100  ;;  %v423_v19 = vmul.f32 %v398_v8, %v4785_v1  ;;  %v302_v47 = vmul.f32 0.5, %v301_v42  ;;  %v7361_v16 = vunpack.c.l.bf16 %v5406_v46  ;;  %v312_v8 = vmul.f32 0.5, %v311_v9 }
 0x195   :  { %v224_v32 = vmul.f32 %v192_v60, %v4648_v28  ;;  %v5401_v29 = vpop.f32.mrf.mxu1  ;;  %v7360_v28 = vunpack.c.h.bf16 %v5406_v46  ;;  %v433_v56 = vmul.f32 %v4821_v38, %v413_v48 }
 0x196   :  { %7464 = vst [vmem:[#allocation20_spill] sm:$0xff] %v5401_v29  ;;  %v443_v1 = vmul.f32 %v4821_v38, %v423_v19  ;;  %v303_v7 = vsub.f32 1.5, %v302_v47  ;;  %v313_v9 = vsub.f32 1.5, %v312_v8 }
 0x197   :  { %v240_v31 = vadd.f32 1e-05, %v224_v32  ;;  %v4229_v24 = vpack.i.bf16 %v7360_v28, %v7361_v16 }
 0x198   :  { %v5412_v33 = vpop.permute.xlu0 %4105  ;;  %v463_v53 = vadd.f32 %v4840_v52, %v443_v1  ;;  %v304_v42 = vmul.f32 %v4282_v55, %v303_v7  ;;  %v314_v7 = vmul.f32 %v5374_v61, %v313_v9 }
 0x199   :  { %4283 = vrsqrt.f32 %v240_v31  ;;  %4230 = vrot.lane.b32.xlu2 %v4229_v24, %s4506_s26  ;;  %vm325_vm2 = vweird.f32 %v240_v31 }
 0x19a   :  { %v5419_v26 = vpack.c.bf16 %v464_v40, %v463_v53  ;;  %v308_v60 = vsel %vm307_vm13, %v4282_v55, %v304_v42  ;;  %v318_v6 = vsel %vm317_vm1, %v5374_v61, %v314_v7 }
 0x19b   :  { %v414_v2 = vmul.f32 %v308_v60, %v4815_v36  ;;  %v453_v36 = vadd.f32 %v4840_v52, %v433_v56  ;;  %v691_v56 = vpack.c.bf16 %v5401_v29, %v5401_v29 }
 0x19c   :  { %3787 = vmatmul.msk.bf16.gmra.mxu1 %vm65_vm0, %v5419_v26  ;;  %v5427_v19 = vpop.permute.xlu2 %4110 }
 0x19d   :  { %v5431_v47 = vpop.f32.mrf.mxu1  ;;  %v434_v32 = vmul.f32 %v4821_v38, %v414_v2 }
 0x19e   :  { %7465 = vst [vmem:[#allocation21_spill] sm:$0xff] %v5431_v47 }
 0x19f   :  { %v4284_v51 = vpop.eup %4283  ;;  %v454_v53 = vadd.f32 %v4840_v52, %v434_v32  ;;  %v692_v32 = vpack.c.bf16 %v5431_v47, %v5431_v47 }
 0x1a0   :  { %v4121_v55 = vpop.permute.xlu0 %4120  ;;  %v320_v1 = vmul.f32 %v4284_v51, %v240_v31  ;;  %vm326_vm3 = vweird.f32 %v4284_v51  ;;  %v415_v31 = vmul.f32 %v318_v6, %v4790_v14 }
 0x1a1   :  { %v5440_v8 = vpack.c.bf16 %v454_v53, %v453_v36  ;;  %vm327_vm4 = vmor %vm325_vm2, %vm326_vm3  ;;  %v5459_v36 = vunpack.c.l.bf16 %v691_v56  ;;  %v5466_v14 = vunpack.c.l.bf16 %v692_v32  ;;  %v4123_v6 = vunpack.i.h.bf16 %v4121_v55 }
 0x1a2   :  { %v321_v40 = vmul.f32 %v4284_v51, %v320_v1  ;;  %v4122_v28 = vunpack.i.l.bf16 %v4121_v55 }
 0x1a3   :  { %3782 = vmatmul.msk.bf16.gmra.mxu0 %vm65_vm0, %v5440_v8 }
 0x1a4   :  { %v322_v42 = vmul.f32 0.5, %v321_v40  ;;  %v5442_v48 = vpop.permute.xlu2 %4125 }
 0x1a5   :  { %v5447_v24 = vpop.f32.mrf.mxu1 }
 0x1a6   :  { %7466 = vst [vmem:[#allocation22_spill] sm:$0xff] %v5447_v24  ;;  %v323_v60 = vsub.f32 1.5, %v322_v42  ;;  %v693_v61 = vpack.c.bf16 %v5447_v24, %v5447_v24  ;;  %v435_v42 = vmul.f32 %v4821_v38, %v415_v31 }
 0x1a8   :  { %v5449_v2 = vpop.permute.xlu0 %4135  ;;  %v324_v9 = vmul.f32 %v4284_v51, %v323_v60  ;;  %v5470_v16 = vunpack.c.l.bf16 %v693_v61  ;;  %v455_v55 = vadd.f32 %v4840_v52, %v435_v42 }
 0x1aa   :  { %v328_v1 = vsel %vm327_vm4, %v4284_v51, %v324_v9 }
 0x1ab   :  { %v416_v7 = vmul.f32 %v328_v1, %v4892_v57 }
 0x1ac   :  { %3788 = vmatmul.msk.bf16.vlgmr.msrb.gmra.mxu1 %vm65_vm0, %v4991_v59  ;;  %v5463_v53 = vpop.permute.xlu1 %4095  ;;  %v4141_v40 = vpop.permute.xlu2 %4140 }
 0x1ad   :  { %v4143_v60 = vunpack.i.h.bf16 %v4141_v40  ;;  %v4142_v51 = vunpack.i.l.bf16 %v4141_v40  ;;  %v5468_v9 = vpop.f32.mrf.mxu1  ;;  %v436_v59 = vmul.f32 %v4821_v38, %v416_v7 }
 0x1ae   :  { %7467 = vst [vmem:[#allocation23_spill] sm:$0xff] %v5468_v9  ;;  %v694_v57 = vpack.c.bf16 %v5468_v9, %v5468_v9 }
 0x1af   :  { %v5476_v56 = vmul.f32 %v4143_v60, %v5466_v14  ;;  %v5479_v31 = vmul.f32 %v4142_v51, %v5459_v36  ;;  %v456_v61 = vadd.f32 %v4840_v52, %v436_v59  ;;  %v1061_v60 = vmul.f32 %v4122_v28, %v5470_v16 }
 0x1b0   :  { %v4151_v32 = vpop.permute.xlu0 %4150  ;;  %v5481_v1 = vunpack.c.l.bf16 %v694_v57 }
 0x1b1   :  { %v4153_v40 = vunpack.i.h.bf16 %v4151_v32  ;;  %v4152_v11 = vunpack.i.l.bf16 %v4151_v32  ;;  %v5495_v57 = vpack.c.bf16 %v456_v61, %v455_v55 }
 0x1b2   :  { %v1062_v51 = vmul.f32 %v4123_v6, %v5481_v1 }
 0x1b3   :  { %v5488_v38 = vmul.f32 %v4152_v11, %v5470_v16  ;;  %v5491_v7 = vmul.f32 %v4153_v40, %v5481_v1  ;;  %3783 = vmatmul.msk.bf16.gmra.mxu0 %vm65_vm0, %v5495_v57 }
 0x1b4   :  { %v4116_v32 = vpop.permute.xlu1 %4115  ;;  %v5497_v23 = vpop.permute.xlu2 %4155  ;;  %v1112_v42 = vpack.c.bf16 %v1062_v51, %v1061_v60 }
 0x1b5   :  { %v4118_v11 = vunpack.i.h.bf16 %v4116_v32  ;;  %v4117_v59 = vunpack.i.l.bf16 %v4116_v32  ;;  %v5503_v40 = vpop.f32.mrf.mxu1 }
 0x1b6   :  { %7468 = vst [vmem:[#allocation24_spill] sm:$0xff] %v5503_v40  ;;  %1453 = vrot.lane.b32.xlu0 %v1112_v42, %s4506_s26  ;;  %v695_v60 = vpack.c.bf16 %v5503_v40, %v5503_v40  ;;  %v4103_v42 = vunpack.i.h.bf16 %v5396_v30 }
 0x1b7   :  { %v1046_v28 = vmul.f32 %v4118_v11, %v5481_v1  ;;  %v1045_v6 = vmul.f32 %v4117_v59, %v5470_v16  ;;  %v4102_v11 = vunpack.i.l.bf16 %v5396_v30 }
 0x1b8   :  { %v4166_v55 = vpop.permute.xlu0 %4165 }
 0x1b9   :  { %v4168_v61 = vunpack.i.h.bf16 %v4166_v55  ;;  %v4167_v44 = vunpack.i.l.bf16 %v4166_v55  ;;  %v1104_v51 = vpack.c.bf16 %v1046_v28, %v1045_v6  ;;  %v711_v6 = vunpack.c.l.bf16 %v695_v60 }
 0x1bb   :  { %v5511_v52 = vmul.f32 %v4167_v44, %v5459_v36  ;;  %v5514_v32 = vmul.f32 %v4168_v61, %v5466_v14  ;;  %1437 = vrot.lane.b32.xlu1 %v1104_v51, %s4506_s26  ;;  %v4097_v44 = vunpack.i.l.bf16 %v5463_v53  ;;  %v4098_v51 = vunpack.i.h.bf16 %v5463_v53 }
 0x1bc   :  { %3789 = vmatmul.msk.bf16.gmra.mxu1 %vm65_vm0, %v5385_v43  ;;  %v4131_v59 = vpop.permute.xlu1 %4130  ;;  %v4171_v55 = vpop.permute.xlu2 %4170  ;;  %v1063_v60 = vmul.f32 %v4102_v11, %v711_v6  ;;  %v4108_v11 = vunpack.i.h.bf16 %v5412_v33 }
 0x1bd   :  { %v4173_v40 = vunpack.i.h.bf16 %v4171_v55  ;;  %v4172_v61 = vunpack.i.l.bf16 %v4171_v55  ;;  %v5524_v62 = vpop.f32.mrf.mxu1  ;;  %v4133_v15 = vunpack.i.h.bf16 %v4131_v59  ;;  %v4132_v9 = vunpack.i.l.bf16 %v4131_v59 }
 0x1be   :  { %7469 = vst [vmem:[#allocation25_spill] sm:$0xff] %v5524_v62  ;;  %v696_v30 = vpack.c.bf16 %v5524_v62, %v5524_v62  ;;  %v1047_v20 = vmul.f32 %v4097_v44, %v711_v6  ;;  %v4138_v59 = vunpack.i.h.bf16 %v5449_v2  ;;  %v4137_v62 = vunpack.i.l.bf16 %v5449_v2 }
 0x1bf   :  { %v5530_v43 = vmul.f32 %v4173_v40, %v5466_v14  ;;  %v5533_v24 = vmul.f32 %v4172_v61, %v5459_v36  ;;  %v1095_v4 = vmul.f32 %v4132_v9, %v711_v6  ;;  %v4128_v61 = vunpack.i.h.bf16 %v5442_v48 }
 0x1c0   :  { %v712_v28 = vunpack.c.l.bf16 %v696_v30 }
 0x1c2   :  { %v1096_v47 = vmul.f32 %v4133_v15, %v712_v28  ;;  %v1048_v53 = vmul.f32 %v4098_v51, %v712_v28  ;;  %v1064_v29 = vmul.f32 %v4103_v42, %v712_v28  ;;  %v4127_v15 = vunpack.i.l.bf16 %v5442_v48 }
 0x1c3   :  { %v4087_v51 = vunpack.i.l.bf16 %v5371_v49 }
 0x1c4   :  { %v4146_v41 = vpop.permute.xlu1 %4145  ;;  %v1129_v40 = vpack.c.bf16 %v1096_v47, %v1095_v4  ;;  %v1105_v50 = vpack.c.bf16 %v1048_v53, %v1047_v20  ;;  %v1113_v39 = vpack.c.bf16 %v1064_v29, %v1063_v60  ;;  %v1043_v20 = vmul.f32 %v4137_v62, %v5459_v36 }
 0x1c5   :  { %v4148_v30 = vunpack.i.h.bf16 %v4146_v41  ;;  %v4147_v44 = vunpack.i.l.bf16 %v4146_v41  ;;  %v1044_v4 = vmul.f32 %v4138_v59, %v5466_v14  ;;  %v1080_v29 = vmul.f32 %v4128_v61, %v712_v28 }
 0x1c6   :  { %1487 = vrot.lane.b32.xlu1 %v1129_v40, %s4506_s26  ;;  %1439 = vrot.lane.b32.xlu0 %v1105_v50, %s4506_s26  ;;  %v1079_v47 = vmul.f32 %v4127_v15, %v711_v6  ;;  %v4092_v36 = vunpack.i.l.bf16 %v5378_v17  ;;  %v4107_v14 = vunpack.i.l.bf16 %v5412_v33  ;;  %v4088_v6 = vunpack.i.h.bf16 %v5371_v49 }
 0x1c7   :  { %v5544_v9 = vmul.f32 %v4148_v30, %v5481_v1  ;;  %v5547_v42 = vmul.f32 %v4147_v44, %v5470_v16  ;;  %1455 = vrot.lane.b32.xlu2 %v1113_v39, %s4506_s26  ;;  %v1103_v50 = vpack.c.bf16 %v1044_v4, %v1043_v20  ;;  %v5564_v39 = vpop.f32.mrf.mxu0 }
 0x1c8   :  { %v1121_v48 = vpack.c.bf16 %v1080_v29, %v1079_v47 }
 0x1c9   :  { %v1120_v41 = vpack.c.bf16 %v5544_v9, %v5547_v42 }
 0x1cc   :  { %3790 = vmatmul.msk.bf16.gmra.mxu1 %vm65_vm0, %v5440_v8 }
 0x1ce   :  { %1435 = vrot.lane.b32.xlu1 %v1103_v50, %s4506_s26 }
 0x1cf   :  { %1471 = vrot.lane.b32.xlu2 %v1121_v48, %s4506_s26  ;;  %v5566_v62 = vpop.f32.mrf.mxu0 }
 0x1dc   :  { %3791 = vmatmul.msk.bf16.gmra.mxu1 %vm65_vm0, %v5495_v57  ;;  %v4093_v57 = vunpack.i.h.bf16 %v5378_v17  ;;  %v667_v17 = vld [vmem:[%s7276_s1 + $0xc0] sm:$0xff]  }
 0x1dd   :  { %v763_v50 = vunpack.c.l.bf16 %v667_v17  ;;  %v764_v48 = vunpack.c.h.bf16 %v667_v17  ;;  %v4181_v17 = vpop.permute.xlu0 %4180 }
 0x1ec   :  { %3792 = vmatmul.msk.bf16.gmra.mxu1 %vm65_vm0, %v4861_v10 }
 0x1fc   :  { %3793 = vmatmul.msk.bf16.gmra.mxu1 %vm65_vm0, %v4952_v27  ;;  %v5580_v27 = vpop.permute.xlu1 %4160 }
 0x204   :  { %v5597_v33 = vpop.permute.xlu1 %4175 }
 0x20c   :  { %3794 = vmatmul.msk.bf16.gmra.mxu1 %vm65_vm0, %v5031_v25 }
 0x210   :  { %v5570_v16 = vpop.f32.mrf.mxu0 }
 0x218   :  { %v5572_v8 = vpop.f32.mrf.mxu0 }
 0x219   :  { %v5574_v2 = vpop.f32.mrf.mxu1 }
 0x21a   :  { %v697_v10 = vpack.c.bf16 %v5574_v2, %v5574_v2 }
 0x21c   :  { %3795 = vmatmul.msk.bf16.gmra.mxu1 %vm65_vm0, %v5419_v26  ;;  %v713_v1 = vunpack.c.l.bf16 %v697_v10  ;;  %vm1491_vm0 = vcmask 523264  }
 0x21e   :  { %v1081_v53 = vmul.f32 %v4107_v14, %v713_v1  ;;  %v1065_v59 = vmul.f32 %v4092_v36, %v713_v1  ;;  %v1049_v30 = vmul.f32 %v4087_v51, %v713_v1  ;;  %v4239_v36 = vpack.i.bf16 %v764_v48, %v763_v50 }
 0x21f   :  { %v7472_v51 = vpack.c.bf16 %v5491_v7, %v5488_v38  ;;  %v4112_v38 = vunpack.i.l.bf16 %v5427_v19 }
 0x220   :  { %v5588_v28 = vpop.f32.mrf.mxu0 }
 0x221   :  { %v5584_v25 = vpop.f32.mrf.mxu1 }
 0x222   :  { %v698_v26 = vpack.c.bf16 %v5584_v25, %v5584_v25 }
 0x224   :  { %v714_v60 = vunpack.c.l.bf16 %v698_v26 }
 0x226   :  { %v1082_v40 = vmul.f32 %v4108_v11, %v714_v60  ;;  %v1066_v61 = vmul.f32 %v4093_v57, %v714_v60  ;;  %v1050_v44 = vmul.f32 %v4088_v6, %v714_v60  ;;  %v5613_v11 = vpop.permute.xlu1 %4190 }
 0x228   :  { %v1122_v15 = vpack.c.bf16 %v1082_v40, %v1081_v53  ;;  %v1114_v20 = vpack.c.bf16 %v1066_v61, %v1065_v59  ;;  %v1106_v4 = vpack.c.bf16 %v1050_v44, %v1049_v30  ;;  %v5601_v47 = vpop.f32.mrf.mxu0  ;;  %v7473_v53 = vunpack.c.l.bf16 %v5212_v37 }
 0x229   :  { %v5599_v29 = vpop.f32.mrf.mxu1  ;;  %v4113_v40 = vunpack.i.h.bf16 %v5427_v19  ;;  %v7474_v61 = vpack.c.bf16 %v5476_v56, %v5479_v31  ;;  %v688_v30 = vpack.c.bf16 %v5601_v47, %v5601_v47  ;;  %v4183_v31 = vunpack.i.h.bf16 %v4181_v17 }
 0x22a   :  { %7470 = vst [vmem:[#allocation26_spill] sm:$0xff] %v5599_v29  ;;  %v1131_v49 = vpack.c.bf16 %v5599_v29, %v5599_v29  ;;  %1473 = vrot.lane.b32.xlu1 %v1122_v15, %s4506_s26  ;;  %1457 = vrot.lane.b32.xlu2 %v1114_v20, %s4506_s26  ;;  %v687_v15 = vpack.c.bf16 %v5588_v28, %v5588_v28 }
 0x22b   :  { %1441 = vrot.lane.b32.xlu0 %v1106_v4, %s4506_s26  ;;  %v1098_v7 = vmul.f32 %v4113_v40, %v714_v60  ;;  %v7475_v4 = vunpack.c.h.bf16 %v5212_v37  ;;  %v4177_v40 = vunpack.i.l.bf16 %v5597_v33 }
 0x22c   :  { %v5608_v10 = vunpack.c.l.bf16 %v1131_v49  ;;  %v5649_v55 = vunpack.c.l.bf16 %v687_v15 }
 0x22e   :  { %v1211_v14 = vmul.f32 %v5608_v10, %v763_v50  ;;  %v1195_v59 = vmul.f32 %v5608_v10, %v7473_v53  ;;  %v4182_v53 = vunpack.i.l.bf16 %v4181_v17  ;;  %v685_v17 = vpack.c.bf16 %v5570_v16, %v5570_v16 }
 0x230   :  { %v5615_v26 = vpop.f32.mrf.mxu0  ;;  %v1259_v56 = vpack.c.bf16 %v1195_v59, %v1195_v59  ;;  %v1275_v50 = vpack.c.bf16 %v1211_v14, %v1211_v14  ;;  %v5694_v15 = vunpack.c.l.bf16 %v685_v17 }
 0x231   :  { %v5611_v57 = vpop.f32.mrf.mxu1 }
 0x232   :  { %7471 = vst [vmem:[#allocation27_spill] sm:$0xff] %v5611_v57  ;;  %v1132_v6 = vpack.c.bf16 %v5611_v57, %v5611_v57  ;;  %1485 = vrot.lane.b32.xlu1 %v7472_v51, %s4506_s26  ;;  %4240 = vrot.lane.b32.xlu2 %v4239_v36, %s4506_s26  ;;  %v1097_v36 = vmul.f32 %v4112_v38, %v713_v1  ;;  %v5644_v51 = vunpack.c.l.bf16 %v688_v30  ;;  %v5670_v38 = vunpack.c.l.b16 %v1275_v50 }
 0x233   :  { %1451 = vrot.lane.b32.xlu0 %v7474_v61, %s4506_s26  ;;  %v7477_v1 = vpack.c.bf16 %v5514_v32, %v5511_v52  ;;  %v686_v30 = vpack.c.bf16 %v5572_v8, %v5572_v8  ;;  %v4196_v52 = vpop.permute.xlu1 %4195 }
 0x234   :  { %v5634_v44 = vunpack.c.l.bf16 %v1132_v6  ;;  %v4178_v6 = vunpack.i.h.bf16 %v5597_v33  ;;  %v5663_v33 = vunpack.c.l.b16 %v1259_v56  ;;  %7478 = vst [vmem:[#allocation29_spill] sm:$0xff] %v5670_v38  ;;  %v1056_v9 = vmul.f32 %v4183_v31, %v5644_v51 }
 0x235   :  { %v1039_v56 = vmul.f32 %v4177_v40, %v5649_v55  ;;  %v4163_v31 = vunpack.i.h.bf16 %v5580_v27  ;;  %v4198_v50 = vunpack.i.h.bf16 %v4196_v52 }
 0x236   :  { %v1212_v20 = vmul.f32 %v5634_v44, %v764_v48  ;;  %v1196_v49 = vmul.f32 %v5634_v44, %v7475_v4  ;;  %v1130_v48 = vpack.c.bf16 %v1098_v7, %v1097_v36  ;;  %v1040_v42 = vmul.f32 %v4178_v6, %v5644_v51 }
 0x237   :  { %v5691_v36 = vunpack.c.l.bf16 %v686_v30  ;;  %v7481_v30 = vunpack.c.l.bf16 %v5176_v21 }
 0x238   :  { %v1276_v19 = vpack.c.bf16 %v1212_v20, %v1212_v20  ;;  %v1260_v60 = vpack.c.bf16 %v1196_v49, %v1196_v49  ;;  %v5651_v37 = vpop.f32.mrf.mxu0  ;;  %v689_v20 = vpack.c.bf16 %v5615_v26, %v5615_v26  ;;  %v1055_v49 = vmul.f32 %v4182_v53, %v5649_v55 }
 0x239   :  { %v5647_v61 = vpop.f32.mrf.mxu1  ;;  %v690_v32 = vpack.c.bf16 %v5651_v37, %v5651_v37  ;;  %v4162_v53 = vunpack.i.l.bf16 %v5580_v27  ;;  %v7483_v27 = vunpack.c.l.bf16 %v5406_v46 }
 0x23a   :  { %7476 = vst [vmem:[#allocation28_spill] sm:$0xff] %v5647_v61  ;;  %v1133_v14 = vpack.c.bf16 %v5647_v61, %v5647_v61  ;;  %1467 = vrot.lane.b32.xlu1 %v7477_v1, %s4506_s26  ;;  %1469 = vrot.lane.b32.xlu2 %v1120_v41, %s4506_s26  ;;  %v5665_v59 = vunpack.c.l.b16 %v1260_v60  ;;  %v5672_v7 = vunpack.c.l.b16 %v1276_v19  ;;  %v1109_v19 = vpack.c.bf16 %v1056_v9, %v1055_v49 }
 0x23b   :  { %1489 = vrot.lane.b32.xlu0 %v1130_v48, %s4506_s26  ;;  %v706_v6 = vunpack.c.l.bf16 %v690_v32  ;;  %v1101_v60 = vpack.c.bf16 %v1040_v42, %v1039_v56  ;;  %v4158_v48 = vunpack.i.h.bf16 %v5497_v23  ;;  %v4197_v1 = vunpack.i.l.bf16 %v4196_v52  ;;  %v5717_v56 = vpop.permute.xlu0 %4200 }
 0x23c   :  { %7479 = vst [vmem:[#allocation30_spill] sm:$0xff] %v5672_v7  ;;  %v5686_v4 = vunpack.c.l.bf16 %v1133_v14  ;;  %v4186_v14 = vpop.permute.xlu2 %4185  ;;  %v705_v61 = vunpack.c.l.bf16 %v689_v20  ;;  %v4157_v52 = vunpack.i.l.bf16 %v5497_v23  ;;  %v7482_v9 = vpack.c.bf16 %v5530_v43, %v5533_v24  ;;  %v4211_v23 = vpop.permute.xlu1 %4210 }
 0x23d   :  { %v1038_v20 = vmul.f32 %v4198_v50, %v5691_v36  ;;  %v1058_v49 = vmul.f32 %v4163_v31, %v706_v6  ;;  %v4213_v50 = vunpack.i.h.bf16 %v4211_v23  ;;  %v4188_v7 = vunpack.i.h.bf16 %v4186_v14 }
 0x23e   :  { %v1197_v32 = vmul.f32 %v5686_v4, %v7481_v30  ;;  %v1213_v42 = vmul.f32 %v5686_v4, %v7483_v27  ;;  %v1057_v30 = vmul.f32 %v4162_v53, %v705_v61  ;;  %v4193_v27 = vunpack.i.h.bf16 %v5613_v11 }
 0x23f   :  { %v1041_v31 = vmul.f32 %v4157_v52, %v705_v61  ;;  %v4187_v52 = vunpack.i.l.bf16 %v4186_v14 }
 0x240   :  { %v1261_v43 = vpack.c.bf16 %v1197_v32, %v1197_v32  ;;  %v1277_v57 = vpack.c.bf16 %v1213_v42, %v1213_v42  ;;  %v1110_v38 = vpack.c.bf16 %v1058_v49, %v1057_v30  ;;  %v4212_v32 = vunpack.i.l.bf16 %v4211_v23 }
 0x241   :  { %v5696_v41 = vpop.f32.mrf.mxu1 }
 0x242   :  { %7480 = vst [vmem:[#allocation31_spill] sm:$0xff] %v5696_v41  ;;  %v1134_v40 = vpack.c.bf16 %v5696_v41, %v5696_v41  ;;  %1447 = vrot.lane.b32.xlu1 %v1109_v19, %s4506_s26  ;;  %1431 = vrot.lane.b32.xlu2 %v1101_v60, %s4506_s26  ;;  %v1037_v19 = vmul.f32 %v4197_v1, %v5694_v15  ;;  %v7484_v41 = vunpack.c.h.bf16 %v5176_v21 }
 0x243   :  { %1483 = vrot.lane.b32.xlu0 %v7482_v9, %s4506_s26  ;;  %v1042_v60 = vmul.f32 %v4158_v48, %v706_v6  ;;  %v7485_v9 = vunpack.c.h.bf16 %v5406_v46  ;;  %v5732_v46 = vunpack.c.l.b16 %v1261_v43  ;;  %v1087_v23 = vmul.f32 %v4212_v32, %v5649_v55 }
 0x244   :  { %v5714_v17 = vunpack.c.l.bf16 %v1134_v40  ;;  %v1100_v29 = vpack.c.bf16 %v1038_v20, %v1037_v19  ;;  %v5739_v20 = vunpack.c.l.b16 %v1277_v57  ;;  %v1088_v19 = vmul.f32 %v4213_v50, %v5644_v51 }
 0x245   :  { %v1102_v21 = vpack.c.bf16 %v1042_v60, %v1041_v31  ;;  %v1074_v60 = vmul.f32 %v4188_v7, %v706_v6  ;;  %v1073_v57 = vmul.f32 %v4187_v52, %v705_v61  ;;  %v4221_v52 = vpop.permute.xlu1 %4220 }
 0x246   :  { %v1198_v24 = vmul.f32 %v5714_v17, %v7484_v41  ;;  %v1214_v40 = vmul.f32 %v5714_v17, %v7485_v9  ;;  %v4192_v41 = vunpack.i.l.bf16 %v5613_v11  ;;  %v4206_v11 = vpop.permute.xlu2 %4205 }
 0x247   :  { %v4207_v7 = vunpack.i.l.bf16 %v4206_v11 }
 0x248   :  { %v1262_v1 = vpack.c.bf16 %v1198_v24, %v1198_v24  ;;  %v1278_v48 = vpack.c.bf16 %v1214_v40, %v1214_v40  ;;  %v1089_v30 = vmul.f32 %v4192_v41, %v705_v61  ;;  %v4226_v24 = vpop.permute.xlu0 %4225  ;;  %v4208_v40 = vunpack.i.h.bf16 %v4206_v11 }
 0x249   :  { %v5727_v53 = vpop.f32.mrf.mxu1  ;;  %v4228_v31 = vunpack.i.h.bf16 %v4226_v24  ;;  %v4202_v61 = vunpack.i.l.bf16 %v5717_v56  ;;  %v7488_v41 = vunpack.c.l.bf16 %v5286_v13 }
 0x24a   :  { %7486 = vst [vmem:[#allocation32_spill] sm:$0xff] %v5727_v53  ;;  %1429 = vrot.lane.b32.xlu1 %v1100_v29, %s4506_s26  ;;  %1449 = vrot.lane.b32.xlu2 %v1110_v38, %s4506_s26  ;;  %v5734_v9 = vunpack.c.l.b16 %v1262_v1  ;;  %v1135_v42 = vpack.c.bf16 %v5727_v53, %v5727_v53  ;;  %v5741_v49 = vunpack.c.l.b16 %v1278_v48  ;;  %v1090_v29 = vmul.f32 %v4193_v27, %v706_v6 }
 0x24b   :  { %1433 = vrot.lane.b32.xlu0 %v1102_v21, %s4506_s26  ;;  %v1125_v1 = vpack.c.bf16 %v1088_v19, %v1087_v23  ;;  %v4203_v27 = vunpack.i.h.bf16 %v5717_v56  ;;  %v1118_v21 = vpack.c.bf16 %v1074_v60, %v1073_v57  ;;  %v4227_v6 = vunpack.i.l.bf16 %v4226_v24 }
 0x24c   :  { %v5749_v43 = vunpack.c.l.bf16 %v1135_v42  ;;  %v1126_v48 = vpack.c.bf16 %v1090_v29, %v1089_v30  ;;  %v1070_v11 = vmul.f32 %v4228_v31, %v5691_v36  ;;  %v1072_v19 = vmul.f32 %v4208_v40, %v5644_v51 }
 0x24d   :  { %v683_v29 = vpack.c.bf16 %v5564_v39, %v5564_v39  ;;  %v1054_v60 = vmul.f32 %v4203_v27, %v5691_v36  ;;  %v684_v56 = vpack.c.bf16 %v5566_v62, %v5566_v62  ;;  %v1069_v30 = vmul.f32 %v4227_v6, %v5694_v15 }
 0x24e   :  { %v1215_v32 = vmul.f32 %v5749_v43, %v7488_v41  ;;  %v4216_v23 = vpop.permute.xlu2 %4215  ;;  %v1071_v24 = vmul.f32 %v4207_v7, %v5649_v55  ;;  %v4223_v31 = vunpack.i.h.bf16 %v4221_v52  ;;  %v1053_v51 = vmul.f32 %v4202_v61, %v5694_v15 }
 0x24f   :  { %v4218_v41 = vunpack.i.h.bf16 %v4216_v23  ;;  %v4217_v38 = vunpack.i.l.bf16 %v4216_v23  ;;  %v5780_v6 = vunpack.c.l.bf16 %v683_v29  ;;  %v5782_v55 = vunpack.c.l.bf16 %v684_v56 }
 0x250   :  { %v1279_v40 = vpack.c.bf16 %v1215_v32, %v1215_v32  ;;  %v1108_v53 = vpack.c.bf16 %v1054_v60, %v1053_v51  ;;  %v4236_v29 = vpop.permute.xlu0 %4235 }
 0x251   :  { %v5752_v50 = vpop.f32.mrf.mxu1  ;;  %v1052_v32 = vmul.f32 %v4223_v31, %v5782_v55  ;;  %v4238_v23 = vunpack.i.h.bf16 %v4236_v29 }
 0x252   :  { %7487 = vst [vmem:[#allocation33_spill] sm:$0xff] %v5752_v50  ;;  %v1136_v14 = vpack.c.bf16 %v5752_v50, %v5752_v50  ;;  %1479 = vrot.lane.b32.xlu1 %v1125_v1, %s4506_s26  ;;  %1481 = vrot.lane.b32.xlu2 %v1126_v48, %s4506_s26  ;;  %v4222_v1 = vunpack.i.l.bf16 %v4221_v52  ;;  %v1116_v48 = vpack.c.bf16 %v1070_v11, %v1069_v30  ;;  %v5789_v7 = vunpack.c.l.b16 %v1279_v40 }
 0x253   :  { %1465 = vrot.lane.b32.xlu0 %v1118_v21, %s4506_s26  ;;  %v1117_v21 = vpack.c.bf16 %v1072_v19, %v1071_v24  ;;  %v1036_v11 = vmul.f32 %v4218_v41, %v5782_v55  ;;  %v1035_v19 = vmul.f32 %v4217_v38, %v5780_v6  ;;  %v7492_v40 = vunpack.c.l.bf16 %v5234_v12 }
 0x254   :  { %v5763_v42 = vunpack.c.l.bf16 %v1136_v14  ;;  %v7489_v14 = vunpack.c.h.bf16 %v5286_v13  ;;  %v1051_v52 = vmul.f32 %v4222_v1, %v5780_v6 }
 0x255   :  { %v1099_v31 = vpack.c.bf16 %v1036_v11, %v1035_v19 }
 0x256   :  { %v1216_v57 = vmul.f32 %v5763_v42, %v7489_v14  ;;  %v4231_v30 = vpop.permute.xlu2 %4230  ;;  %v1107_v24 = vpack.c.bf16 %v1052_v32, %v1051_v52 }
 0x257   :  { %v4233_v14 = vunpack.i.h.bf16 %v4231_v30  ;;  %v4232_v38 = vunpack.i.l.bf16 %v4231_v30 }
 0x258   :  { %v1280_v27 = vpack.c.bf16 %v1216_v57, %v1216_v57 }
 0x259   :  { %v5778_v50 = vpop.f32.mrf.mxu1  ;;  %v1086_v41 = vmul.f32 %v4233_v14, %v5691_v36  ;;  %v1085_v52 = vmul.f32 %v4232_v38, %v5694_v15  ;;  %v4039_v15 = vld [vmem:[%s7276_s1 + $0x38] sm:$0xff]  ;;  %v4037_v14 = vld [vmem:[%s7276_s1 + $0x28] sm:$0xff] }
 0x25a   :  { %7490 = vst [vmem:[#allocation34_spill] sm:$0xff] %v5778_v50  ;;  %1461 = vrot.lane.b32.xlu1 %v1116_v48, %s4506_s26  ;;  %1463 = vrot.lane.b32.xlu2 %v1117_v21, %s4506_s26  ;;  %v1137_v13 = vpack.c.bf16 %v5778_v50, %v5778_v50  ;;  %v5791_v61 = vunpack.c.l.b16 %v1280_v27  ;;  %v1068_v48 = vmul.f32 %v4238_v23, %v5782_v55 }
 0x25b   :  { %1445 = vrot.lane.b32.xlu0 %v1108_v53, %s4506_s26  ;;  %v4237_v53 = vunpack.i.l.bf16 %v4236_v29  ;;  %v1124_v30 = vpack.c.bf16 %v1086_v41, %v1085_v52  ;;  %v4044_v52 = vld [vmem:[%s7276_s1 + $0x60] sm:$0xff] }
 0x25c   :  { %v5799_v56 = vunpack.c.l.bf16 %v1137_v13  ;;  %v7493_v13 = vunpack.c.h.bf16 %v5234_v12  ;;  %v4047_v12 = vld [vmem:[%s7276_s1 + $0x78] sm:$0xff] }
 0x25d   :  { %v1067_v21 = vmul.f32 %v4237_v53, %v5780_v6 }
 0x25e   :  { %v1217_v1 = vmul.f32 %v5799_v56, %v7492_v40  ;;  %v4063_v40 = vld [vmem:[%s7276_s1 + $0xf8] sm:$0xff] }
 0x25f   :  { %v1115_v19 = vpack.c.bf16 %v1068_v48, %v1067_v21  ;;  %v5851_v48 = vpop.permute.xlu1 %1437 }
 0x260   :  { %v1281_v11 = vpack.c.bf16 %v1217_v1, %v1217_v1  ;;  %v4055_v1 = vld [vmem:[%s7276_s1 + $0xb8] sm:$0xff] }
 0x261   :  { %v5801_v57 = vpop.f32.mrf.mxu1 }
 0x262   :  { %7491 = vst [vmem:[#allocation35_spill] sm:$0xff] %v5801_v57  ;;  %v1138_v51 = vpack.c.bf16 %v5801_v57, %v5801_v57  ;;  %1443 = vrot.lane.b32.xlu2 %v1107_v24, %s4506_s26  ;;  %v5821_v23 = vunpack.c.l.b16 %v1281_v11  ;;  %v1456_v24 = vpop.permute.xlu2 %1455 }
 0x263   :  { %1427 = vrot.lane.b32.xlu0 %v1099_v31, %s4506_s26  ;;  %v4046_v31 = vld [vmem:[%s7276_s1 + $0x70] sm:$0xff] }
 0x264   :  { %v5812_v27 = vunpack.c.l.bf16 %v1138_v51 }
 0x266   :  { %v1218_v32 = vmul.f32 %v5812_v27, %v7493_v13 }
 0x267   :  { %v5864_v11 = vpop.permute.xlu1 %1487 }
 0x268   :  { %v1282_v29 = vpack.c.bf16 %v1218_v32, %v1218_v32  ;;  %v4054_v32 = vld [vmem:[%s7276_s1 + $0xb0] sm:$0xff] }
 0x269   :  { %v5841_v51 = vpop.f32.mrf.mxu1 }
 0x26a   :  { %1459 = vrot.lane.b32.xlu2 %v1115_v19, %s4506_s26  ;;  %v5823_v53 = vunpack.c.l.b16 %v1282_v29  ;;  %7494 = vst [vmem:[#allocation36_spill] sm:$0xff] %v5841_v51  ;;  %v1472_v38 = vpop.permute.xlu2 %1471  ;;  %v1454_v29 = vpop.permute.xlu0 %1453 }
 0x26b   :  { %1477 = vrot.lane.b32.xlu0 %v1124_v30, %s4506_s26 }
 0x271   :  { %v5854_v21 = vpop.f32.mrf.mxu1 }
 0x272   :  { %2462 = vrot.lane.b32.xlu2 %v4047_v12, %s4506_s26  ;;  %7495 = vst [vmem:[#allocation37_spill] sm:$0xff] %v5854_v21 }
 0x273   :  { %2446 = vrot.lane.b32.xlu0 %v4039_v15, %s4506_s26 }
 0x279   :  { %v5868_v30 = vpop.f32.mrf.mxu1 }
 0x27a   :  { %2442 = vrot.lane.b32.xlu2 %v4037_v14, %s4506_s26  ;;  %7496 = vst [vmem:[#allocation38_spill] sm:$0xff] %v5868_v30  ;;  %v1559_v14 = vsel %vm1491_vm0, %v1456_v24, 0  ;;  %v1436_v24 = vpop.permute.xlu1 %1435 }
 0x27b   :  { %2460 = vrot.lane.b32.xlu0 %v4046_v31, %s4506_s26  ;;  %v4043_v31 = vld [vmem:[%s7276_s1 + $0x58] sm:$0xff] }
 0x282   :  { %2494 = vrot.lane.b32.xlu2 %v4063_v40, %s4506_s26 }
 0x283   :  { %2478 = vrot.lane.b32.xlu0 %v4055_v1, %s4506_s26 }
 0x284   :  { %v1458_v41 = vpop.permute.xlu2 %1457 }
 0x285   :  { %v1562_v13 = vsel %vm1491_vm0, %v1458_v41, 0  ;;  %v4035_v41 = vld [vmem:[%s7276_s1 + $0x18] sm:$0xff] }
 0x286   :  { %1661 = vmatpush.bf16.xpose.msra.mxu3 %v1562_v13 }
 0x28a   :  { %2476 = vrot.lane.b32.xlu2 %v4054_v32, %s4506_s26 }
 0x28b   :  { %2456 = vrot.lane.b32.xlu0 %v4044_v52, %s4506_s26  ;;  %v1440_v52 = vpop.permute.xlu0 %1439 }
 0x28c   :  { %v4241_v19 = vpop.permute.xlu2 %4240 }
 0x28d   :  { %v4243_v12 = vunpack.i.h.bf16 %v4241_v19  ;;  %v4242_v15 = vunpack.i.l.bf16 %v4241_v19  ;;  %v1556_v19 = vsel %vm1491_vm0, %v1454_v29, 0 }
 0x28e   :  { %1662 = vmatpush.bf16.xpose.msra.mxu3 %v1559_v14 }
 0x28f   :  { %v1084_v40 = vmul.f32 %v4243_v12, %v5782_v55  ;;  %v1083_v1 = vmul.f32 %v4242_v15, %v5780_v6  ;;  %v4051_v6 = vld [vmem:[%s7276_s1 + $0x98] sm:$0xff]  ;;  %v5886_v55 = vpop.f32.mrf.mxu1  ;;  %v4033_v12 = vld [vmem:[%s7276_s1 + $0x8] sm:$0xff]  ;;  %v4038_v15 = vld [vmem:[%s7276_s1 + $0x30] sm:$0xff] }
 0x290   :  { %7497 = vst [vmem:[#allocation39_spill] sm:$0xff] %v5886_v55 }
 0x291   :  { %v1123_v13 = vpack.c.bf16 %v1084_v40, %v1083_v1 }
 0x292   :  { %2454 = vrot.lane.b32.xlu2 %v4043_v31, %s4506_s26 }
 0x293   :  { %2438 = vrot.lane.b32.xlu0 %v4035_v41, %s4506_s26  ;;  %1475 = vrot.lane.b32.xlu1 %v1123_v13, %s4506_s26  ;;  %v4040_v41 = vld [vmem:[%s7276_s1 + $0x40] sm:$0xff]  ;;  %v4045_v13 = vld [vmem:[%s7276_s1 + $0x68] sm:$0xff] }
 0x294   :  { %v1470_v32 = vpop.permute.xlu2 %1469 }
 0x296   :  { %1663 = vmatpush.bf16.xpose.msra.mxu3 %v1556_v19 }
 0x297   :  { %v5907_v19 = vpop.f32.mrf.mxu1 }
 0x298   :  { %7498 = vst [vmem:[#allocation40_spill] sm:$0xff] %v5907_v19 }
 0x29a   :  { %2470 = vrot.lane.b32.xlu2 %v4051_v6, %s4506_s26 }
 0x29b   :  { %2434 = vrot.lane.b32.xlu0 %v4033_v12, %s4506_s26  ;;  %2444 = vrot.lane.b32.xlu1 %v4038_v15, %s4506_s26 }
 0x29c   :  { %v1474_v29 = vpop.permute.xlu1 %1473  ;;  %v5897_v14 = vpop.permute.xlu2 %1431 }
 0x29d   :  { %v1442_v31 = vpop.permute.xlu0 %1441  ;;  %v1586_v40 = vsel %vm1491_vm0, %v1474_v29, 0  ;;  %v1583_v29 = vsel %vm1491_vm0, %v1472_v38, 0  ;;  %v1580_v38 = vsel %vm1491_vm0, %v1470_v32, 0 }
 0x29e   :  { %v1538_v1 = vsel %vm1491_vm0, %v1442_v31, 0  ;;  %1710 = vmatpush.bf16.xpose.msrb.mxu0 %v1586_v40  ;;  %v1535_v31 = vsel %vm1491_vm0, %v1440_v52, 0 }
 0x29f   :  { %1612 = vmatpush.bf16.xpose.msra.mxu2 %v1538_v1  ;;  %v4036_v1 = vld [vmem:[%s7276_s1 + $0x20] sm:$0xff]  ;;  %v5917_v60 = vpop.f32.mrf.mxu1 }
 0x2a0   :  { %7499 = vst [vmem:[#allocation41_spill] sm:$0xff] %v5917_v60 }
 0x2a3   :  { %2448 = vrot.lane.b32.xlu0 %v4040_v41, %s4506_s26  ;;  %2458 = vrot.lane.b32.xlu1 %v4045_v13, %s4506_s26 }
 0x2a4   :  { %v1486_v6 = vpop.permute.xlu1 %1485  ;;  %v1450_v12 = vpop.permute.xlu2 %1449 }
 0x2a5   :  { %v1452_v15 = vpop.permute.xlu0 %1451 }
 0x2a6   :  { %v1553_v40 = vsel %vm1491_vm0, %v1452_v15, 0  ;;  %1711 = vmatpush.bf16.xpose.msrb.mxu0 %v1583_v29  ;;  %v1532_v15 = vsel %vm1491_vm0, %v5851_v48, 0  ;;  %v1550_v29 = vsel %vm1491_vm0, %v1450_v12, 0  ;;  %v1529_v12 = vsel %vm1491_vm0, %v1436_v24, 0 }
 0x2a7   :  { %1613 = vmatpush.bf16.xpose.msra.mxu2 %v1535_v31  ;;  %1664 = vmatpush.bf16.xpose.msra.mxu3 %v1553_v40  ;;  %v4062_v31 = vld [vmem:[%s7276_s1 + $0xf0] sm:$0xff]  ;;  %v1604_v24 = vsel %vm1491_vm0, %v1486_v6, 0  ;;  %v1523_v6 = vsel %vm1491_vm0, %v5897_v14, 0  ;;  %v7503_v14 = vunpack.c.l.bf16 %v4830_v63 }
 0x2ab   :  { %2440 = vrot.lane.b32.xlu1 %v4036_v1, %s4506_s26  ;;  %v5929_v1 = vpop.f32.mrf.mxu1 }
 0x2ac   :  { %v1468_v41 = vpop.permute.xlu1 %1467  ;;  %v1482_v13 = vpop.permute.xlu2 %1481  ;;  %7500 = vst [vmem:[#allocation42_spill] sm:$0xff] %v5929_v1 }
 0x2ad   :  { %v1490_v36 = vpop.permute.xlu0 %1489  ;;  %v1577_v48 = vsel %vm1491_vm0, %v1468_v41, 0 }
 0x2ae   :  { %v1610_v52 = vsel %vm1491_vm0, %v1490_v36, 0  ;;  %1712 = vmatpush.bf16.xpose.msrb.mxu0 %v1580_v38  ;;  %v1607_v38 = vsel %vm1491_vm0, %v5864_v11, 0  ;;  %v4061_v11 = vld [vmem:[%s7276_s1 + $0xe8] sm:$0xff] }
 0x2af   :  { %1614 = vmatpush.bf16.xpose.msra.mxu2 %v1532_v15  ;;  %1665 = vmatpush.bf16.xpose.msra.mxu3 %v1550_v29 }
 0x2b0   :  { %1759 = vmatpush.bf16.xpose.msra.mxu1 %v1610_v52  ;;  %v4053_v52 = vld [vmem:[%s7276_s1 + $0xa8] sm:$0xff] }
 0x2b3   :  { %2492 = vrot.lane.b32.xlu1 %v4062_v31, %s4506_s26  ;;  %v5941_v41 = vpop.f32.mrf.mxu1 }
 0x2b4   :  { %v1448_v40 = vpop.permute.xlu1 %1447  ;;  %v1464_v15 = vpop.permute.xlu2 %1463  ;;  %7501 = vst [vmem:[#allocation43_spill] sm:$0xff] %v5941_v41 }
 0x2b5   :  { %v1484_v32 = vpop.permute.xlu0 %1483  ;;  %v1547_v36 = vsel %vm1491_vm0, %v1448_v40, 0  ;;  %v1571_v50 = vsel %vm1491_vm0, %v1464_v15, 0 }
 0x2b6   :  { %1713 = vmatpush.bf16.xpose.msrb.mxu0 %v1577_v48  ;;  %v1146_v48 = vpack.c.bf16 %v5941_v41, %v5941_v41 }
 0x2b7   :  { %1615 = vmatpush.bf16.xpose.msra.mxu2 %v1529_v12  ;;  %1666 = vmatpush.bf16.xpose.msra.mxu3 %v1547_v36  ;;  %v1145_v12 = vpack.c.bf16 %v5929_v1, %v5929_v1 }
 0x2b8   :  { %1760 = vmatpush.bf16.xpose.msra.mxu1 %v1607_v38 }
 0x2bb   :  { %2474 = vrot.lane.b32.xlu1 %v4053_v52, %s4506_s26  ;;  %v5952_v52 = vunpack.c.l.bf16 %v1146_v48  ;;  %v7502_v48 = vunpack.c.h.bf16 %v4830_v63 }
 0x2bc   :  { %v1430_v40 = vpop.permute.xlu1 %1429  ;;  %v1444_v36 = vpop.permute.xlu2 %1443 }
 0x2bd   :  { %v1434_v29 = vpop.permute.xlu0 %1433  ;;  %v1194_v1 = vmul.f32 %v5952_v52, %v7502_v48 }
 0x2be   :  { %v1526_v31 = vsel %vm1491_vm0, %v1434_v29, 0 }
 0x2bf   :  { %1616 = vmatpush.bf16.xpose.msra.mxu2 %v1526_v31  ;;  %v1601_v31 = vsel %vm1491_vm0, %v1484_v32, 0 }
 0x2c0   :  { %1761 = vmatpush.bf16.xpose.msra.mxu1 %v1604_v24  ;;  %v4034_v24 = vld [vmem:[%s7276_s1 + $0x10] sm:$0xff] }
 0x2c3   :  { %2490 = vrot.lane.b32.xlu1 %v4061_v11, %s4506_s26  ;;  %v5961_v11 = vunpack.c.l.bf16 %v1145_v12  ;;  %v1258_v12 = vpack.c.bf16 %v1194_v1, %v1194_v1 }
 0x2c4   :  { %v1480_v41 = vpop.permute.xlu1 %1479  ;;  %v1460_v57 = vpop.permute.xlu2 %1459 }
 0x2c5   :  { %v1466_v38 = vpop.permute.xlu0 %1465  ;;  %v1193_v32 = vmul.f32 %v5961_v11, %v7503_v14  ;;  %v2207_v48 = vunpack.c.l.b16 %v1258_v12  ;;  %v1595_v15 = vsel %vm1491_vm0, %v1480_v41, 0  ;;  %v1144_v12 = vpack.c.bf16 %v5917_v60, %v5917_v60 }
 0x2c6   :  { %v1574_v29 = vsel %vm1491_vm0, %v1466_v38, 0  ;;  %v1143_v41 = vpack.c.bf16 %v5907_v19, %v5907_v19 }
 0x2c7   :  { %1617 = vmatpush.bf16.xpose.msra.mxu2 %v1523_v6  ;;  %1714 = vmatpush.bf16.xpose.msrb.mxu0 %v1574_v29  ;;  %v1520_v6 = vsel %vm1491_vm0, %v1430_v40, 0  ;;  %v1257_v63 = vpack.c.bf16 %v1193_v32, %v1193_v32  ;;  %v4052_v32 = vld [vmem:[%s7276_s1 + $0xa0] sm:$0xff] }
 0x2c8   :  { %1762 = vmatpush.bf16.xpose.msra.mxu1 %v1601_v31  ;;  %v1598_v31 = vsel %vm1491_vm0, %v1482_v13, 0 }
 0x2c9   :  { %v2206_v14 = vunpack.c.l.b16 %v1257_v63  ;;  %v7505_v63 = vunpack.c.l.bf16 %v4917_v58 }
 0x2cb   :  { %2436 = vrot.lane.b32.xlu1 %v4034_v24, %s4506_s26  ;;  %v4042_v24 = vld [vmem:[%s7276_s1 + $0x50] sm:$0xff] }
 0x2cc   :  { %v1462_v40 = vpop.permute.xlu1 %1461 }
 0x2cd   :  { %v1446_v38 = vpop.permute.xlu0 %1445 }
 0x2ce   :  { %v1544_v29 = vsel %vm1491_vm0, %v1446_v38, 0  ;;  %v2463_v38 = vpop.permute.xlu2 %2462 }
 0x2cf   :  { %1618 = vmatpush.bf16.xpose.msra.mxu2 %v1520_v6  ;;  %1667 = vmatpush.bf16.xpose.msra.mxu3 %v1544_v29  ;;  %v1541_v6 = vsel %vm1491_vm0, %v1444_v36, 0  ;;  %v2255_v29 = vpack.c.b16 %v2207_v48, %v2206_v14  ;;  %v7504_v36 = vunpack.c.h.bf16 %v4917_v58  ;;  %v1177_v48 = vmul.f32 %v5961_v11, %v7505_v63 }
 0x2d0   :  { %1715 = vmatpush.bf16.xpose.msrb.mxu0 %v1571_v50  ;;  %1763 = vmatpush.bf16.xpose.msra.mxu1 %v1598_v31  ;;  %v1568_v50 = vsel %vm1491_vm0, %v1462_v40, 0  ;;  %v5999_v40 = vpack.c.bf16 %v5566_v62, %v5564_v39  ;;  %v6001_v14 = vunpack.c.l.bf16 %v1144_v12  ;;  %v4060_v39 = vld [vmem:[%s7276_s1 + $0xe0] sm:$0xff]  ;;  %v7507_v12 = vunpack.c.l.bf16 %v4964_v34 }
 0x2d1   :  { %v2558_v31 = vsel %vm1491_vm0, %v2255_v29, %v2463_v38  ;;  %v1241_v58 = vpack.c.bf16 %v1177_v48, %v1177_v48  ;;  %v1565_v29 = vsel %vm1491_vm0, %v1460_v57, 0 }
 0x2d3   :  { %2452 = vrot.lane.b32.xlu1 %v4042_v24, %s4506_s26  ;;  %v1178_v24 = vmul.f32 %v5952_v52, %v7504_v36 }
 0x2d5   :  { %v1428_v1 = vpop.permute.xlu0 %1427  ;;  %v1242_v38 = vpack.c.bf16 %v1178_v24, %v1178_v24 }
 0x2d6   :  { %v1517_v13 = vsel %vm1491_vm0, %v1428_v1, 0  ;;  %v6021_v36 = vpop.permute.xlu2 %2442 }
 0x2d7   :  { %1619 = vmatpush.bf16.xpose.msra.mxu2 %v1517_v13  ;;  %1668 = vmatpush.bf16.xpose.msra.mxu3 %v1541_v6  ;;  %v6003_v13 = vunpack.c.l.bf16 %v1143_v41  ;;  %v2191_v62 = vunpack.c.l.b16 %v1242_v38 }
 0x2d8   :  { %1716 = vmatpush.bf16.xpose.msrb.mxu0 %v1568_v50  ;;  %1764 = vmatpush.bf16.xpose.msra.mxu1 %v1595_v15  ;;  %v7506_v15 = vunpack.c.h.bf16 %v4964_v34  ;;  %v4041_v34 = vld [vmem:[%s7276_s1 + $0x48] sm:$0xff] }
 0x2da   :  { %v1192_v50 = vmul.f32 %v6001_v14, %v7506_v15 }
 0x2db   :  { %2472 = vrot.lane.b32.xlu1 %v4052_v32, %s4506_s26  ;;  %v2190_v32 = vunpack.c.l.b16 %v1241_v58 }
 0x2dc   :  { %v1256_v24 = vpack.c.bf16 %v1192_v50, %v1192_v50 }
 0x2dd   :  { %v1478_v1 = vpop.permute.xlu0 %1477  ;;  %v2247_v57 = vpack.c.b16 %v2191_v62, %v2190_v32  ;;  %v6038_v62 = vpack.c.bf16 %v5572_v8, %v5570_v16  ;;  %v4059_v16 = vld [vmem:[%s7276_s1 + $0xd8] sm:$0xff]  ;;  %v7511_v8 = vunpack.c.l.bf16 %v5046_v18 }
 0x2de   :  { %v1592_v6 = vsel %vm1491_vm0, %v1478_v1, 0  ;;  %3796 = vmatmul.msk.bf16.vlgmr.msra.gmra.mxu2 %vm1491_vm0, %v5999_v40  ;;  %3804 = vmatmul.msk.bf16.vlgmr.msra.gmra.mxu3 %vm1491_vm0, %v5999_v40  ;;  %v2205_v38 = vunpack.c.l.b16 %v1256_v24  ;;  %v7508_v1 = vunpack.c.h.bf16 %v4873_v54 }
 0x2df   :  { %2673 = vmatpush.bf16.msrb.mxu3 %v2558_v31  ;;  %v1191_v31 = vmul.f32 %v6003_v13, %v7507_v12  ;;  %v7510_v12 = vunpack.c.h.bf16 %v5046_v18  ;;  %v4032_v18 = vld [vmem:[%s7276_s1] sm:$0xff] }
 0x2e0   :  { %1717 = vmatpush.bf16.xpose.msrb.mxu0 %v1565_v29  ;;  %1765 = vmatpush.bf16.xpose.msra.mxu1 %v1592_v6  ;;  %v1210_v6 = vmul.f32 %v5952_v52, %v7508_v1  ;;  %v7509_v29 = vunpack.c.l.bf16 %v4873_v54 }
 0x2e1   :  { %v1255_v48 = vpack.c.bf16 %v1191_v31, %v1191_v31  ;;  %v1208_v31 = vmul.f32 %v6001_v14, %v7510_v12 }
 0x2e2   :  { %v1274_v50 = vpack.c.bf16 %v1210_v6, %v1210_v6 }
 0x2e3   :  { %2488 = vrot.lane.b32.xlu1 %v4060_v39, %s4506_s26  ;;  %v2204_v58 = vunpack.c.l.b16 %v1255_v48  ;;  %v1209_v39 = vmul.f32 %v5961_v11, %v7509_v29  ;;  %v1272_v48 = vpack.c.bf16 %v1208_v31, %v1208_v31  ;;  %v7513_v31 = vunpack.c.l.bf16 %v5002_v3 }
 0x2e5   :  { %v2447_v41 = vpop.permute.xlu0 %2446  ;;  %v2254_v15 = vpack.c.b16 %v2205_v38, %v2204_v58  ;;  %v1273_v24 = vpack.c.bf16 %v1209_v39, %v1209_v39  ;;  %v2221_v58 = vunpack.c.l.b16 %v1272_v48 }
 0x2e6   :  { %v2526_v63 = vsel %vm1491_vm0, %v2247_v57, %v2447_v41  ;;  %v2495_v57 = vpop.permute.xlu2 %2494  ;;  %v1207_v41 = vmul.f32 %v6003_v13, %v7511_v8  ;;  %v1142_v8 = vpack.c.bf16 %v5886_v55, %v5886_v55 }
 0x2e7   :  { %3812 = vmatmul.msk.bf16.vlgmr.msrb.gmra.mxu0 %vm1491_vm0, %v5999_v40  ;;  %2624 = vmatpush.bf16.msrb.mxu2 %v2526_v63  ;;  %v2223_v63 = vunpack.c.l.b16 %v1274_v50  ;;  %v7512_v50 = vunpack.c.h.bf16 %v5002_v3 }
 0x2e8   :  { %v1271_v38 = vpack.c.bf16 %v1207_v41, %v1207_v41 }
 0x2ea   :  { %v2220_v39 = vunpack.c.l.b16 %v1271_v38  ;;  %v7515_v38 = vunpack.c.l.bf16 %v5011_v5 }
 0x2eb   :  { %2450 = vrot.lane.b32.xlu1 %v4041_v34, %s4506_s26  ;;  %v2222_v34 = vunpack.c.l.b16 %v1273_v24 }
 0x2ec   :  { %v2262_v12 = vpack.c.b16 %v2221_v58, %v2220_v39  ;;  %v1140_v58 = vpack.c.bf16 %v5854_v21, %v5854_v21  ;;  %v7516_v39 = vunpack.c.h.bf16 %v5053_v35 }
 0x2ed   :  { %v2461_v32 = vpop.permute.xlu0 %2460  ;;  %v2263_v1 = vpack.c.b16 %v2223_v63, %v2222_v34 }
 0x2ee   :  { %3797 = vmatmul.msk.bf16.gmra.mxu2 %vm1491_vm0, %v6038_v62  ;;  %3805 = vmatmul.msk.bf16.gmra.mxu3 %vm1491_vm0, %v6038_v62  ;;  %v2554_v54 = vsel %vm1491_vm0, %v2254_v15, %v2461_v32  ;;  %v2477_v15 = vpop.permute.xlu2 %2476  ;;  %v1226_v32 = vmul.f32 %v5952_v52, %v7512_v50  ;;  %v1141_v52 = vpack.c.bf16 %v5868_v30, %v5868_v30 }
 0x2ef   :  { %2674 = vmatpush.bf16.msrb.mxu3 %v2554_v54  ;;  %v1225_v54 = vmul.f32 %v5961_v11, %v7513_v31  ;;  %v2586_v24 = vsel %vm1491_vm0, %v2262_v12, %v2477_v15  ;;  %v7514_v11 = vunpack.c.h.bf16 %v5011_v5  ;;  %v7517_v31 = vunpack.c.l.bf16 %v5053_v35 }
 0x2f0   :  { %v1290_v41 = vpack.c.bf16 %v1226_v32, %v1226_v32  ;;  %v6089_v34 = vunpack.c.l.bf16 %v1141_v52  ;;  %v1139_v32 = vpack.c.bf16 %v5841_v51, %v5841_v51 }
 0x2f1   :  { %v1289_v3 = vpack.c.bf16 %v1225_v54, %v1225_v54  ;;  %v1176_v63 = vmul.f32 %v6001_v14, %v7514_v11 }
 0x2f2   :  { %v2239_v48 = vunpack.c.l.b16 %v1290_v41  ;;  %v1173_v54 = vmul.f32 %v6089_v34, %v7517_v31  ;;  %v6114_v11 = vunpack.c.l.bf16 %v1139_v32  ;;  %v7522_v31 = vunpack.c.h.bf16 %v4985_v45 }
 0x2f3   :  { %2486 = vrot.lane.b32.xlu1 %v4059_v16, %s4506_s26  ;;  %v6071_v16 = vpack.c.bf16 %v5601_v47, %v5588_v28  ;;  %v4050_v28 = vld [vmem:[%s7276_s1 + $0x90] sm:$0xff]  ;;  %v6084_v47 = vunpack.c.l.bf16 %v1142_v8  ;;  %v6109_v8 = vunpack.c.l.bf16 %v1140_v58 }
 0x2f5   :  { %v2479_v6 = vpop.permute.xlu0 %2478 }
 0x2f6   :  { %v2590_v29 = vsel %vm1491_vm0, %v2263_v1, %v2479_v6  ;;  %v1175_v1 = vmul.f32 %v6003_v13, %v7515_v38  ;;  %v2238_v6 = vunpack.c.l.b16 %v1289_v3  ;;  %v7518_v3 = vunpack.c.h.bf16 %v4931_v22 }
 0x2f7   :  { %3813 = vmatmul.msk.bf16.gmra.mxu0 %vm1491_vm0, %v6038_v62  ;;  %v6121_v38 = vpack.c.bf16 %v5651_v37, %v5615_v26  ;;  %v7521_v26 = vunpack.c.l.bf16 %v5084_v0 }
 0x2f8   :  { %2722 = vmatpush.bf16.msra.mxu0 %v2590_v29  ;;  %v1240_v29 = vpack.c.bf16 %v1176_v63, %v1176_v63  ;;  %v2271_v15 = vpack.c.b16 %v2239_v48, %v2238_v6  ;;  %v1239_v12 = vpack.c.bf16 %v1175_v1, %v1175_v1  ;;  %v1237_v63 = vpack.c.bf16 %v1173_v54, %v1173_v54 }
 0x2f9   :  { %v7519_v48 = vunpack.c.l.bf16 %v4931_v22  ;;  %v1187_v37 = vmul.f32 %v6114_v11, %v7521_v26  ;;  %v1172_v54 = vmul.f32 %v6109_v8, %v7522_v31 }
 0x2fa   :  { %v2189_v41 = vunpack.c.l.b16 %v1240_v29  ;;  %v2188_v35 = vunpack.c.l.b16 %v1239_v12  ;;  %v7520_v29 = vunpack.c.h.bf16 %v5084_v0 }
 0x2fb   :  { %2432 = vrot.lane.b32.xlu1 %v4032_v18, %s4506_s26  ;;  %v1174_v18 = vmul.f32 %v6084_v47, %v7516_v39 }
 0x2fc   :  { %2723 = vmatpush.bf16.msra.mxu0 %v2586_v24  ;;  %v2622_v24 = vsel %vm1491_vm0, %v2271_v15, %v2495_v57  ;;  %v1189_v57 = vmul.f32 %v6089_v34, %v7519_v48  ;;  %v2246_v1 = vpack.c.b16 %v2189_v41, %v2188_v35  ;;  %v1188_v39 = vmul.f32 %v6109_v8, %v7520_v29 }
 0x2fd   :  { %v1238_v52 = vpack.c.bf16 %v1174_v18, %v1174_v18  ;;  %v2186_v15 = vunpack.c.l.b16 %v1237_v63  ;;  %v7525_v35 = vunpack.c.l.bf16 %v4985_v45 }
 0x2fe   :  { %3798 = vmatmul.msk.bf16.gmra.mxu2 %vm1491_vm0, %v6071_v16  ;;  %3806 = vmatmul.msk.bf16.gmra.mxu3 %vm1491_vm0, %v6071_v16  ;;  %v1252_v12 = vpack.c.bf16 %v1188_v39, %v1188_v39 }
 0x2ff   :  { %v2187_v6 = vunpack.c.l.b16 %v1238_v52 }
 0x301   :  { %v2245_v32 = vpack.c.b16 %v2187_v6, %v2186_v15  ;;  %v1236_v6 = vpack.c.bf16 %v1172_v54, %v1172_v54  ;;  %v7530_v54 = vld [vmem:[#allocation7_spill] sm:$0xff] }
 0x303   :  { %2468 = vrot.lane.b32.xlu1 %v4050_v28, %s4506_s26  ;;  %v1190_v28 = vmul.f32 %v6084_v47, %v7518_v3  ;;  %v2518_v0 = vsel %vm1491_vm0, %v2245_v32, %v6021_v36 }
 0x305   :  { %v1476_v50 = vpop.permute.xlu1 %1475  ;;  %v1254_v58 = vpack.c.bf16 %v1190_v28, %v1190_v28  ;;  %v1251_v28 = vpack.c.bf16 %v1187_v37, %v1187_v37 }
 0x306   :  { %v1589_v5 = vsel %vm1491_vm0, %v1476_v50, 0  ;;  %v1253_v50 = vpack.c.bf16 %v1189_v57, %v1189_v57 }
 0x307   :  { %3814 = vmatmul.msk.bf16.gmra.mxu0 %vm1491_vm0, %v6071_v16  ;;  %1766 = vmatpush.bf16.xpose.msra.mxu1 %v1589_v5  ;;  %v2203_v5 = vunpack.c.l.b16 %v1254_v58  ;;  %v7527_v58 = vld [vmem:[#allocation9_spill] sm:$0xff]  ;;  %v2200_v45 = vunpack.c.l.b16 %v1251_v28 }
 0x308   :  { %v2202_v3 = vunpack.c.l.b16 %v1253_v50  ;;  %v7528_v29 = vunpack.c.h.bf16 %v7527_v58  ;;  %v7529_v26 = vunpack.c.l.bf16 %v7527_v58 }
 0x30a   :  { %v2253_v57 = vpack.c.b16 %v2203_v5, %v2202_v3  ;;  %v1170_v39 = vmul.f32 %v5812_v27, %v7528_v29  ;;  %v1169_v37 = vmul.f32 %v5799_v56, %v7529_v26 }
 0x30c   :  { %v1234_v31 = vpack.c.bf16 %v1170_v39, %v1170_v39  ;;  %v1233_v28 = vpack.c.bf16 %v1169_v37, %v1169_v37  ;;  %v7535_v37 = vld [vmem:[#allocation10_spill] sm:$0xff] }
 0x30d   :  { %v2445_v18 = vpop.permute.xlu1 %2444 }
 0x30e   :  { %3799 = vmatmul.msk.bf16.gmra.mxu2 %vm1491_vm0, %v6121_v38  ;;  %3807 = vmatmul.msk.bf16.gmra.mxu3 %vm1491_vm0, %v6121_v38  ;;  %v2522_v22 = vsel %vm1491_vm0, %v2246_v1, %v2445_v18  ;;  %v2201_v1 = vunpack.c.l.b16 %v1252_v12  ;;  %v2457_v18 = vpop.permute.xlu0 %2456  ;;  %v2185_v12 = vunpack.c.l.b16 %v1236_v6  ;;  %v2455_v6 = vpop.permute.xlu2 %2454  ;;  %v2183_v29 = vunpack.c.l.b16 %v1234_v31 }
 0x30f   :  { %2771 = vmatpush.bf16.msrb.mxu1 %v2622_v24  ;;  %2625 = vmatpush.bf16.msrb.mxu2 %v2522_v22  ;;  %v7523_v24 = vld [vmem:[#allocation13_spill] sm:$0xff] }
 0x310   :  { %3820 = vmatmul.msk.bf16.vlgmr.msra.gmra.mxu1 %vm1491_vm0, %v5999_v40  ;;  %v7524_v41 = vunpack.c.h.bf16 %v7523_v24  ;;  %v1171_v40 = vmul.f32 %v6114_v11, %v7525_v35  ;;  %v7526_v63 = vunpack.c.l.bf16 %v7523_v24  ;;  %v2252_v5 = vpack.c.b16 %v2201_v1, %v2200_v45 }
 0x311   :  { %v7531_v24 = vunpack.c.h.bf16 %v7530_v54  ;;  %v7532_v35 = vunpack.c.l.bf16 %v7530_v54  ;;  %v7537_v54 = vunpack.c.l.bf16 %v7535_v37 }
 0x312   :  { %v1186_v52 = vmul.f32 %v5812_v27, %v7524_v41  ;;  %v1185_v48 = vmul.f32 %v5799_v56, %v7526_v63  ;;  %v1235_v50 = vpack.c.bf16 %v1171_v40, %v1171_v40 }
 0x313   :  { %2626 = vmatpush.bf16.msrb.mxu2 %v2518_v0  ;;  %v1224_v41 = vmul.f32 %v6001_v14, %v7531_v24  ;;  %v2546_v0 = vsel %vm1491_vm0, %v2252_v5, %v2457_v18  ;;  %v1223_v40 = vmul.f32 %v6003_v13, %v7532_v35  ;;  %v2182_v18 = vunpack.c.l.b16 %v1233_v28  ;;  %v7538_v35 = vld [vmem:[#allocation5_spill] sm:$0xff] }
 0x314   :  { %v1250_v22 = vpack.c.bf16 %v1186_v52, %v1186_v52  ;;  %v1249_v32 = vpack.c.bf16 %v1185_v48, %v1185_v48  ;;  %v2184_v3 = vunpack.c.l.b16 %v1235_v50  ;;  %v7534_v48 = vld [vmem:[#allocation21_spill] sm:$0xff]  ;;  %v1205_v24 = vmul.f32 %v6089_v34, %v7537_v54 }
 0x315   :  { %v2459_v36 = vpop.permute.xlu1 %2458  ;;  %v1288_v39 = vpack.c.bf16 %v1224_v41, %v1224_v41  ;;  %v2243_v50 = vpack.c.b16 %v2183_v29, %v2182_v18  ;;  %v7542_v29 = vld [vmem:[#allocation23_spill] sm:$0xff] }
 0x316   :  { %v2550_v15 = vsel %vm1491_vm0, %v2253_v57, %v2459_v36  ;;  %v2199_v52 = vunpack.c.l.b16 %v1250_v22  ;;  %v2198_v63 = vunpack.c.l.b16 %v1249_v32  ;;  %v7533_v57 = vld [vmem:[#allocation20_spill] sm:$0xff]  ;;  %v2244_v58 = vpack.c.b16 %v2185_v12, %v2184_v3 }
 0x317   :  { %3815 = vmatmul.msk.bf16.gmra.mxu0 %vm1491_vm0, %v6121_v38  ;;  %2675 = vmatpush.bf16.msrb.mxu3 %v2550_v15  ;;  %v6168_v1 = vpack.c.bf16 %v7534_v48, %v7533_v57  ;;  %v1287_v22 = vpack.c.bf16 %v1223_v40, %v1223_v40  ;;  %v2439_v15 = vpop.permute.xlu0 %2438  ;;  %v2237_v26 = vunpack.c.l.b16 %v1288_v39  ;;  %v7536_v32 = vunpack.c.h.bf16 %v7535_v37 }
 0x318   :  { %v2251_v36 = vpack.c.b16 %v2199_v52, %v2198_v63  ;;  %v2510_v12 = vsel %vm1491_vm0, %v2243_v50, %v2439_v15  ;;  %v1269_v3 = vpack.c.bf16 %v1205_v24, %v1205_v24  ;;  %v7539_v40 = vunpack.c.h.bf16 %v7538_v35 }
 0x319   :  { %v1206_v5 = vmul.f32 %v6084_v47, %v7536_v32  ;;  %v2236_v31 = vunpack.c.l.b16 %v1287_v22  ;;  %v7540_v48 = vunpack.c.l.bf16 %v7538_v35  ;;  %v7543_v22 = vld [vmem:[#allocation15_spill] sm:$0xff] }
 0x31a   :  { %v2542_v45 = vsel %vm1491_vm0, %v2251_v36, %v2455_v6  ;;  %v1222_v63 = vmul.f32 %v6084_v47, %v7539_v40  ;;  %v2218_v57 = vunpack.c.l.b16 %v1269_v3  ;;  %v7544_v15 = vunpack.c.h.bf16 %v7543_v22 }
 0x31b   :  { %2676 = vmatpush.bf16.msrb.mxu3 %v2546_v0  ;;  %v2270_v41 = vpack.c.b16 %v2237_v26, %v2236_v31  ;;  %v1221_v6 = vmul.f32 %v6089_v34, %v7540_v48  ;;  %v7545_v26 = vunpack.c.l.bf16 %v7543_v22 }
 0x31c   :  { %v1286_v36 = vpack.c.bf16 %v1222_v63, %v1222_v63 }
 0x31d   :  { %v2441_v14 = vpop.permute.xlu1 %2440  ;;  %v1285_v18 = vpack.c.bf16 %v1221_v6, %v1221_v6  ;;  %v1167_v37 = vmul.f32 %v5749_v43, %v7545_v26 }
 0x31e   :  { %3800 = vmatmul.msk.bf16.gmra.mxu2 %vm1491_vm0, %v6168_v1  ;;  %3808 = vmatmul.msk.bf16.gmra.mxu3 %vm1491_vm0, %v6168_v1  ;;  %v2514_v13 = vsel %vm1491_vm0, %v2244_v58, %v2441_v14  ;;  %v7541_v58 = vld [vmem:[#allocation22_spill] sm:$0xff]  ;;  %v2235_v34 = vunpack.c.l.b16 %v1286_v36 }
 0x31f   :  { %2627 = vmatpush.bf16.msrb.mxu2 %v2514_v13  ;;  %2677 = vmatpush.bf16.msrb.mxu3 %v2542_v45  ;;  %v6196_v39 = vpack.c.bf16 %v7542_v29, %v7541_v58  ;;  %v1168_v45 = vmul.f32 %v5763_v42, %v7544_v15  ;;  %v2234_v50 = vunpack.c.l.b16 %v1285_v18  ;;  %v7552_v58 = vld [vmem:[#allocation24_spill] sm:$0xff]  ;;  %v7553_v29 = vld [vmem:[#allocation25_spill] sm:$0xff] }
 0x320   :  { %3821 = vmatmul.msk.bf16.gmra.mxu1 %vm1491_vm0, %v6038_v62  ;;  %v1270_v62 = vpack.c.bf16 %v1206_v5, %v1206_v5 }
 0x321   :  { %v2269_v32 = vpack.c.b16 %v2235_v34, %v2234_v50  ;;  %v1232_v5 = vpack.c.bf16 %v1168_v45, %v1168_v45  ;;  %v2435_v45 = vpop.permute.xlu0 %2434 }
 0x322   :  { %v2219_v28 = vunpack.c.l.b16 %v1270_v62 }
 0x323   :  { %2628 = vmatpush.bf16.msrb.mxu2 %v2510_v12  ;;  %v7546_v12 = vld [vmem:[#allocation18_spill] sm:$0xff] }
 0x324   :  { %v2261_v14 = vpack.c.b16 %v2219_v28, %v2218_v57  ;;  %v7547_v31 = vunpack.c.h.bf16 %v7546_v12  ;;  %v7548_v62 = vunpack.c.l.bf16 %v7546_v12  ;;  %v7549_v28 = vld [vmem:[#allocation8_spill] sm:$0xff] }
 0x325   :  { %v2493_v52 = vpop.permute.xlu1 %2492  ;;  %v7550_v35 = vunpack.c.h.bf16 %v7549_v28  ;;  %v7551_v48 = vunpack.c.l.bf16 %v7549_v28 }
 0x326   :  { %v2618_v0 = vsel %vm1491_vm0, %v2270_v41, %v2493_v52  ;;  %v1166_v54 = vmul.f32 %v5714_v17, %v7547_v31  ;;  %v1231_v41 = vpack.c.bf16 %v1167_v37, %v1167_v37  ;;  %v1165_v52 = vmul.f32 %v5686_v4, %v7548_v62  ;;  %v7554_v37 = vld [vmem:[#allocation6_spill] sm:$0xff] }
 0x327   :  { %3816 = vmatmul.msk.bf16.gmra.mxu0 %vm1491_vm0, %v6168_v1  ;;  %2772 = vmatpush.bf16.msrb.mxu1 %v2618_v0  ;;  %v2181_v0 = vunpack.c.l.b16 %v1232_v5  ;;  %v1184_v40 = vmul.f32 %v5763_v42, %v7550_v35  ;;  %v1183_v6 = vmul.f32 %v5749_v43, %v7551_v48  ;;  %v7557_v62 = vld [vmem:[#allocation14_spill] sm:$0xff]  ;;  %v7560_v48 = vld [vmem:[#allocation12_spill] sm:$0xff] }
 0x328   :  { %v1230_v3 = vpack.c.bf16 %v1166_v54, %v1166_v54  ;;  %v2180_v63 = vunpack.c.l.b16 %v1231_v41  ;;  %v1229_v57 = vpack.c.bf16 %v1165_v52, %v1165_v52  ;;  %v7556_v54 = vunpack.c.l.bf16 %v7554_v37 }
 0x329   :  { %v1247_v15 = vpack.c.bf16 %v1183_v6, %v1183_v6  ;;  %v7558_v52 = vunpack.c.h.bf16 %v7557_v62  ;;  %v7559_v35 = vunpack.c.l.bf16 %v7557_v62  ;;  %v7561_v6 = vunpack.c.h.bf16 %v7560_v48 }
 0x32a   :  { %v2242_v36 = vpack.c.b16 %v2181_v0, %v2180_v63  ;;  %v2178_v22 = vunpack.c.l.b16 %v1229_v57 }
 0x32b   :  { %v2196_v31 = vunpack.c.l.b16 %v1247_v15 }
 0x32d   :  { %v2475_v13 = vpop.permute.xlu1 %2474 }
 0x32e   :  { %3801 = vmatmul.msk.bf16.gmra.mxu2 %vm1491_vm0, %v6196_v39  ;;  %3809 = vmatmul.msk.bf16.gmra.mxu3 %vm1491_vm0, %v6196_v39  ;;  %v2582_v47 = vsel %vm1491_vm0, %v2261_v14, %v2475_v13  ;;  %v6228_v14 = vpack.c.bf16 %v7553_v29, %v7552_v58  ;;  %v2179_v13 = vunpack.c.l.b16 %v1230_v3  ;;  %v1220_v58 = vmul.f32 %v6109_v8, %v7561_v6 }
 0x32f   :  { %2724 = vmatpush.bf16.msra.mxu0 %v2582_v47  ;;  %v1248_v47 = vpack.c.bf16 %v1184_v40, %v1184_v40  ;;  %v1201_v40 = vmul.f32 %v5799_v56, %v7559_v35 }
 0x330   :  { %3822 = vmatmul.msk.bf16.gmra.mxu1 %vm1491_vm0, %v6071_v16  ;;  %v2241_v50 = vpack.c.b16 %v2179_v13, %v2178_v22 }
 0x331   :  { %v2197_v26 = vunpack.c.l.b16 %v1248_v47  ;;  %v6261_v47 = vpack.c.bf16 %v5584_v25, %v5574_v2 }
 0x332   :  { %v2502_v12 = vsel %vm1491_vm0, %v2241_v50, %v2435_v45  ;;  %v2471_v50 = vpop.permute.xlu2 %2470 }
 0x335   :  { %v2491_v24 = vpop.permute.xlu1 %2490 }
 0x336   :  { %v2614_v16 = vsel %vm1491_vm0, %v2269_v32, %v2491_v24  ;;  %v7555_v32 = vunpack.c.h.bf16 %v7554_v37  ;;  %v1203_v24 = vmul.f32 %v6114_v11, %v7556_v54 }
 0x337   :  { %3817 = vmatmul.msk.bf16.gmra.mxu0 %vm1491_vm0, %v6196_v39  ;;  %2773 = vmatpush.bf16.msrb.mxu1 %v2614_v16  ;;  %v2250_v16 = vpack.c.b16 %v2197_v26, %v2196_v31 }
 0x338   :  { %v1204_v5 = vmul.f32 %v6109_v8, %v7555_v32  ;;  %v1267_v28 = vpack.c.bf16 %v1203_v24, %v1203_v24 }
 0x33a   :  { %v1268_v41 = vpack.c.bf16 %v1204_v5, %v1204_v5  ;;  %v2216_v29 = vunpack.c.l.b16 %v1267_v28 }
 0x33c   :  { %v2217_v63 = vunpack.c.l.b16 %v1268_v41 }
 0x33d   :  { %v2437_v18 = vpop.permute.xlu1 %2436 }
 0x33e   :  { %3802 = vmatmul.msk.bf16.gmra.mxu2 %vm1491_vm0, %v6228_v14  ;;  %3810 = vmatmul.msk.bf16.gmra.mxu3 %vm1491_vm0, %v6228_v14  ;;  %v2506_v34 = vsel %vm1491_vm0, %v2242_v36, %v2437_v18  ;;  %v7562_v36 = vunpack.c.l.bf16 %v7560_v48  ;;  %v2260_v56 = vpack.c.b16 %v2217_v63, %v2216_v29 }
 0x33f   :  { %2629 = vmatpush.bf16.msrb.mxu2 %v2506_v34  ;;  %v1284_v34 = vpack.c.bf16 %v1220_v58, %v1220_v58  ;;  %v2449_v58 = vpop.permute.xlu0 %2448 }
 0x340   :  { %3823 = vmatmul.msk.bf16.gmra.mxu1 %vm1491_vm0, %v6121_v38  ;;  %v1202_v38 = vmul.f32 %v5812_v27, %v7558_v52  ;;  %v1265_v27 = vpack.c.bf16 %v1201_v40, %v1201_v40  ;;  %v1219_v13 = vmul.f32 %v6114_v11, %v7562_v36  ;;  %v7563_v11 = vld [vmem:[#allocation11_spill] sm:$0xff] }
 0x341   :  { %v2233_v25 = vunpack.c.l.b16 %v1284_v34  ;;  %v7564_v26 = vunpack.c.h.bf16 %v7563_v11 }
 0x342   :  { %v1266_v57 = vpack.c.bf16 %v1202_v38, %v1202_v38  ;;  %v2214_v15 = vunpack.c.l.b16 %v1265_v27  ;;  %v1283_v45 = vpack.c.bf16 %v1219_v13, %v1219_v13  ;;  %v7569_v27 = vld [vmem:[#allocation17_spill] sm:$0xff] }
 0x343   :  { %2630 = vmatpush.bf16.msrb.mxu2 %v2502_v12  ;;  %v1182_v37 = vmul.f32 %v5714_v17, %v7564_v26  ;;  %v7565_v12 = vunpack.c.l.bf16 %v7563_v11  ;;  %v7570_v36 = vunpack.c.h.bf16 %v7569_v27  ;;  %v7573_v11 = vld [vmem:[#allocation16_spill] sm:$0xff] }
 0x344   :  { %v2215_v18 = vunpack.c.l.b16 %v1266_v57  ;;  %v2232_v5 = vunpack.c.l.b16 %v1283_v45  ;;  %v7574_v26 = vunpack.c.h.bf16 %v7573_v11 }
 0x345   :  { %v2453_v0 = vpop.permute.xlu1 %2452  ;;  %v1181_v31 = vmul.f32 %v5686_v4, %v7565_v12  ;;  %v1246_v24 = vpack.c.bf16 %v1182_v37, %v1182_v37  ;;  %v1164_v13 = vmul.f32 %v5634_v44, %v7570_v36 }
 0x346   :  { %v2538_v3 = vsel %vm1491_vm0, %v2250_v16, %v2453_v0  ;;  %v2259_v2 = vpack.c.b16 %v2215_v18, %v2214_v15  ;;  %v2268_v54 = vpack.c.b16 %v2233_v25, %v2232_v5  ;;  %v7566_v16 = vld [vmem:[#allocation19_spill] sm:$0xff]  ;;  %v7571_v18 = vunpack.c.l.bf16 %v7569_v27 }
 0x347   :  { %3818 = vmatmul.msk.bf16.gmra.mxu0 %vm1491_vm0, %v6228_v14  ;;  %2678 = vmatpush.bf16.msrb.mxu3 %v2538_v3  ;;  %v7567_v41 = vunpack.c.h.bf16 %v7566_v16  ;;  %v1245_v38 = vpack.c.bf16 %v1181_v31, %v1181_v31  ;;  %v7568_v17 = vunpack.c.l.bf16 %v7566_v16  ;;  %v2195_v4 = vunpack.c.l.b16 %v1246_v24 }
 0x348   :  { %v2574_v32 = vsel %vm1491_vm0, %v2259_v2, %v2471_v50  ;;  %v1163_v34 = vmul.f32 %v5608_v10, %v7571_v18  ;;  %v1228_v15 = vpack.c.bf16 %v1164_v13, %v1164_v13  ;;  %v1200_v37 = vmul.f32 %v5763_v42, %v7574_v26  ;;  %v1302_v13 = vld [vmem:[%s7277_s2 + $0x18] sm:$0xff] }
 0x349   :  { %v1179_v0 = vmul.f32 %v5608_v10, %v7568_v17  ;;  %v2194_v28 = vunpack.c.l.b16 %v1245_v38  ;;  %v7575_v10 = vunpack.c.l.bf16 %v7573_v11 }
 0x34a   :  { %v1227_v2 = vpack.c.bf16 %v1163_v34, %v1163_v34  ;;  %v1264_v31 = vpack.c.bf16 %v1200_v37, %v1200_v37  ;;  %v1337_v34 = vunpack.c.l.bf16 %v1302_v13 }
 0x34b   :  { %v1243_v35 = vpack.c.bf16 %v1179_v0, %v1179_v0  ;;  %v2249_v40 = vpack.c.b16 %v2195_v4, %v2194_v28  ;;  %v1199_v5 = vmul.f32 %v5749_v43, %v7575_v10  ;;  %v1299_v4 = vld [vmem:[%s7277_s2] sm:$0xff]  ;;  %v1304_v10 = vld [vmem:[%s7277_s2 + $0x28] sm:$0xff] }
 0x34d   :  { %v2473_v22 = vpop.permute.xlu1 %2472  ;;  %v2192_v6 = vunpack.c.l.b16 %v1243_v35  ;;  %v1263_v16 = vpack.c.bf16 %v1199_v5, %v1199_v5  ;;  %v1300_v35 = vld [vmem:[%s7277_s2 + $0x8] sm:$0xff]  ;;  %v1338_v5 = vunpack.c.h.bf16 %v1302_v13 }
 0x34e   :  { %3803 = vmatmul.msk.bf16.gmra.mxu2 %vm1491_vm0, %v6261_v47  ;;  %3811 = vmatmul.msk.bf16.gmra.mxu3 %vm1491_vm0, %v6261_v47  ;;  %v2578_v8 = vsel %vm1491_vm0, %v2260_v56, %v2473_v22 }
 0x34f   :  { %2725 = vmatpush.bf16.msra.mxu0 %v2578_v8  ;;  %v2212_v42 = vunpack.c.l.b16 %v1263_v16 }
 0x350   :  { %3824 = vmatmul.msk.bf16.gmra.mxu1 %vm1491_vm0, %v6168_v1  ;;  %v1180_v1 = vmul.f32 %v5634_v44, %v7567_v41  ;;  %v2177_v44 = vunpack.c.l.b16 %v1228_v15  ;;  %v2213_v41 = vunpack.c.l.b16 %v1264_v31 }
 0x352   :  { %v1244_v3 = vpack.c.bf16 %v1180_v1, %v1180_v1 }
 0x353   :  { %2726 = vmatpush.bf16.msra.mxu0 %v2574_v32  ;;  %v2176_v32 = vunpack.c.l.b16 %v1227_v2 }
 0x354   :  { %v2193_v63 = vunpack.c.l.b16 %v1244_v3  ;;  %v1332_v3 = vunpack.c.h.bf16 %v1299_v4 }
 0x355   :  { %v2489_v62 = vpop.permute.xlu1 %2488  ;;  %v2240_v12 = vpack.c.b16 %v2177_v44, %v2176_v32 }
 0x356   :  { %v2610_v52 = vsel %vm1491_vm0, %v2268_v54, %v2489_v62  ;;  %v2248_v29 = vpack.c.b16 %v2193_v63, %v2192_v6  ;;  %v2258_v62 = vpack.c.b16 %v2213_v41, %v2212_v42  ;;  %v1301_v6 = vld [vmem:[%s7277_s2 + $0x10] sm:$0xff] }
 0x357   :  { %3819 = vmatmul.msk.bf16.gmra.mxu0 %vm1491_vm0, %v6261_v47  ;;  %2774 = vmatpush.bf16.msrb.mxu1 %v2610_v52  ;;  %v1336_v36 = vunpack.c.h.bf16 %v1301_v6 }
 0x358   :  { %v2530_v56 = vsel %vm1491_vm0, %v2248_v29, %v2449_v58  ;;  %v1335_v58 = vunpack.c.l.bf16 %v1301_v6 }
 0x35d   :  { %v2451_v57 = vpop.permute.xlu1 %2450 }
 0x35e   :  { %v2534_v48 = vsel %vm1491_vm0, %v2249_v40, %v2451_v57 }
 0x35f   :  { %2679 = vmatpush.bf16.msrb.mxu3 %v2534_v48  ;;  %v1333_v48 = vunpack.c.l.bf16 %v1300_v35 }
 0x360   :  { %3825 = vmatmul.msk.bf16.gmra.mxu1 %vm1491_vm0, %v6196_v39  ;;  %v7572_v39 = vpack.c.b16 %v5823_v53, %v5821_v23 }
 0x361   :  { %v1621_v22 = vpop.f32.mrf.mxu2  ;;  %v1670_v8 = vpop.f32.mrf.mxu3 }
 0x362   :  { %v6324_v57 = vadd.f32 %v1670_v8, %v1332_v3 }
 0x363   :  { %2680 = vmatpush.bf16.msrb.mxu3 %v2530_v56  ;;  %v1334_v56 = vunpack.c.h.bf16 %v1300_v35 }
 0x364   :  { %v1719_v25 = vpop.f32.mrf.mxu0 }
 0x365   :  { %v2487_v45 = vpop.permute.xlu1 %2486  ;;  %v6333_v27 = vadd.f32 %v1719_v25, %v1333_v48  ;;  %v4049_v48 = vld [vmem:[%s7276_s1 + $0x88] sm:$0xff] }
 0x366   :  { %v2606_v50 = vsel %vm1491_vm0, %v7572_v39, %v2487_v45 }
 0x367   :  { %2775 = vmatpush.bf16.msrb.mxu1 %v2606_v50  ;;  %v1303_v50 = vld [vmem:[%s7277_s2 + $0x20] sm:$0xff] }
 0x368   :  { %v1339_v44 = vunpack.c.l.bf16 %v1303_v50  ;;  %v1340_v32 = vunpack.c.h.bf16 %v1303_v50 }
 0x369   :  { %v1623_v54 = vpop.f32.mrf.mxu2  ;;  %v1672_v23 = vpop.f32.mrf.mxu3 }
 0x36a   :  { %v6343_v45 = vadd.f32 %v1623_v54, %v1335_v58  ;;  %v6345_v39 = vadd.f32 %v1672_v23, %v1336_v36 }
 0x36c   :  { %v1721_v1 = vpop.f32.mrf.mxu0  ;;  %v1813_v26 = vmax.f32 %v6343_v45, %v6345_v39 }
 0x36d   :  { %v2433_v24 = vpop.permute.xlu1 %2432  ;;  %v6357_v37 = vadd.f32 %v1721_v1, %v1337_v34  ;;  %v1311_v34 = vld [vmem:[%s7277_s2 + $0x60] sm:$0xff] }
 0x36e   :  { %v2498_v53 = vsel %vm1491_vm0, %v2240_v12, %v2433_v24  ;;  %v1341_v12 = vunpack.c.l.bf16 %v1304_v10  ;;  %v1356_v50 = vunpack.c.h.bf16 %v1311_v34 }
 0x36f   :  { %2631 = vmatpush.bf16.msrb.mxu2 %v2498_v53  ;;  %v1814_v16 = vmax.f32 %v1813_v26, %v6357_v37 }
 0x370   :  { %3826 = vmatmul.msk.bf16.gmra.mxu1 %vm1491_vm0, %v6228_v14  ;;  %v1331_v14 = vunpack.c.l.bf16 %v1299_v4 }
 0x371   :  { %v1626_v43 = vpop.f32.mrf.mxu2  ;;  %v1675_v17 = vpop.f32.mrf.mxu3 }
 0x372   :  { %v6322_v63 = vadd.f32 %v1621_v22, %v1331_v14  ;;  %v6362_v54 = vadd.f32 %v1626_v43, %v1339_v44  ;;  %v6364_v24 = vadd.f32 %v1675_v17, %v1340_v32  ;;  %v1312_v44 = vld [vmem:[%s7277_s2 + $0x68] sm:$0xff] }
 0x374   :  { %v1724_v0 = vpop.f32.mrf.mxu0  ;;  %v1808_v29 = vmax.f32 %v6322_v63, %v6324_v57  ;;  %v1818_v42 = vmax.f32 %v6362_v54, %v6364_v24 }
 0x375   :  { %v2469_v52 = vpop.permute.xlu1 %2468 }
 0x376   :  { %v2570_v38 = vsel %vm1491_vm0, %v2258_v62, %v2469_v52  ;;  %v1809_v15 = vmax.f32 %v1808_v29, %v6333_v27  ;;  %v6376_v62 = vadd.f32 %v1724_v0, %v1341_v12  ;;  %v1342_v52 = vunpack.c.h.bf16 %v1304_v10  ;;  %v4057_v29 = vld [vmem:[%s7276_s1 + $0xc8] sm:$0xff] }
 0x377   :  { %2727 = vmatpush.bf16.msra.mxu0 %v2570_v38 }
 0x378   :  { %v1819_v17 = vmax.f32 %v1818_v42, %v6376_v62 }
 0x379   :  { %v6315_v28 = vpop.f32.mrf.mxu2  ;;  %v6320_v40 = vpop.f32.mrf.mxu3 }
 0x380   :  { %3827 = vmatmul.msk.bf16.gmra.mxu1 %vm1491_vm0, %v6261_v47  ;;  %v6329_v47 = vpop.f32.mrf.mxu0 }
 0x381   :  { %v6338_v18 = vpop.f32.mrf.mxu2  ;;  %v6340_v22 = vpop.f32.mrf.mxu3 }
 0x388   :  { %v6353_v11 = vpop.f32.mrf.mxu0 }
 0x389   :  { %v6366_v23 = vpop.f32.mrf.mxu2  ;;  %v6371_v41 = vpop.f32.mrf.mxu3 }
 0x38d   :  { %v1768_v8 = vpop.f32.mrf.mxu1 }
 0x38e   :  { %v6350_v2 = vadd.f32 %v1768_v8, %v1334_v56  ;;  %v4058_v56 = vld [vmem:[%s7276_s1 + $0xd0] sm:$0xff] }
 0x390   :  { %v1810_v25 = vmax.f32 %v1809_v15, %v6350_v2  ;;  %v6378_v38 = vpop.f32.mrf.mxu0  ;;  %v1355_v15 = vunpack.c.l.bf16 %v1311_v34 }
 0x391   :  { %v1636_v14 = vpop.f32.mrf.mxu2  ;;  %v1685_v35 = vpop.f32.mrf.mxu3 }
 0x392   :  { %1811 = vmax.xlane.f32.xlu0 %v1810_v25  ;;  %v4048_v25 = vld [vmem:[%s7276_s1 + $0x80] sm:$0xff]  ;;  %v6419_v12 = vadd.f32 %v1685_v35, %v1356_v50 }
 0x394   :  { %7577 = vst [vmem:[#allocation9_spill] sm:$0xff] %v6419_v12 }
 0x395   :  { %v1770_v31 = vpop.f32.mrf.mxu1 }
 0x396   :  { %v6368_v53 = vadd.f32 %v1770_v31, %v1338_v5  ;;  %v6417_v5 = vadd.f32 %v1636_v14, %v1355_v15  ;;  %v1357_v31 = vunpack.c.l.bf16 %v1312_v44  ;;  %v1316_v15 = vld [vmem:[%s7277_s2 + $0x88] sm:$0xff] }
 0x398   :  { %v1815_v1 = vmax.f32 %v1814_v16, %v6368_v53  ;;  %v1734_v0 = vpop.f32.mrf.mxu0  ;;  %7576 = vst [vmem:[#allocation13_spill] sm:$0xff] %v6417_v5 }
 0x399   :  { %v6390_v58 = vpop.f32.mrf.mxu2  ;;  %v6395_v36 = vpop.f32.mrf.mxu3  ;;  %v6424_v42 = vadd.f32 %v1734_v0, %v1357_v31 }
 0x39a   :  { %1816 = vmax.xlane.f32.xlu2 %v1815_v1  ;;  %v1838_v1 = vmax.f32 %v6417_v5, %v6419_v12 }
 0x39b   :  { %7578 = vst [vmem:[#allocation7_spill] sm:$0xff] %v6424_v42 }
 0x39c   :  { %v1839_v14 = vmax.f32 %v1838_v1, %v6424_v42  ;;  %v1365_v1 = vunpack.c.l.bf16 %v1316_v15 }
 0x39d   :  { %v1773_v43 = vpop.f32.mrf.mxu1 }
 0x39e   :  { %v6381_v4 = vadd.f32 %v1773_v43, %v1342_v52  ;;  %v1358_v52 = vunpack.c.h.bf16 %v1312_v44  ;;  %v4056_v43 = vld [vmem:[%s7276_s1 + $0xc0] sm:$0xff] }
 0x3a0   :  { %v1820_v3 = vmax.f32 %v1819_v17, %v6381_v4  ;;  %v6406_v8 = vpop.f32.mrf.mxu0 }
 0x3a1   :  { %v1641_v26 = vpop.f32.mrf.mxu2  ;;  %v1690_v32 = vpop.f32.mrf.mxu3 }
 0x3a2   :  { %1821 = vmax.xlane.f32.xlu1 %v1820_v3 }
 0x3a5   :  { %v6387_v6 = vpop.f32.mrf.mxu1 }
 0x3a6   :  { %2466 = vrot.lane.b32.xlu0 %v4049_v48, %s4506_s26  ;;  %v1315_v48 = vld [vmem:[%s7277_s2 + $0x80] sm:$0xff] }
 0x3a7   :  { %v1364_v34 = vunpack.c.h.bf16 %v1315_v48 }
 0x3a8   :  { %v1739_v16 = vpop.f32.mrf.mxu0 }
 0x3a9   :  { %v6430_v3 = vpop.f32.mrf.mxu2  ;;  %v6438_v0 = vpop.f32.mrf.mxu3  ;;  %v6450_v31 = vadd.f32 %v1690_v32, %v1364_v34 }
 0x3ab   :  { %7581 = vst [vmem:[#allocation10_spill] sm:$0xff] %v6450_v31 }
 0x3ad   :  { %v6397_v13 = vpop.f32.mrf.mxu1 }
 0x3ae   :  { %2482 = vrot.lane.b32.xlu0 %v4057_v29, %s4506_s26 }
 0x3b0   :  { %v6444_v50 = vpop.f32.mrf.mxu0 }
 0x3b2   :  { %2484 = vrot.lane.b32.xlu2 %v4058_v56, %s4506_s26  ;;  %v1363_v56 = vunpack.c.l.bf16 %v1315_v48  ;;  %v6457_v48 = vadd.f32 %v1739_v16, %v1365_v1  ;;  %v1309_v1 = vld [vmem:[%s7277_s2 + $0x50] sm:$0xff] }
 0x3b4   :  { %v6448_v44 = vadd.f32 %v1641_v26, %v1363_v56  ;;  %7582 = vst [vmem:[#allocation5_spill] sm:$0xff] %v6457_v48  ;;  %v1306_v26 = vld [vmem:[%s7277_s2 + $0x38] sm:$0xff] }
 0x3b5   :  { %v6415_v10 = vpop.f32.mrf.mxu1  ;;  %v1345_v16 = vunpack.c.l.bf16 %v1306_v26 }
 0x3b6   :  { %2464 = vrot.lane.b32.xlu0 %v4048_v25, %s4506_s26  ;;  %7580 = vst [vmem:[#allocation21_spill] sm:$0xff] %v6448_v44 }
 0x3b8   :  { %v1744_v32 = vpop.f32.mrf.mxu0 }
 0x3bd   :  { %v1783_v17 = vpop.f32.mrf.mxu1 }
 0x3be   :  { %v6432_v35 = vadd.f32 %v1783_v17, %v1358_v52  ;;  %2480 = vrot.lane.b32.xlu0 %v4056_v43, %s4506_s26  ;;  %v1305_v52 = vld [vmem:[%s7277_s2 + $0x30] sm:$0xff]  ;;  %v1646_v43 = vpop.f32.mrf.mxu2  ;;  %v1695_v17 = vpop.f32.mrf.mxu3 }
 0x3bf   :  { %v1343_v60 = vunpack.c.l.bf16 %v1305_v52  ;;  %v1344_v19 = vunpack.c.h.bf16 %v1305_v52 }
 0x3c0   :  { %7579 = vst [vmem:[#allocation20_spill] sm:$0xff] %v6432_v35  ;;  %v1840_v29 = vmax.f32 %v1839_v14, %v6432_v35  ;;  %v1848_v14 = vmax.f32 %v6448_v44, %v6450_v31  ;;  %v6511_v42 = vpop.f32.mrf.mxu0 }
 0x3c1   :  { %v6466_v30 = vadd.f32 %v6315_v28, %v1343_v60  ;;  %v6469_v21 = vadd.f32 %v6320_v40, %v1344_v19  ;;  %v6483_v19 = vadd.f32 %v6329_v47, %v1345_v16  ;;  %v1351_v28 = vunpack.c.l.bf16 %v1309_v1 }
 0x3c2   :  { %1841 = vmax.xlane.f32.xlu1 %v1840_v29  ;;  %v1366_v29 = vunpack.c.h.bf16 %v1316_v15  ;;  %v1849_v34 = vmax.f32 %v1848_v14, %v6457_v48  ;;  %v1319_v15 = vld [vmem:[%s7277_s2 + $0xa0] sm:$0xff]  ;;  %v1346_v14 = vunpack.c.h.bf16 %v1306_v26  ;;  %v1352_v40 = vunpack.c.h.bf16 %v1309_v1  ;;  %v1320_v48 = vld [vmem:[%s7277_s2 + $0xa8] sm:$0xff]  ;;  %v1310_v26 = vld [vmem:[%s7277_s2 + $0x58] sm:$0xff] }
 0x3c3   :  { %v1823_v60 = vmax.f32 %v6466_v30, %v6469_v21  ;;  %7584 = vst [vmem:[#allocation23_spill] sm:$0xff] %v6483_v19  ;;  %v1353_v35 = vunpack.c.l.bf16 %v1310_v26 }
 0x3c4   :  { %v6509_v44 = vadd.f32 %v6371_v41, %v1352_v40 }
 0x3c5   :  { %v6446_v25 = vpop.f32.mrf.mxu1  ;;  %v1824_v12 = vmax.f32 %v1823_v60, %v6483_v19  ;;  %v6528_v40 = vadd.f32 %v6378_v38, %v1353_v35 }
 0x3c6   :  { %v6478_v51 = vpop.f32.mrf.mxu2  ;;  %v6488_v31 = vpop.f32.mrf.mxu3 }
 0x3cd   :  { %v1788_v56 = vpop.f32.mrf.mxu1 }
 0x3ce   :  { %v6463_v55 = vadd.f32 %v1788_v56, %v1366_v29  ;;  %v1371_v29 = vunpack.c.l.bf16 %v1319_v15  ;;  %v1372_v56 = vunpack.c.h.bf16 %v1319_v15  ;;  %v6497_v15 = vadd.f32 %v6387_v6, %v1346_v14  ;;  %v1700_v38 = vpop.f32.mrf.mxu3 }
 0x3d0   :  { %7583 = vst [vmem:[#allocation22_spill] sm:$0xff] %v6463_v55  ;;  %v1850_v52 = vmax.f32 %v1849_v34, %v6463_v55  ;;  %v1307_v34 = vld [vmem:[%s7277_s2 + $0x40] sm:$0xff]  ;;  %v6501_v16 = vadd.f32 %v1646_v43, %v1371_v29  ;;  %v6503_v1 = vadd.f32 %v1695_v17, %v1372_v56  ;;  %v6506_v55 = vadd.f32 %v6366_v23, %v1351_v28  ;;  %v1313_v43 = vld [vmem:[%s7277_s2 + $0x70] sm:$0xff]  ;;  %v1308_v17 = vld [vmem:[%s7277_s2 + $0x48] sm:$0xff] }
 0x3d1   :  { %v1347_v6 = vunpack.c.l.bf16 %v1307_v34  ;;  %v1348_v14 = vunpack.c.h.bf16 %v1307_v34  ;;  %v1354_v23 = vunpack.c.h.bf16 %v1310_v26  ;;  %v1825_v29 = vmax.f32 %v1824_v12, %v6497_v15 }
 0x3d2   :  { %1851 = vmax.xlane.f32.xlu1 %v1850_v52  ;;  %7585 = vst [vmem:[#allocation15_spill] sm:$0xff] %v6501_v16  ;;  %v1373_v52 = vunpack.c.l.bf16 %v1320_v48  ;;  %v1858_v41 = vmax.f32 %v6501_v16, %v6503_v1  ;;  %v1374_v28 = vunpack.c.h.bf16 %v1320_v48  ;;  %v1833_v60 = vmax.f32 %v6506_v55, %v6509_v44  ;;  %v1314_v48 = vld [vmem:[%s7277_s2 + $0x78] sm:$0xff] }
 0x3d3   :  { %7586 = vst [vmem:[#allocation18_spill] sm:$0xff] %v6503_v1  ;;  %v1359_v34 = vunpack.c.l.bf16 %v1313_v43  ;;  %v1360_v5 = vunpack.c.h.bf16 %v1313_v43  ;;  %v6531_v19 = vadd.f32 %v6338_v18, %v1347_v6  ;;  %v6534_v12 = vadd.f32 %v6340_v22, %v1348_v14  ;;  %v1323_v14 = vld [vmem:[%s7277_s2 + $0xc0] sm:$0xff] }
 0x3d4   :  { %v6523_v56 = vadd.f32 %v1744_v32, %v1373_v52  ;;  %v1349_v26 = vunpack.c.l.bf16 %v1308_v17  ;;  %v1651_v32 = vpop.f32.mrf.mxu2  ;;  %v6540_v52 = vadd.f32 %v6415_v10, %v1354_v23  ;;  %v1350_v1 = vunpack.c.h.bf16 %v1308_v17 }
 0x3d5   :  { %v6499_v47 = vpop.f32.mrf.mxu1  ;;  %v6546_v18 = vadd.f32 %v6390_v58, %v1359_v34  ;;  %v6549_v22 = vadd.f32 %v6395_v36, %v1360_v5  ;;  %v1361_v6 = vunpack.c.l.bf16 %v1314_v48  ;;  %v1834_v10 = vmax.f32 %v1833_v60, %v6528_v40  ;;  %v1317_v58 = vld [vmem:[%s7277_s2 + $0x90] sm:$0xff]  ;;  %v1749_v5 = vpop.f32.mrf.mxu0 }
 0x3d6   :  { %7587 = vst [vmem:[#allocation8_spill] sm:$0xff] %v6523_v56  ;;  %v1859_v43 = vmax.f32 %v1858_v41, %v6523_v56  ;;  %v1828_v17 = vmax.f32 %v6531_v19, %v6534_v12  ;;  %v6558_v23 = vadd.f32 %v6353_v11, %v1349_v26  ;;  %v1362_v41 = vunpack.c.h.bf16 %v1314_v48  ;;  %v1324_v48 = vld [vmem:[%s7277_s2 + $0xc8] sm:$0xff] }
 0x3d7   :  { %7589 = vst [vmem:[#allocation25_spill] sm:$0xff] %v6549_v22  ;;  %v6566_v34 = vadd.f32 %v6397_v13, %v1350_v1  ;;  %v1379_v60 = vunpack.c.l.bf16 %v1323_v14  ;;  %v1843_v11 = vmax.f32 %v6546_v18, %v6549_v22  ;;  %v6571_v26 = vadd.f32 %v6406_v8, %v1361_v6  ;;  %v1318_v13 = vld [vmem:[%s7277_s2 + $0x98] sm:$0xff] }
 0x3d8   :  { %v1367_v56 = vunpack.c.l.bf16 %v1317_v58  ;;  %v1368_v16 = vunpack.c.h.bf16 %v1317_v58  ;;  %v6581_v1 = vadd.f32 %v6446_v25, %v1362_v41  ;;  %v1381_v6 = vunpack.c.l.bf16 %v1324_v48  ;;  %v1325_v58 = vld [vmem:[%s7277_s2 + $0xd0] sm:$0xff] }
 0x3d9   :  { %7590 = vst [vmem:[#allocation6_spill] sm:$0xff] %v6571_v26  ;;  %v1369_v25 = vunpack.c.l.bf16 %v1318_v13 }
 0x3db   :  { %1826 = vmax.xlane.f32.xlu2 %v1825_v29 }
 0x3dc   :  { %v1653_v41 = vpop.f32.mrf.mxu2 }
 0x3dd   :  { %v1793_v35 = vpop.f32.mrf.mxu1 }
 0x3de   :  { %v6543_v29 = vadd.f32 %v1793_v35, %v1374_v28  ;;  %v1835_v28 = vmax.f32 %v1834_v10, %v6540_v52  ;;  %v1380_v35 = vunpack.c.h.bf16 %v1323_v14  ;;  %v6583_v10 = vadd.f32 %v1651_v32, %v1379_v60 }
 0x3df   :  { %v1844_v32 = vmax.f32 %v1843_v11, %v6571_v26  ;;  %v1383_v60 = vunpack.c.l.bf16 %v1325_v58  ;;  %v1382_v11 = vunpack.c.h.bf16 %v1324_v48 }
 0x3e0   :  { %7588 = vst [vmem:[#allocation24_spill] sm:$0xff] %v6543_v29  ;;  %v1860_v36 = vmax.f32 %v1859_v43, %v6543_v29  ;;  %v1829_v43 = vmax.f32 %v1828_v17, %v6558_v23  ;;  %v6585_v8 = vadd.f32 %v1700_v38, %v1380_v35  ;;  %v6592_v17 = vadd.f32 %v6430_v3, %v1367_v56  ;;  %v1702_v29 = vpop.f32.mrf.mxu3  ;;  %v1321_v38 = vld [vmem:[%s7277_s2 + $0xb0] sm:$0xff] }
 0x3e1   :  { %7591 = vst [vmem:[#allocation14_spill] sm:$0xff] %v6583_v10  ;;  %v1370_v35 = vunpack.c.h.bf16 %v1318_v13  ;;  %v6604_v56 = vadd.f32 %v1749_v5, %v1381_v6  ;;  %v1375_v13 = vunpack.c.l.bf16 %v1321_v38  ;;  %v1376_v22 = vunpack.c.h.bf16 %v1321_v38  ;;  %v1322_v5 = vld [vmem:[%s7277_s2 + $0xb8] sm:$0xff] }
 0x3e2   :  { %1861 = vmax.xlane.f32.xlu1 %v1860_v36  ;;  %7592 = vst [vmem:[#allocation12_spill] sm:$0xff] %v6585_v8  ;;  %v1830_v36 = vmax.f32 %v1829_v43, %v6566_v34  ;;  %v1845_v43 = vmax.f32 %v1844_v32, %v6581_v1  ;;  %v1868_v3 = vmax.f32 %v6583_v10, %v6585_v8  ;;  %v1751_v32 = vpop.f32.mrf.mxu0 }
 0x3e3   :  { %1836 = vmax.xlane.f32.xlu2 %v1835_v28  ;;  %v6595_v28 = vadd.f32 %v6438_v0, %v1368_v16  ;;  %7594 = vst [vmem:[#allocation19_spill] sm:$0xff] %v6604_v56  ;;  %v1384_v0 = vunpack.c.h.bf16 %v1325_v58  ;;  %v1326_v16 = vld [vmem:[%s7277_s2 + $0xd8] sm:$0xff]  ;;  %v6618_v58 = vadd.f32 %v6499_v47, %v1370_v35  ;;  %v6621_v10 = vadd.f32 %v1653_v41, %v1383_v60 }
 0x3e4   :  { %v1385_v6 = vunpack.c.l.bf16 %v1326_v16  ;;  %v1869_v48 = vmax.f32 %v1868_v3, %v6604_v56  ;;  %v6631_v38 = vadd.f32 %v6478_v51, %v1375_v13  ;;  %v1377_v47 = vunpack.c.l.bf16 %v1322_v5 }
 0x3e5   :  { %v1795_v14 = vpop.f32.mrf.mxu1  ;;  %7593 = vst [vmem:[#allocation11_spill] sm:$0xff] %v6595_v28  ;;  %v1853_v26 = vmax.f32 %v6592_v17, %v6595_v28  ;;  %v6623_v28 = vadd.f32 %v1702_v29, %v1384_v0  ;;  %v1656_v29 = vpop.f32.mrf.mxu2  ;;  %v1378_v0 = vunpack.c.h.bf16 %v1322_v5 }
 0x3e6   :  { %v6649_v13 = vadd.f32 %v6511_v42, %v1377_v47 }
 0x3e8   :  { %1831 = vmax.xlane.f32.xlu0 %v1830_v36  ;;  %v6612_v36 = vadd.f32 %v6444_v50, %v1369_v25  ;;  %v1327_v50 = vld [vmem:[%s7277_s2 + $0xe0] sm:$0xff]  ;;  %v1705_v3 = vpop.f32.mrf.mxu3 }
 0x3e9   :  { %v1387_v60 = vunpack.c.l.bf16 %v1327_v50  ;;  %v1388_v51 = vunpack.c.h.bf16 %v1327_v50 }
 0x3ea   :  { %v1854_v35 = vmax.f32 %v1853_v26, %v6612_v36 }
 0x3eb   :  { %1846 = vmax.xlane.f32.xlu2 %v1845_v43  ;;  %v6634_v43 = vadd.f32 %v6488_v31, %v1376_v22  ;;  %v1328_v31 = vld [vmem:[%s7277_s2 + $0xe8] sm:$0xff]  ;;  %v1386_v22 = vunpack.c.h.bf16 %v1326_v16  ;;  %v6655_v50 = vadd.f32 %v1705_v3, %v1388_v51  ;;  %v1329_v16 = vld [vmem:[%s7277_s2 + $0xf0] sm:$0xff] }
 0x3ec   :  { %v1855_v56 = vmax.f32 %v1854_v35, %v6618_v58  ;;  %v1389_v5 = vunpack.c.l.bf16 %v1328_v31  ;;  %v6651_v35 = vadd.f32 %v1795_v14, %v1378_v0  ;;  %v1391_v47 = vunpack.c.l.bf16 %v1329_v16  ;;  %v1330_v0 = vld [vmem:[%s7277_s2 + $0xf8] sm:$0xff] }
 0x3ed   :  { %v1798_v8 = vpop.f32.mrf.mxu1  ;;  %v1863_v26 = vmax.f32 %v6631_v38, %v6634_v43  ;;  %7597 = vst [vmem:[#allocation44_spill] sm:$0xff] %v6655_v50  ;;  %v1392_v3 = vunpack.c.h.bf16 %v1329_v16  ;;  %v1390_v51 = vunpack.c.h.bf16 %v1328_v31 }
 0x3ee   :  { %v6628_v25 = vadd.f32 %v1798_v8, %v1382_v11  ;;  %v1873_v8 = vmax.f32 %v6621_v10, %v6623_v28  ;;  %v6641_v11 = vadd.f32 %v1751_v32, %v1385_v6  ;;  %v6653_v6 = vadd.f32 %v1656_v29, %v1387_v60 }
 0x3ef   :  { %v1864_v42 = vmax.f32 %v1863_v26, %v6649_v13  ;;  %v1393_v26 = vunpack.c.l.bf16 %v1330_v0 }
 0x3f0   :  { %7595 = vst [vmem:[#allocation17_spill] sm:$0xff] %v6628_v25  ;;  %v1870_v41 = vmax.f32 %v1869_v48, %v6628_v25  ;;  %v1754_v48 = vpop.f32.mrf.mxu0  ;;  %v1874_v25 = vmax.f32 %v1873_v8, %v6641_v11  ;;  %v1878_v60 = vmax.f32 %v6653_v6, %v6655_v50  ;;  %v1658_v8 = vpop.f32.mrf.mxu2  ;;  %v1394_v50 = vunpack.c.h.bf16 %v1330_v0 }
 0x3f1   :  { %7596 = vst [vmem:[#allocation16_spill] sm:$0xff] %v6653_v6  ;;  %v1865_v14 = vmax.f32 %v1864_v42, %v6651_v35  ;;  %v6668_v29 = vadd.f32 %v1754_v48, %v1389_v5  ;;  %v6674_v42 = vadd.f32 %v1658_v8, %v1391_v47 }
 0x3f2   :  { %1871 = vmax.xlane.f32.xlu1 %v1870_v41 }
 0x3f3   :  { %1856 = vmax.xlane.f32.xlu2 %v1855_v56 }
 0x3f5   :  { %v1800_v32 = vpop.f32.mrf.mxu1 }
 0x3f6   :  { %v6660_v41 = vadd.f32 %v1800_v32, %v1386_v22  ;;  %v1707_v22 = vpop.f32.mrf.mxu3  ;;  %v1879_v32 = vmax.f32 %v1878_v60, %v6668_v29 }
 0x3f8   :  { %7598 = vst [vmem:[#allocation45_spill] sm:$0xff] %v6660_v41  ;;  %v1875_v56 = vmax.f32 %v1874_v25, %v6660_v41  ;;  %v6676_v41 = vadd.f32 %v1707_v22, %v1392_v3  ;;  %v1756_v48 = vpop.f32.mrf.mxu0 }
 0x3f9   :  { %v6683_v31 = vadd.f32 %v1756_v48, %v1393_v26 }
 0x3fa   :  { %1876 = vmax.xlane.f32.xlu0 %v1875_v56  ;;  %v1883_v56 = vmax.f32 %v6674_v42, %v6676_v41 }
 0x3fb   :  { %1866 = vmax.xlane.f32.xlu2 %v1865_v14 }
 0x3fc   :  { %v1884_v60 = vmax.f32 %v1883_v56, %v6683_v31 }
 0x3fd   :  { %v1803_v25 = vpop.f32.mrf.mxu1 }
 0x3fe   :  { %v6678_v5 = vadd.f32 %v1803_v25, %v1390_v51 }
 0x400   :  { %v1880_v16 = vmax.f32 %v1879_v32, %v6678_v5 }
 0x403   :  { %1881 = vmax.xlane.f32.xlu2 %v1880_v16 }
 0x405   :  { %v1805_v14 = vpop.f32.mrf.mxu1  ;;  %v1812_v6 = vpop.xlane.xlu0 %1811 }
 0x406   :  { %v6686_v47 = vadd.f32 %v1805_v14, %v1394_v50  ;;  %v1888_v51 = vsub.f32 %v6322_v63, %v1812_v6  ;;  %v1889_v8 = vsub.f32 %v6324_v57, %v1812_v6  ;;  %v7599_v63 = vpack.c.b16 %v5791_v61, %v5789_v7 }
 0x408   :  { %v1885_v3 = vmax.f32 %v1884_v60, %v6686_v47  ;;  %v1952_v22 = vmul.f32 1.442695, %v1888_v51  ;;  %v1954_v25 = vmul.f32 1.442695, %v1889_v8 }
 0x40a   :  { %1886 = vmax.xlane.f32.xlu1 %v1885_v3  ;;  %4285 = vpow2.f32 %v1952_v22 }
 0x40b   :  { %4287 = vpow2.f32 %v1954_v25 }
 0x40d   :  { %v1817_v32 = vpop.xlane.xlu2 %1816 }
 0x40e   :  { %v1892_v26 = vsub.f32 %v6343_v45, %v1817_v32  ;;  %v1893_v0 = vsub.f32 %v6345_v39, %v1817_v32  ;;  %v7600_v39 = vpack.c.b16 %v5734_v9, %v5732_v46  ;;  %v1894_v22 = vsub.f32 %v6357_v37, %v1817_v32 }
 0x40f   :  { %v1895_v46 = vsub.f32 %v6368_v53, %v1817_v32  ;;  %v1891_v9 = vsub.f32 %v6350_v2, %v1812_v6  ;;  %v7603_v32 = vld [vmem:[#allocation30_spill] sm:$0xff]  ;;  %v7604_v2 = vld [vmem:[#allocation29_spill] sm:$0xff] }
 0x410   :  { %v1960_v48 = vmul.f32 1.442695, %v1892_v26  ;;  %v1962_v16 = vmul.f32 1.442695, %v1893_v0  ;;  %v4286_v56 = vpop.eup %4285  ;;  %v1890_v26 = vsub.f32 %v6333_v27, %v1812_v6  ;;  %v1964_v7 = vmul.f32 1.442695, %v1894_v22 }
 0x411   :  { %v4288_v14 = vpop.eup %4287  ;;  %v1966_v37 = vmul.f32 1.442695, %v1895_v46  ;;  %v7605_v6 = vpack.c.b16 %v7603_v32, %v7604_v2 }
 0x412   :  { %4289 = vpow2.f32 %v1960_v48  ;;  %v1956_v61 = vmul.f32 1.442695, %v1890_v26  ;;  %v7601_v48 = vpack.c.b16 %v5741_v49, %v5739_v20 }
 0x413   :  { %4291 = vpow2.f32 %v1962_v16 }
 0x414   :  { %4293 = vpow2.f32 %v1964_v7 }
 0x415   :  { %v2485_v50 = vpop.permute.xlu2 %2484  ;;  %4295 = vpow2.f32 %v1956_v61 }
 0x416   :  { %v2602_v57 = vsel %vm1491_vm0, %v7599_v63, %v2485_v50  ;;  %4297 = vpow2.f32 %v1966_v37 }
 0x417   :  { %2776 = vmatpush.bf16.msrb.mxu1 %v2602_v57 }
 0x418   :  { %v4290_v60 = vpop.eup %4289  ;;  %v2467_v3 = vpop.permute.xlu0 %2466 }
 0x419   :  { %v4292_v45 = vpop.eup %4291  ;;  %v2566_v51 = vsel %vm1491_vm0, %v7600_v39, %v2467_v3  ;;  %v2080_v8 = vpack.c.bf16 %v4290_v60, %v4286_v56  ;;  %v1958_v56 = vmul.f32 1.442695, %v1891_v9 }
 0x41a   :  { %2728 = vmatpush.bf16.msra.mxu0 %v2566_v51  ;;  %v2081_v25 = vpack.c.bf16 %v4292_v45, %v4288_v14  ;;  %v4294_v50 = vpop.eup %4293  ;;  %v7602_v14 = vpack.c.b16 %v5665_v59, %v5663_v33  ;;  %v1822_v33 = vpop.xlane.xlu1 %1821 }
 0x41b   :  { %2632 = vmatmul.bf16.vlgmr.msrb.gmra.mxu2 %v2080_v8  ;;  %v4296_v57 = vpop.eup %4295  ;;  %4299 = vpow2.f32 %v1958_v56  ;;  %v1896_v59 = vsub.f32 %v6362_v54, %v1822_v33  ;;  %v1897_v39 = vsub.f32 %v6364_v24, %v1822_v33  ;;  %v1898_v51 = vsub.f32 %v6376_v62, %v1822_v33 }
 0x41c   :  { %2681 = vmatmul.bf16.vlgmr.msrb.gmra.mxu3 %v2081_v25  ;;  %v2082_v20 = vpack.c.bf16 %v4294_v50, %v4296_v57  ;;  %v4298_v49 = vpop.eup %4297  ;;  %v1899_v8 = vsub.f32 %v6381_v4, %v1822_v33 }
 0x41d   :  { %v1968_v22 = vmul.f32 1.442695, %v1896_v59  ;;  %v1970_v25 = vmul.f32 1.442695, %v1897_v39  ;;  %v1972_v26 = vmul.f32 1.442695, %v1898_v51 }
 0x41e   :  { %v1974_v7 = vmul.f32 1.442695, %v1899_v8 }
 0x41f   :  { %4301 = vpow2.f32 %v1968_v22 }
 0x420   :  { %v2483_v0 = vpop.permute.xlu0 %2482  ;;  %4303 = vpow2.f32 %v1970_v25 }
 0x421   :  { %v2598_v16 = vsel %vm1491_vm0, %v7601_v48, %v2483_v0  ;;  %v4300_v3 = vpop.eup %4299  ;;  %4305 = vpow2.f32 %v1972_v26 }
 0x422   :  { %2777 = vmatpush.bf16.msrb.mxu1 %v2598_v16  ;;  %v2083_v45 = vpack.c.bf16 %v4298_v49, %v4300_v3  ;;  %v7606_v16 = vld [vmem:[#allocation23_spill] sm:$0xff]  ;;  %4307 = vpow2.f32 %v1974_v7  ;;  %v7607_v7 = vld [vmem:[#allocation13_spill] sm:$0xff] }
 0x425   :  { %v4302_v37 = vpop.eup %4301 }
 0x426   :  { %v4304_v50 = vpop.eup %4303 }
 0x427   :  { %v4306_v56 = vpop.eup %4305 }
 0x428   :  { %v2465_v27 = vpop.permute.xlu0 %2464 }
 0x429   :  { %v2562_v63 = vsel %vm1491_vm0, %v7602_v14, %v2465_v27  ;;  %v4308_v27 = vpop.eup %4307 }
 0x42a   :  { %2729 = vmatpush.bf16.msra.mxu0 %v2562_v63 }
 0x42d   :  { %2730 = vmatmul.bf16.vlgmr.msra.gmra.mxu0 %v2082_v20 }
 0x430   :  { %v2481_v53 = vpop.permute.xlu0 %2480 }
 0x431   :  { %v2594_v60 = vsel %vm1491_vm0, %v7605_v6, %v2481_v53 }
 0x432   :  { %2778 = vmatpush.bf16.msrb.mxu1 %v2594_v60 }
 0x435   :  { %2779 = vmatmul.bf16.vlgmr.msrb.gmra.mxu1 %v2083_v45 }
 0x44e   :  { %v1827_v61 = vpop.xlane.xlu2 %1826 }
 0x44f   :  { %v1900_v0 = vsub.f32 %v6466_v30, %v1827_v61  ;;  %v1901_v48 = vsub.f32 %v6469_v21, %v1827_v61  ;;  %v1902_v46 = vsub.f32 %v7606_v16, %v1827_v61  ;;  %v1903_v54 = vsub.f32 %v6497_v15, %v1827_v61 }
 0x451   :  { %v1976_v24 = vmul.f32 1.442695, %v1900_v0  ;;  %v1978_v62 = vmul.f32 1.442695, %v1901_v48  ;;  %v1980_v9 = vmul.f32 1.442695, %v1902_v46 }
 0x452   :  { %v1982_v4 = vmul.f32 1.442695, %v1903_v54  ;;  %v7608_v48 = vld [vmem:[#allocation9_spill] sm:$0xff] }
 0x453   :  { %4309 = vpow2.f32 %v1976_v24 }
 0x454   :  { %4311 = vpow2.f32 %v1978_v62  ;;  %v7609_v62 = vld [vmem:[#allocation25_spill] sm:$0xff] }
 0x455   :  { %4313 = vpow2.f32 %v1980_v9 }
 0x456   :  { %4315 = vpow2.f32 %v1982_v4  ;;  %v1837_v30 = vpop.xlane.xlu2 %1836 }
 0x457   :  { %v1908_v21 = vsub.f32 %v6506_v55, %v1837_v30  ;;  %v1909_v15 = vsub.f32 %v6509_v44, %v1837_v30  ;;  %v1910_v63 = vsub.f32 %v6528_v40, %v1837_v30  ;;  %v1911_v39 = vsub.f32 %v6540_v52, %v1837_v30  ;;  %v7610_v30 = vld [vmem:[#allocation6_spill] sm:$0xff] }
 0x459   :  { %v4310_v14 = vpop.eup %4309  ;;  %v1992_v53 = vmul.f32 1.442695, %v1908_v21  ;;  %v1994_v60 = vmul.f32 1.442695, %v1909_v15  ;;  %v1996_v33 = vmul.f32 1.442695, %v1910_v63 }
 0x45a   :  { %v4312_v57 = vpop.eup %4311  ;;  %v2084_v20 = vpack.c.bf16 %v4310_v14, %v4302_v37  ;;  %v1998_v22 = vmul.f32 1.442695, %v1911_v39  ;;  %v7611_v63 = vld [vmem:[#allocation7_spill] sm:$0xff] }
 0x45b   :  { %v4314_v49 = vpop.eup %4313  ;;  %v1832_v32 = vpop.xlane.xlu0 %1831  ;;  %v2085_v2 = vpack.c.bf16 %v4312_v57, %v4304_v50  ;;  %4317 = vpow2.f32 %v1992_v53  ;;  %v7612_v53 = vld [vmem:[#allocation20_spill] sm:$0xff] }
 0x45c   :  { %v4316_v6 = vpop.eup %4315  ;;  %v1904_v3 = vsub.f32 %v6531_v19, %v1832_v32  ;;  %v1905_v45 = vsub.f32 %v6534_v12, %v1832_v32  ;;  %v1906_v55 = vsub.f32 %v6558_v23, %v1832_v32  ;;  %2637 = vmatmul.bf16.gmra.mxu2 %v2084_v20  ;;  %v1907_v44 = vsub.f32 %v6566_v34, %v1832_v32  ;;  %v1842_v23 = vpop.xlane.xlu1 %1841 }
 0x45d   :  { %2686 = vmatmul.bf16.gmra.mxu3 %v2085_v2  ;;  %v2086_v40 = vpack.c.bf16 %v4314_v49, %v4306_v56  ;;  %v2087_v59 = vpack.c.bf16 %v4316_v6, %v4308_v27  ;;  %4319 = vpow2.f32 %v1994_v60  ;;  %v1912_v61 = vsub.f32 %v7607_v7, %v1842_v23 }
 0x45e   :  { %v1984_v51 = vmul.f32 1.442695, %v1904_v3  ;;  %v1986_v8 = vmul.f32 1.442695, %v1905_v45  ;;  %v1988_v19 = vmul.f32 1.442695, %v1906_v55  ;;  %4321 = vpow2.f32 %v1996_v33  ;;  %v1847_v26 = vpop.xlane.xlu2 %1846 }
 0x45f   :  { %2735 = vmatmul.bf16.gmra.mxu0 %v2086_v40  ;;  %2784 = vmatmul.bf16.gmra.mxu1 %v2087_v59  ;;  %v1990_v12 = vmul.f32 1.442695, %v1907_v44  ;;  %v1913_v16 = vsub.f32 %v7608_v48, %v1842_v23  ;;  %v1916_v54 = vsub.f32 %v6546_v18, %v1847_v26  ;;  %v1917_v9 = vsub.f32 %v7609_v62, %v1847_v26  ;;  %v7613_v59 = vld [vmem:[#allocation21_spill] sm:$0xff] }
 0x460   :  { %4323 = vpow2.f32 %v1984_v51  ;;  %v2000_v50 = vmul.f32 1.442695, %v1912_v61  ;;  %v1918_v56 = vsub.f32 %v7610_v30, %v1847_v26  ;;  %v1919_v14 = vsub.f32 %v6581_v1, %v1847_v26 }
 0x461   :  { %4325 = vpow2.f32 %v1986_v8  ;;  %v4318_v34 = vpop.eup %4317  ;;  %v2002_v15 = vmul.f32 1.442695, %v1913_v16  ;;  %v1914_v57 = vsub.f32 %v7611_v63, %v1842_v23  ;;  %v2008_v20 = vmul.f32 1.442695, %v1916_v54  ;;  %v7614_v8 = vld [vmem:[#allocation10_spill] sm:$0xff]  ;;  %v7616_v54 = vld [vmem:[#allocation5_spill] sm:$0xff] }
 0x462   :  { %4327 = vpow2.f32 %v1988_v19  ;;  %v1915_v32 = vsub.f32 %v7612_v53, %v1842_v23  ;;  %v2010_v2 = vmul.f32 1.442695, %v1917_v9  ;;  %v2012_v6 = vmul.f32 1.442695, %v1918_v56 }
 0x463   :  { %4329 = vpow2.f32 %v1990_v12  ;;  %v4320_v25 = vpop.eup %4319  ;;  %v2014_v60 = vmul.f32 1.442695, %v1919_v14  ;;  %v2004_v3 = vmul.f32 1.442695, %v1914_v57  ;;  %v7618_v57 = vld [vmem:[#allocation15_spill] sm:$0xff] }
 0x464   :  { %4331 = vpow2.f32 %v1998_v22  ;;  %v4322_v52 = vpop.eup %4321  ;;  %v2006_v45 = vmul.f32 1.442695, %v1915_v32  ;;  %v1852_v1 = vpop.xlane.xlu1 %1851 }
 0x465   :  { %4333 = vpow2.f32 %v2000_v50  ;;  %v1920_v39 = vsub.f32 %v7613_v59, %v1852_v1  ;;  %v1921_v19 = vsub.f32 %v7614_v8, %v1852_v1 }
 0x466   :  { %v4324_v0 = vpop.eup %4323  ;;  %4335 = vpow2.f32 %v2002_v15  ;;  %v1857_v44 = vpop.xlane.xlu2 %1856 }
 0x467   :  { %v4326_v46 = vpop.eup %4325  ;;  %v2088_v4 = vpack.c.bf16 %v4318_v34, %v4324_v0  ;;  %4337 = vpow2.f32 %v2008_v20  ;;  %v1924_v22 = vsub.f32 %v6592_v17, %v1857_v44  ;;  %v7615_v34 = vld [vmem:[#allocation11_spill] sm:$0xff]  ;;  %v2016_v7 = vmul.f32 1.442695, %v1920_v39  ;;  %v7620_v39 = vld [vmem:[#allocation8_spill] sm:$0xff] }
 0x468   :  { %v4328_v24 = vpop.eup %4327  ;;  %v2089_v21 = vpack.c.bf16 %v4320_v25, %v4326_v46  ;;  %4339 = vpow2.f32 %v2010_v2  ;;  %v1925_v25 = vsub.f32 %v7615_v34, %v1857_v44  ;;  %v1926_v61 = vsub.f32 %v6612_v36, %v1857_v44 }
 0x469   :  { %v4330_v37 = vpop.eup %4329  ;;  %v2090_v49 = vpack.c.bf16 %v4322_v52, %v4328_v24  ;;  %4341 = vpow2.f32 %v2012_v6  ;;  %v2018_v16 = vmul.f32 1.442695, %v1921_v19  ;;  %v1927_v46 = vsub.f32 %v6618_v58, %v1857_v44 }
 0x46a   :  { %v4332_v27 = vpop.eup %4331  ;;  %4343 = vpow2.f32 %v2014_v60  ;;  %v1922_v24 = vsub.f32 %v7616_v54, %v1852_v1  ;;  %v2024_v62 = vmul.f32 1.442695, %v1924_v22  ;;  %v2026_v50 = vmul.f32 1.442695, %v1925_v25 }
 0x46b   :  { %v2091_v18 = vpack.c.bf16 %v4332_v27, %v4330_v37  ;;  %v4334_v55 = vpop.eup %4333  ;;  %4345 = vpow2.f32 %v2004_v3  ;;  %v2028_v30 = vmul.f32 1.442695, %v1926_v61  ;;  %v2030_v36 = vmul.f32 1.442695, %v1927_v46  ;;  %v7623_v46 = vld [vmem:[#allocation12_spill] sm:$0xff] }
 0x46c   :  { %2642 = vmatmul.bf16.gmra.mxu2 %v2088_v4  ;;  %v4336_v33 = vpop.eup %4335  ;;  %4347 = vpow2.f32 %v2006_v45  ;;  %v7617_v4 = vld [vmem:[#allocation22_spill] sm:$0xff]  ;;  %v2020_v56 = vmul.f32 1.442695, %v1922_v24  ;;  %v1862_v58 = vpop.xlane.xlu1 %1861 }
 0x46d   :  { %2691 = vmatmul.bf16.gmra.mxu3 %v2089_v21  ;;  %v4338_v40 = vpop.eup %4337  ;;  %v1923_v37 = vsub.f32 %v7617_v4, %v1852_v1  ;;  %4349 = vpow2.f32 %v2016_v7  ;;  %v1928_v20 = vsub.f32 %v7618_v57, %v1862_v58  ;;  %v1877_v7 = vpop.xlane.xlu0 %1876 }
 0x46e   :  { %v4340_v51 = vpop.eup %4339  ;;  %v2092_v26 = vpack.c.bf16 %v4338_v40, %v4334_v55  ;;  %4351 = vpow2.f32 %v2018_v16  ;;  %v1867_v14 = vpop.xlane.xlu2 %1866 }
 0x46f   :  { %2740 = vmatmul.bf16.gmra.mxu0 %v2090_v49  ;;  %2789 = vmatmul.bf16.gmra.mxu1 %v2091_v18  ;;  %v4342_v12 = vpop.eup %4341  ;;  %v2093_v0 = vpack.c.bf16 %v4340_v51, %v4336_v33  ;;  %4353 = vpow2.f32 %v2024_v62  ;;  %v2022_v21 = vmul.f32 1.442695, %v1923_v37  ;;  %v7619_v18 = vld [vmem:[#allocation18_spill] sm:$0xff]  ;;  %v1932_v2 = vsub.f32 %v6631_v38, %v1867_v14 }
 0x470   :  { %v4344_v23 = vpop.eup %4343  ;;  %4355 = vpow2.f32 %v2026_v50  ;;  %v1929_v53 = vsub.f32 %v7619_v18, %v1862_v58  ;;  %v1933_v60 = vsub.f32 %v6634_v43, %v1867_v14  ;;  %v2032_v1 = vmul.f32 1.442695, %v1928_v20  ;;  %v7626_v20 = vld [vmem:[#allocation17_spill] sm:$0xff] }
 0x471   :  { %v4346_v52 = vpop.eup %4345  ;;  %4357 = vpow2.f32 %v2028_v30  ;;  %v1934_v55 = vsub.f32 %v6649_v13, %v1867_v14  ;;  %v1935_v59 = vsub.f32 %v6651_v35, %v1867_v14  ;;  %v1930_v51 = vsub.f32 %v7620_v39, %v1862_v58 }
 0x472   :  { %v4348_v48 = vpop.eup %4347  ;;  %v2094_v9 = vpack.c.bf16 %v4342_v12, %v4346_v52  ;;  %4359 = vpow2.f32 %v2030_v36  ;;  %v2034_v40 = vmul.f32 1.442695, %v1929_v53  ;;  %v2040_v8 = vmul.f32 1.442695, %v1932_v2  ;;  %v7621_v12 = vld [vmem:[#allocation24_spill] sm:$0xff] }
 0x473   :  { %v2095_v17 = vpack.c.bf16 %v4344_v23, %v4348_v48  ;;  %v4350_v27 = vpop.eup %4349  ;;  %4361 = vpow2.f32 %v2020_v56  ;;  %v1931_v22 = vsub.f32 %v7621_v12, %v1862_v58  ;;  %v2042_v43 = vmul.f32 1.442695, %v1933_v60  ;;  %v7624_v58 = vld [vmem:[#allocation45_spill] sm:$0xff] }
 0x474   :  { %v4352_v15 = vpop.eup %4351  ;;  %4363 = vpow2.f32 %v2022_v21  ;;  %v2044_v23 = vmul.f32 1.442695, %v1934_v55  ;;  %v2046_v13 = vmul.f32 1.442695, %v1935_v59  ;;  %v2036_v34 = vmul.f32 1.442695, %v1930_v51  ;;  %v1872_v35 = vpop.xlane.xlu1 %1871 }
 0x475   :  { %v4354_v63 = vpop.eup %4353  ;;  %4365 = vpow2.f32 %v2032_v1  ;;  %v2038_v25 = vmul.f32 1.442695, %v1931_v22  ;;  %v1937_v54 = vsub.f32 %v7623_v46, %v1872_v35  ;;  %v1940_v62 = vsub.f32 %v6621_v10, %v1877_v7  ;;  %v7627_v55 = vld [vmem:[#allocation16_spill] sm:$0xff] }
 0x476   :  { %v4356_v49 = vpop.eup %4355  ;;  %v2096_v3 = vpack.c.bf16 %v4354_v63, %v4350_v27  ;;  %4367 = vpow2.f32 %v2034_v40  ;;  %v1942_v30 = vsub.f32 %v6641_v11, %v1877_v7  ;;  %v1943_v27 = vsub.f32 %v7624_v58, %v1877_v7  ;;  %v1882_v2 = vpop.xlane.xlu2 %1881  ;;  %v7628_v40 = vld [vmem:[#allocation44_spill] sm:$0xff] }
 0x477   :  { %v4358_v32 = vpop.eup %4357  ;;  %v2097_v33 = vpack.c.bf16 %v4356_v49, %v4352_v15  ;;  %4369 = vpow2.f32 %v2040_v8  ;;  %v2050_v21 = vmul.f32 1.442695, %v1937_v54  ;;  %v7625_v15 = vld [vmem:[#allocation19_spill] sm:$0xff]  ;;  %v2056_v63 = vmul.f32 1.442695, %v1940_v62 }
 0x478   :  { %v4360_v6 = vpop.eup %4359  ;;  %4371 = vpow2.f32 %v2042_v43  ;;  %v1938_v14 = vsub.f32 %v7625_v15, %v1872_v35  ;;  %v1939_v49 = vsub.f32 %v7626_v20, %v1872_v35  ;;  %v2060_v18 = vmul.f32 1.442695, %v1942_v30 }
 0x479   :  { %v4362_v45 = vpop.eup %4361  ;;  %4373 = vpow2.f32 %v2044_v23  ;;  %v2062_v11 = vmul.f32 1.442695, %v1943_v27  ;;  %v1945_v59 = vsub.f32 %v7628_v40, %v1882_v2 }
 0x47a   :  { %v4364_v44 = vpop.eup %4363  ;;  %v2098_v19 = vpack.c.bf16 %v4358_v32, %v4362_v45  ;;  %4375 = vpow2.f32 %v2046_v13  ;;  %v2052_v53 = vmul.f32 1.442695, %v1938_v14  ;;  %v2054_v32 = vmul.f32 1.442695, %v1939_v49  ;;  %v4067_v45 = vld [vmem:[%s7281_s6 + $0x18] sm:$0xff] }
 0x47b   :  { %v2099_v38 = vpack.c.bf16 %v4360_v6, %v4364_v44  ;;  %4377 = vpow2.f32 %v2036_v34  ;;  %3004 = vmatpush.bf16.msra.mxu2 %v4067_v45 }
 0x47c   :  { %2647 = vmatmul.bf16.gmra.mxu2 %v2092_v26  ;;  %v4366_v26 = vpop.eup %4365  ;;  %4379 = vpow2.f32 %v2038_v25 }
 0x47d   :  { %2696 = vmatmul.bf16.gmra.mxu3 %v2093_v0  ;;  %v4368_v52 = vpop.eup %4367  ;;  %v7622_v0 = vld [vmem:[#allocation14_spill] sm:$0xff] }
 0x47e   :  { %v4370_v61 = vpop.eup %4369  ;;  %v1936_v48 = vsub.f32 %v7622_v0, %v1872_v35  ;;  %v2066_v35 = vmul.f32 1.442695, %v1945_v59  ;;  %v1947_v0 = vsub.f32 %v6678_v5, %v1882_v2 }
 0x47f   :  { %2745 = vmatmul.bf16.gmra.mxu0 %v2094_v9  ;;  %2794 = vmatmul.bf16.gmra.mxu1 %v2095_v17  ;;  %v4372_v16 = vpop.eup %4371  ;;  %v1941_v17 = vsub.f32 %v6623_v28, %v1877_v7  ;;  %v2100_v4 = vpack.c.bf16 %v4370_v61, %v4366_v26  ;;  %v1946_v7 = vsub.f32 %v6668_v29, %v1882_v2 }
 0x480   :  { %v4374_v24 = vpop.eup %4373  ;;  %v2048_v50 = vmul.f32 1.442695, %v1936_v48  ;;  %v2101_v36 = vpack.c.bf16 %v4372_v16, %v4368_v52 }
 0x481   :  { %v4376_v9 = vpop.eup %4375  ;;  %v2058_v28 = vmul.f32 1.442695, %v1941_v17  ;;  %v2068_v54 = vmul.f32 1.442695, %v1946_v7 }
 0x482   :  { %v4378_v37 = vpop.eup %4377  ;;  %4381 = vpow2.f32 %v2048_v50 }
 0x483   :  { %v4380_v56 = vpop.eup %4379  ;;  %v2102_v57 = vpack.c.bf16 %v4374_v24, %v4378_v37  ;;  %4383 = vpow2.f32 %v2050_v21  ;;  %v2070_v24 = vmul.f32 1.442695, %v1947_v0 }
 0x484   :  { %v2103_v10 = vpack.c.bf16 %v4376_v9, %v4380_v56  ;;  %4385 = vpow2.f32 %v2056_v63 }
 0x485   :  { %4387 = vpow2.f32 %v2058_v28 }
 0x486   :  { %4389 = vpow2.f32 %v2060_v18 }
 0x487   :  { %4391 = vpow2.f32 %v2062_v11 }
 0x488   :  { %v4382_v6 = vpop.eup %4381  ;;  %4393 = vpow2.f32 %v2052_v53 }
 0x489   :  { %v4384_v60 = vpop.eup %4383  ;;  %4395 = vpow2.f32 %v2054_v32  ;;  %v4066_v32 = vld [vmem:[%s7281_s6 + $0x10] sm:$0xff] }
 0x48a   :  { %v4386_v1 = vpop.eup %4385  ;;  %3005 = vmatpush.bf16.msra.mxu2 %v4066_v32 }
 0x48b   :  { %v4388_v44 = vpop.eup %4387  ;;  %v2104_v22 = vpack.c.bf16 %v4386_v1, %v4382_v6 }
 0x48c   :  { %2652 = vmatmul.bf16.gmra.mxu2 %v2096_v3  ;;  %v1887_v3 = vpop.xlane.xlu1 %1886  ;;  %v4390_v39 = vpop.eup %4389  ;;  %v2105_v34 = vpack.c.bf16 %v4388_v44, %v4384_v60 }
 0x48d   :  { %2701 = vmatmul.bf16.gmra.mxu3 %v2097_v33  ;;  %v1944_v33 = vsub.f32 %v7627_v55, %v1882_v2  ;;  %v1948_v51 = vsub.f32 %v6674_v42, %v1887_v3  ;;  %v4392_v8 = vpop.eup %4391  ;;  %v1950_v13 = vsub.f32 %v6683_v31, %v1887_v3  ;;  %v1951_v26 = vsub.f32 %v6686_v47, %v1887_v3 }
 0x48e   :  { %v4394_v43 = vpop.eup %4393 }
 0x48f   :  { %2750 = vmatmul.bf16.gmra.mxu0 %v2098_v19  ;;  %2799 = vmatmul.bf16.gmra.mxu1 %v2099_v38  ;;  %v1949_v19 = vsub.f32 %v6676_v41, %v1887_v3  ;;  %v2064_v23 = vmul.f32 1.442695, %v1944_v33  ;;  %v4396_v25 = vpop.eup %4395  ;;  %v2072_v42 = vmul.f32 1.442695, %v1948_v51  ;;  %v2106_v61 = vpack.c.bf16 %v4390_v39, %v4394_v43 }
 0x490   :  { %v2107_v41 = vpack.c.bf16 %v4392_v8, %v4396_v25  ;;  %v2076_v16 = vmul.f32 1.442695, %v1950_v13  ;;  %v2078_v31 = vmul.f32 1.442695, %v1951_v26 }
 0x491   :  { %v2074_v48 = vmul.f32 1.442695, %v1949_v19  ;;  %4397 = vpow2.f32 %v2064_v23 }
 0x492   :  { %4399 = vpow2.f32 %v2066_v35 }
 0x493   :  { %4401 = vpow2.f32 %v2072_v42 }
 0x494   :  { %4403 = vpow2.f32 %v2074_v48  ;;  %v4065_v48 = vld [vmem:[%s7281_s6 + $0x8] sm:$0xff] }
 0x495   :  { %4405 = vpow2.f32 %v2076_v16  ;;  %3006 = vmatpush.bf16.msra.mxu2 %v4065_v48 }
 0x496   :  { %4407 = vpow2.f32 %v2078_v31 }
 0x497   :  { %v4398_v17 = vpop.eup %4397  ;;  %4409 = vpow2.f32 %v2068_v54 }
 0x498   :  { %v4400_v37 = vpop.eup %4399  ;;  %4411 = vpow2.f32 %v2070_v24 }
 0x499   :  { %v4402_v30 = vpop.eup %4401 }
 0x49a   :  { %v4404_v56 = vpop.eup %4403  ;;  %v2108_v14 = vpack.c.bf16 %v4402_v30, %v4398_v17 }
 0x49b   :  { %v4406_v21 = vpop.eup %4405 }
 0x49c   :  { %2657 = vmatmul.bf16.gmra.mxu2 %v2100_v4  ;;  %v4408_v27 = vpop.eup %4407 }
 0x49d   :  { %2706 = vmatmul.bf16.gmra.mxu3 %v2101_v36  ;;  %v4410_v63 = vpop.eup %4409 }
 0x49e   :  { %v2633_v38 = vpop.f32.mrf.mxu2  ;;  %v4412_v20 = vpop.eup %4411  ;;  %v2110_v18 = vpack.c.bf16 %v4406_v21, %v4410_v63 }
 0x49f   :  { %2755 = vmatmul.bf16.gmra.mxu0 %v2102_v57  ;;  %2804 = vmatmul.bf16.gmra.mxu1 %v2103_v10  ;;  %v2682_v12 = vpop.f32.mrf.mxu3  ;;  %v2109_v10 = vpack.c.bf16 %v4404_v56, %v4400_v37  ;;  %v2111_v11 = vpack.c.bf16 %v4408_v27, %v4412_v20 }
 0x4a0   :  { %v2683_v46 = vadd.f32 %v2682_v12, %v2633_v38 }
 0x4a6   :  { %v2635_v9 = vpop.f32.mrf.mxu2 }
 0x4a7   :  { %v2684_v5 = vpop.f32.mrf.mxu3 }
 0x4a8   :  { %v2685_v36 = vadd.f32 %v2684_v5, %v2635_v9 }
 0x4aa   :  { %v2731_v52 = vpop.f32.mrf.mxu0 }
 0x4ab   :  { %v2732_v47 = vadd.f32 %v2731_v52, %v2683_v46 }
 0x4ac   :  { %2662 = vmatmul.bf16.gmra.mxu2 %v2104_v22 }
 0x4ad   :  { %2711 = vmatmul.bf16.gmra.mxu3 %v2105_v34 }
 0x4af   :  { %2760 = vmatmul.bf16.gmra.mxu0 %v2106_v61  ;;  %2809 = vmatmul.bf16.gmra.mxu1 %v2107_v41 }
 0x4b2   :  { %v2780_v29 = vpop.f32.mrf.mxu1  ;;  %v2733_v50 = vpop.f32.mrf.mxu0 }
 0x4b3   :  { %v6776_v62 = vadd.f32 %v2780_v29, %v2732_v47  ;;  %v2734_v58 = vadd.f32 %v2733_v50, %v2685_v36 }
 0x4b5   :  { %v2820_v4 = vmax.f32 %v6776_v62, 1e-30 }
 0x4b7   :  { %4413 = vrcp.f32 %v2820_v4 }
 0x4ba   :  { %v2782_v15 = vpop.f32.mrf.mxu1 }
 0x4bb   :  { %v6779_v57 = vadd.f32 %v2782_v15, %v2734_v58 }
 0x4bc   :  { %2667 = vmatmul.bf16.gmra.mxu2 %v2108_v14 }
 0x4bd   :  { %v4414_v49 = vpop.eup %4413  ;;  %v2821_v28 = vmax.f32 %v6779_v57, 1e-30  ;;  %2716 = vmatmul.bf16.gmra.mxu3 %v2109_v10 }
 0x4be   :  { %2868 = vrot.lane.b32.xlu0 %v4414_v49, %s4506_s26 }
 0x4bf   :  { %4415 = vrcp.f32 %v2821_v28  ;;  %2765 = vmatmul.bf16.gmra.mxu0 %v2110_v18  ;;  %2814 = vmatmul.bf16.gmra.mxu1 %v2111_v11 }
 0x4c5   :  { %v4416_v53 = vpop.eup %4415 }
 0x4c6   :  { %2870 = vrot.lane.b32.xlu2 %v4416_v53, %s4506_s26 }
 0x4dc   :  { %v2736_v2 = vpop.f32.mrf.mxu0  ;;  %v2785_v6 = vpop.f32.mrf.mxu1 }
 0x4df   :  { %v2638_v60 = vpop.f32.mrf.mxu2 }
 0x4e0   :  { %v2687_v3 = vpop.f32.mrf.mxu3 }
 0x4e1   :  { %v2688_v45 = vadd.f32 %v2687_v3, %v2638_v60 }
 0x4e3   :  { %v2737_v1 = vadd.f32 %v2736_v2, %v2688_v45 }
 0x4e4   :  { %v2738_v55 = vpop.f32.mrf.mxu0  ;;  %v2787_v33 = vpop.f32.mrf.mxu1 }
 0x4e5   :  { %v6787_v44 = vadd.f32 %v2785_v6, %v2737_v1 }
 0x4e7   :  { %v2822_v40 = vmax.f32 %v6787_v44, 1e-30  ;;  %v2640_v59 = vpop.f32.mrf.mxu2 }
 0x4e8   :  { %v2689_v39 = vpop.f32.mrf.mxu3 }
 0x4e9   :  { %4417 = vrcp.f32 %v2822_v40  ;;  %v2690_v51 = vadd.f32 %v2689_v39, %v2640_v59 }
 0x4eb   :  { %v2739_v8 = vadd.f32 %v2738_v55, %v2690_v51  ;;  %v4064_v55 = vld [vmem:[%s7281_s6] sm:$0xff]  ;;  %s3752_s6 = sshll.u32 %s7289_s14, 4  ;;  %s3753_s6 = int_to_ptr.hbm [resolvable:$true] %s3752_s6 }
 0x4ec   :  { %v2741_v19 = vpop.f32.mrf.mxu0  ;;  %v2790_v38 = vpop.f32.mrf.mxu1  ;;  %3007 = vmatpush.bf16.msra.mxu2 %v4064_v55 }
 0x4ed   :  { %v6790_v12 = vadd.f32 %v2787_v33, %v2739_v8 }
 0x4ef   :  { %v4418_v22 = vpop.eup %4417  ;;  %v2823_v43 = vmax.f32 %v6790_v12, 1e-30  ;;  %v2643_v23 = vpop.f32.mrf.mxu2 }
 0x4f0   :  { %2872 = vrot.lane.b32.xlu1 %v4418_v22, %s4506_s26  ;;  %v2692_v13 = vpop.f32.mrf.mxu3 }
 0x4f1   :  { %4419 = vrcp.f32 %v2823_v43  ;;  %v2693_v34 = vadd.f32 %v2692_v13, %v2643_v23 }
 0x4f3   :  { %v2742_v25 = vadd.f32 %v2741_v19, %v2693_v34 }
 0x4f4   :  { %v2743_v35 = vpop.f32.mrf.mxu0  ;;  %v2792_v26 = vpop.f32.mrf.mxu1 }
 0x4f5   :  { %v6794_v52 = vadd.f32 %v2790_v38, %v2742_v25 }
 0x4f7   :  { %v4420_v7 = vpop.eup %4419  ;;  %v2824_v42 = vmax.f32 %v6794_v52, 1e-30  ;;  %v2645_v61 = vpop.f32.mrf.mxu2 }
 0x4f8   :  { %2874 = vrot.lane.b32.xlu0 %v4420_v7, %s4506_s26  ;;  %v2694_v41 = vpop.f32.mrf.mxu3 }
 0x4f9   :  { %4421 = vrcp.f32 %v2824_v42  ;;  %v2695_v0 = vadd.f32 %v2694_v41, %v2645_v61 }
 0x4fb   :  { %v2744_v16 = vadd.f32 %v2743_v35, %v2695_v0 }
 0x4fc   :  { %v2746_v46 = vpop.f32.mrf.mxu0  ;;  %v2795_v31 = vpop.f32.mrf.mxu1 }
 0x4fd   :  { %v6801_v54 = vadd.f32 %v2792_v26, %v2744_v16 }
 0x4ff   :  { %v4422_v47 = vpop.eup %4421  ;;  %v2825_v24 = vmax.f32 %v6801_v54, 1e-30  ;;  %v2648_v29 = vpop.f32.mrf.mxu2 }
 0x500   :  { %v2697_v9 = vpop.f32.mrf.mxu3  ;;  %2876 = vrot.lane.b32.xlu0 %v4422_v47, %s4506_s26 }
 0x501   :  { %4423 = vrcp.f32 %v2825_v24  ;;  %v2698_v5 = vadd.f32 %v2697_v9, %v2648_v29 }
 0x503   :  { %v2747_v17 = vadd.f32 %v2746_v46, %v2698_v5 }
 0x504   :  { %v2748_v4 = vpop.f32.mrf.mxu0  ;;  %v2797_v37 = vpop.f32.mrf.mxu1 }
 0x505   :  { %v6805_v50 = vadd.f32 %v2795_v31, %v2747_v17 }
 0x507   :  { %v4424_v30 = vpop.eup %4423  ;;  %v2826_v36 = vmax.f32 %v6805_v50, 1e-30  ;;  %v2650_v56 = vpop.f32.mrf.mxu2 }
 0x508   :  { %v2699_v21 = vpop.f32.mrf.mxu3  ;;  %2878 = vrot.lane.b32.xlu2 %v4424_v30, %s4506_s26 }
 0x509   :  { %4425 = vrcp.f32 %v2826_v36  ;;  %v2700_v58 = vadd.f32 %v2699_v21, %v2650_v56 }
 0x50b   :  { %v2749_v27 = vadd.f32 %v2748_v4, %v2700_v58 }
 0x50c   :  { %v2751_v15 = vpop.f32.mrf.mxu0  ;;  %v2800_v14 = vpop.f32.mrf.mxu1 }
 0x50d   :  { %v6809_v63 = vadd.f32 %v2797_v37, %v2749_v27 }
 0x50f   :  { %v4426_v10 = vpop.eup %4425  ;;  %v2827_v20 = vmax.f32 %v6809_v63, 1e-30  ;;  %v2653_v49 = vpop.f32.mrf.mxu2 }
 0x510   :  { %v2702_v28 = vpop.f32.mrf.mxu3  ;;  %2880 = vrot.lane.b32.xlu1 %v4426_v10, %s4506_s26 }
 0x511   :  { %4427 = vrcp.f32 %v2827_v20  ;;  %v2703_v18 = vadd.f32 %v2702_v28, %v2653_v49 }
 0x513   :  { %v2752_v11 = vadd.f32 %v2751_v15, %v2703_v18 }
 0x514   :  { %v2753_v53 = vpop.f32.mrf.mxu0  ;;  %v2802_v32 = vpop.f32.mrf.mxu1 }
 0x515   :  { %v6813_v2 = vadd.f32 %v2800_v14, %v2752_v11 }
 0x517   :  { %v4428_v6 = vpop.eup %4427  ;;  %v2828_v60 = vmax.f32 %v6813_v2, 1e-30  ;;  %v2655_v3 = vpop.f32.mrf.mxu2 }
 0x518   :  { %v2704_v45 = vpop.f32.mrf.mxu3  ;;  %2882 = vrot.lane.b32.xlu0 %v4428_v6, %s4506_s26 }
 0x519   :  { %4429 = vrcp.f32 %v2828_v60  ;;  %v2705_v1 = vadd.f32 %v2704_v45, %v2655_v3 }
 0x51b   :  { %v2754_v33 = vadd.f32 %v2753_v53, %v2705_v1 }
 0x51c   :  { %v2756_v40 = vpop.f32.mrf.mxu0  ;;  %v2805_v59 = vpop.f32.mrf.mxu1 }
 0x51d   :  { %v6820_v39 = vadd.f32 %v2802_v32, %v2754_v33 }
 0x51f   :  { %v4430_v51 = vpop.eup %4429  ;;  %v2829_v8 = vmax.f32 %v6820_v39, 1e-30  ;;  %v2658_v19 = vpop.f32.mrf.mxu2 }
 0x520   :  { %v2707_v38 = vpop.f32.mrf.mxu3  ;;  %2884 = vrot.lane.b32.xlu2 %v4430_v51, %s4506_s26  ;;  %v2871_v48 = vpop.permute.xlu2 %2870 }
 0x521   :  { %4431 = vrcp.f32 %v2829_v8  ;;  %v2708_v22 = vadd.f32 %v2707_v38, %v2658_v19  ;;  %v2917_v9 = vmul.f32 %v2871_v48, %v6779_v57 }
 0x523   :  { %v2757_v43 = vadd.f32 %v2756_v40, %v2708_v22 }
 0x524   :  { %v2758_v23 = vpop.f32.mrf.mxu0  ;;  %v2807_v13 = vpop.f32.mrf.mxu1 }
 0x525   :  { %v6824_v34 = vadd.f32 %v2805_v59, %v2757_v43 }
 0x527   :  { %v4432_v25 = vpop.eup %4431  ;;  %v2830_v35 = vmax.f32 %v6824_v34, 1e-30  ;;  %v2660_v26 = vpop.f32.mrf.mxu2 }
 0x528   :  { %v2709_v7 = vpop.f32.mrf.mxu3  ;;  %2886 = vrot.lane.b32.xlu1 %v4432_v25, %s4506_s26 }
 0x529   :  { %4433 = vrcp.f32 %v2830_v35  ;;  %v2710_v42 = vadd.f32 %v2709_v7, %v2660_v26 }
 0x52b   :  { %v2759_v61 = vadd.f32 %v2758_v23, %v2710_v42 }
 0x52c   :  { %v2761_v41 = vpop.f32.mrf.mxu0  ;;  %v2810_v16 = vpop.f32.mrf.mxu1 }
 0x52d   :  { %v6828_v0 = vadd.f32 %v2807_v13, %v2759_v61 }
 0x52f   :  { %v4434_v46 = vpop.eup %4433  ;;  %v2831_v31 = vmax.f32 %v6828_v0, 1e-30  ;;  %v2663_v47 = vpop.f32.mrf.mxu2 }
 0x530   :  { %2888 = vrot.lane.b32.xlu0 %v4434_v46, %s4506_s26  ;;  %v2712_v24 = vpop.f32.mrf.mxu3  ;;  %v2869_v29 = vpop.permute.xlu0 %2868 }
 0x531   :  { %4435 = vrcp.f32 %v2831_v31  ;;  %v2713_v5 = vadd.f32 %v2712_v24, %v2663_v47  ;;  %v2916_v17 = vmul.f32 %v2869_v29, %v6776_v62 }
 0x533   :  { %v2762_v4 = vadd.f32 %v2761_v41, %v2713_v5  ;;  %v2932_v37 = vpack.c.bf16 %v2917_v9, %v2916_v17 }
 0x534   :  { %v2763_v36 = vpop.f32.mrf.mxu0  ;;  %v2812_v27 = vpop.f32.mrf.mxu1 }
 0x535   :  { %v6834_v30 = vadd.f32 %v2810_v16, %v2762_v4  ;;  %3972 = vmatmul.msk.bf16.vlgmr.msra.gmra.mxu2 %vm1491_vm0, %v2932_v37 }
 0x537   :  { %v4436_v56 = vpop.eup %4435  ;;  %v2832_v21 = vmax.f32 %v6834_v30, 1e-30  ;;  %v2665_v58 = vpop.f32.mrf.mxu2 }
 0x538   :  { %2890 = vrot.lane.b32.xlu2 %v4436_v56, %s4506_s26  ;;  %v2714_v15 = vpop.f32.mrf.mxu3 }
 0x539   :  { %4437 = vrcp.f32 %v2832_v21  ;;  %v2715_v57 = vadd.f32 %v2714_v15, %v2665_v58  ;;  %v7630_v15 = vld [vmem:[#allocation27_spill] sm:$0xff] }
 0x53b   :  { %v2764_v14 = vadd.f32 %v2763_v36, %v2715_v57  ;;  %v7629_v36 = vld [vmem:[#allocation26_spill] sm:$0xff] }
 0x53c   :  { %v2766_v28 = vpop.f32.mrf.mxu0  ;;  %v2815_v53 = vpop.f32.mrf.mxu1 }
 0x53d   :  { %v6839_v10 = vadd.f32 %v2812_v27, %v2764_v14 }
 0x53f   :  { %v4438_v62 = vpop.eup %4437  ;;  %v2833_v20 = vmax.f32 %v6839_v10, 1e-30  ;;  %v2668_v49 = vpop.f32.mrf.mxu2 }
 0x540   :  { %v2717_v18 = vpop.f32.mrf.mxu3  ;;  %2892 = vrot.lane.b32.xlu1 %v4438_v62, %s4506_s26 }
 0x541   :  { %4439 = vrcp.f32 %v2833_v20  ;;  %v2718_v11 = vadd.f32 %v2717_v18, %v2668_v49 }
 0x543   :  { %v2767_v32 = vadd.f32 %v2766_v28, %v2718_v11  ;;  %v7631_v11 = vld [vmem:[#allocation28_spill] sm:$0xff] }
 0x544   :  { %v2768_v33 = vpop.f32.mrf.mxu0  ;;  %v2817_v59 = vpop.f32.mrf.mxu1 }
 0x545   :  { %v6843_v6 = vadd.f32 %v2815_v53, %v2767_v32 }
 0x547   :  { %v4440_v60 = vpop.eup %4439  ;;  %v2834_v3 = vmax.f32 %v6843_v6, 1e-30  ;;  %v2670_v45 = vpop.f32.mrf.mxu2 }
 0x548   :  { %v2719_v1 = vpop.f32.mrf.mxu3  ;;  %2894 = vrot.lane.b32.xlu0 %v4440_v60, %s4506_s26 }
 0x549   :  { %4441 = vrcp.f32 %v2834_v3  ;;  %v2720_v55 = vadd.f32 %v2719_v1, %v2670_v45  ;;  %v7632_v45 = vld [vmem:[#allocation31_spill] sm:$0xff] }
 0x54b   :  { %v2769_v40 = vadd.f32 %v2768_v33, %v2720_v55 }
 0x54d   :  { %v2818_v51 = vadd.f32 %v2817_v59, %v2769_v40  ;;  %v7633_v40 = vld [vmem:[#allocation32_spill] sm:$0xff] }
 0x54f   :  { %v4442_v8 = vpop.eup %4441  ;;  %v2835_v19 = vmax.f32 %v2818_v51, 1e-30 }
 0x550   :  { %2896 = vrot.lane.b32.xlu2 %v4442_v8, %s4506_s26 }
 0x551   :  { %4443 = vrcp.f32 %v2835_v19 }
 0x557   :  { %v4444_v38 = vpop.eup %4443 }
 0x558   :  { %2898 = vrot.lane.b32.xlu1 %v4444_v38, %s4506_s26  ;;  %v7634_v38 = vld [vmem:[#allocation33_spill] sm:$0xff]  ;;  %s4509_s26 = smov 128  }
 0x562   :  { %v2873_v22 = vpop.permute.xlu1 %2872  ;;  %v2879_v26 = vpop.permute.xlu2 %2878 }
 0x563   :  { %v2918_v23 = vmul.f32 %v2873_v22, %v6787_v44  ;;  %v2921_v42 = vmul.f32 %v2879_v26, %v6801_v54  ;;  %v4507_v26 = vmov 64.0  }
 0x564   :  { %4445 = vrcp.f32 %v4507_v26 }
 0x56a   :  { %v2875_v43 = vpop.permute.xlu0 %2874 }
 0x56b   :  { %v2919_v13 = vmul.f32 %v2875_v43, %v6790_v12 }
 0x56d   :  { %v2933_v25 = vpack.c.bf16 %v2919_v13, %v2918_v23 }
 0x56f   :  { %3973 = vmatmul.msk.bf16.gmra.mxu2 %vm1491_vm0, %v2933_v25  ;;  %v7635_v25 = vld [vmem:[#allocation34_spill] sm:$0xff] }
 0x572   :  { %v2877_v35 = vpop.permute.xlu0 %2876 }
 0x573   :  { %v2920_v7 = vmul.f32 %v2877_v35, %v6794_v52 }
 0x575   :  { %v2934_v61 = vpack.c.bf16 %v2921_v42, %v2920_v7  ;;  %v4446_v42 = vpop.eup %4445 }
 0x576   :  { %vm3118_vm5 = vweird.f32 %v4446_v42 }
 0x57a   :  { %v2885_v12 = vpop.permute.xlu2 %2884 }
 0x57b   :  { %v2924_v47 = vmul.f32 %v2885_v12, %v6813_v2 }
 0x57f   :  { %3974 = vmatmul.msk.bf16.gmra.mxu2 %vm1491_vm0, %v2934_v61  ;;  %v3114_v61 = vmul.f32 64.0, %v4446_v42 }
 0x582   :  { %v2881_v41 = vpop.permute.xlu1 %2880 }
 0x583   :  { %v2922_v16 = vmul.f32 %v2881_v41, %v6805_v50  ;;  %v3115_v41 = vsub.f32 1.0, %v3114_v61 }
 0x58a   :  { %v2883_v48 = vpop.permute.xlu0 %2882 }
 0x58b   :  { %v2923_v44 = vmul.f32 %v2883_v48, %v6809_v63  ;;  %v6867_v63 = vld [vmem:[%s7282_s7] ss:$0 sm:$0xff]  ;;  %v3116_v48 = vmul.f32 %v4446_v42, %v3115_v41  ;;  %s4510_s7 = smov 8  }
 0x58d   :  { %v2935_v46 = vpack.c.bf16 %v2923_v44, %v2922_v16  ;;  %v3117_v16 = vadd.f32 %v4446_v42, %v3116_v48 }
 0x58f   :  { %3975 = vmatmul.msk.bf16.gmra.mxu2 %vm1491_vm0, %v2935_v46  ;;  %v6916_v44 = vsel %vm3118_vm5, %v4446_v42, %v3117_v16  ;;  %v7640_v42 = vld [vmem:[#allocation39_spill] sm:$0xff] }
 0x592   :  { %v2891_v29 = vpop.permute.xlu2 %2890 }
 0x593   :  { %v2927_v50 = vmul.f32 %v2891_v29, %v6828_v0 }
 0x59a   :  { %v2887_v31 = vpop.permute.xlu1 %2886 }
 0x59b   :  { %v2925_v52 = vmul.f32 %v2887_v31, %v6820_v39 }
 0x59d   :  { %v2936_v24 = vpack.c.bf16 %v2925_v52, %v2924_v47 }
 0x59f   :  { %3976 = vmatmul.msk.bf16.gmra.mxu2 %vm1491_vm0, %v2936_v24 }
 0x5a2   :  { %v2889_v54 = vpop.permute.xlu0 %2888 }
 0x5a3   :  { %v2926_v9 = vmul.f32 %v2889_v54, %v6824_v34 }
 0x5a5   :  { %v2937_v5 = vpack.c.bf16 %v2927_v50, %v2926_v9  ;;  %v7636_v50 = vld [vmem:[#allocation35_spill] sm:$0xff] }
 0x5aa   :  { %v2897_v14 = vpop.permute.xlu2 %2896 }
 0x5af   :  { %3977 = vmatmul.msk.bf16.gmra.mxu2 %vm1491_vm0, %v2937_v5 }
 0x5b2   :  { %v2893_v2 = vpop.permute.xlu1 %2892 }
 0x5b3   :  { %v2928_v37 = vmul.f32 %v2893_v2, %v6834_v30 }
 0x5b8   :  { %v3009_v17 = vpop.f32.mrf.mxu2 }
 0x5b9   :  { %v3010_v39 = vadd.f32 %v6867_v63, %v3009_v17 }
 0x5ba   :  { %v2895_v4 = vpop.permute.xlu0 %2894 }
 0x5bb   :  { %v6872_v56 = vadd.f32 %v3010_v39, %v7629_v36  ;;  %v2929_v34 = vmul.f32 %v2895_v4, %v6839_v10  ;;  %v2930_v10 = vmul.f32 %v2897_v14, %v6843_v6 }
 0x5bd   :  { %v2938_v0 = vpack.c.bf16 %v2929_v34, %v2928_v37  ;;  %v3065_v21 = vsel %vm1491_vm0, %v6872_v56, 0.0  ;;  %v7637_v34 = vld [vmem:[#allocation36_spill] sm:$0xff] }
 0x5be   :  { %3066 = vadd.xlane.f32.xlu0 %v3065_v21 }
 0x5bf   :  { %3978 = vmatmul.msk.bf16.gmra.mxu2 %vm1491_vm0, %v2938_v0 }
 0x5c0   :  { %v3011_v58 = vpop.f32.mrf.mxu2 }
 0x5c1   :  { %v3012_v27 = vadd.f32 %v6867_v63, %v3011_v58 }
 0x5c3   :  { %v6880_v57 = vadd.f32 %v3012_v27, %v7630_v15 }
 0x5c5   :  { %v3068_v30 = vsel %vm1491_vm0, %v6880_v57, 0.0 }
 0x5c6   :  { %3069 = vadd.xlane.f32.xlu2 %v3068_v30 }
 0x5ca   :  { %v2899_v62 = vpop.permute.xlu1 %2898 }
 0x5cb   :  { %v2931_v20 = vmul.f32 %v2899_v62, %v2818_v51 }
 0x5cd   :  { %v2939_v49 = vpack.c.bf16 %v2931_v20, %v2930_v10 }
 0x5cf   :  { %3979 = vmatmul.msk.bf16.gmra.mxu2 %vm1491_vm0, %v2939_v49 }
 0x5f2   :  { %v3014_v28 = vpop.f32.mrf.mxu2 }
 0x5f3   :  { %v3015_v18 = vadd.f32 %v6867_v63, %v3014_v28 }
 0x5f5   :  { %v6888_v53 = vadd.f32 %v3015_v18, %v7631_v11  ;;  %v7638_v18 = vld [vmem:[#allocation37_spill] sm:$0xff] }
 0x5f7   :  { %v3071_v32 = vsel %vm1491_vm0, %v6888_v53, 0.0 }
 0x5f8   :  { %3072 = vadd.xlane.f32.xlu1 %v3071_v32 }
 0x5fa   :  { %v3016_v60 = vpop.f32.mrf.mxu2 }
 0x5fb   :  { %v3017_v3 = vadd.f32 %v6867_v63, %v3016_v60 }
 0x5fd   :  { %v6894_v1 = vadd.f32 %v3017_v3, %v7632_v45 }
 0x5ff   :  { %v3074_v6 = vsel %vm1491_vm0, %v6894_v1, 0.0 }
 0x600   :  { %3075 = vadd.xlane.f32.xlu0 %v3074_v6 }
 0x602   :  { %v3019_v55 = vpop.f32.mrf.mxu2 }
 0x603   :  { %v3020_v33 = vadd.f32 %v6867_v63, %v3019_v55 }
 0x605   :  { %v6900_v59 = vadd.f32 %v3020_v33, %v7633_v40 }
 0x607   :  { %v3077_v51 = vsel %vm1491_vm0, %v6900_v59, 0.0 }
 0x608   :  { %3078 = vadd.xlane.f32.xlu2 %v3077_v51  ;;  %v7639_v51 = vld [vmem:[#allocation38_spill] sm:$0xff] }
 0x60a   :  { %v3021_v8 = vpop.f32.mrf.mxu2 }
 0x60b   :  { %v3022_v19 = vadd.f32 %v6867_v63, %v3021_v8 }
 0x60d   :  { %v6906_v22 = vadd.f32 %v3022_v19, %v7634_v38 }
 0x60f   :  { %v3080_v43 = vsel %vm1491_vm0, %v6906_v22, 0.0 }
 0x610   :  { %3081 = vadd.xlane.f32.xlu1 %v3080_v43 }
 0x612   :  { %v3024_v23 = vpop.f32.mrf.mxu2 }
 0x613   :  { %v3025_v13 = vadd.f32 %v6867_v63, %v3024_v23 }
 0x615   :  { %v6912_v35 = vadd.f32 %v3025_v13, %v7635_v25 }
 0x617   :  { %v3083_v7 = vsel %vm1491_vm0, %v6912_v35, 0.0 }
 0x618   :  { %3084 = vadd.xlane.f32.xlu1 %v3083_v7 }
 0x61a   :  { %v3026_v31 = vpop.f32.mrf.mxu2 }
 0x61b   :  { %v3027_v24 = vadd.f32 %v6867_v63, %v3026_v31 }
 0x61d   :  { %v6928_v5 = vadd.f32 %v3027_v24, %v7636_v50 }
 0x61f   :  { %v3086_v36 = vsel %vm1491_vm0, %v6928_v5, 0.0 }
 0x622   :  { %v3029_v17 = vpop.f32.mrf.mxu2 }
 0x623   :  { %v3030_v4 = vadd.f32 %v6867_v63, %v3029_v17 }
 0x625   :  { %v6940_v0 = vadd.f32 %v3030_v4, %v7637_v34 }
 0x627   :  { %v3089_v21 = vsel %vm1491_vm0, %v6940_v0, 0.0 }
 0x62a   :  { %v3031_v58 = vpop.f32.mrf.mxu2 }
 0x62b   :  { %v3032_v10 = vadd.f32 %v6867_v63, %v3031_v58 }
 0x62d   :  { %v6954_v11 = vadd.f32 %v3032_v10, %v7638_v18  ;;  %v4071_v10 = vld [vmem:[%s7285_s10 + $0x18] sm:$0xff]  ;;  %v4069_v18 = vld [vmem:[%s7285_s10 + $0x8] sm:$0xff] }
 0x62e   :  { %3536 = vmatpush.bf16.msra.mxu3 %v4071_v10 }
 0x62f   :  { %v3092_v6 = vsel %vm1491_vm0, %v6954_v11, 0.0 }
 0x631   :  { %v3067_v46 = vpop.xlane.xlu0 %3066 }
 0x632   :  { %v3120_v12 = vmul.f32 %v6916_v44, %v3067_v46  ;;  %v3034_v14 = vpop.f32.mrf.mxu2 }
 0x633   :  { %v3035_v45 = vadd.f32 %v6867_v63, %v3034_v14 }
 0x634   :  { %v6920_v47 = vsub.f32 %v6872_v56, %v3120_v12 }
 0x635   :  { %v6967_v8 = vadd.f32 %v3035_v45, %v7639_v51 }
 0x636   :  { %v3152_v52 = vmul.f32 %v6920_v47, %v6920_v47 }
 0x637   :  { %v3095_v23 = vsel %vm1491_vm0, %v6967_v8, 0.0 }
 0x638   :  { %v3168_v54 = vsel %vm1491_vm0, %v3152_v52, 0.0 }
 0x639   :  { %v3070_v29 = vpop.xlane.xlu2 %3069  ;;  %3169 = vadd.xlane.f32.xlu0 %v3168_v54  ;;  %v7641_v54 = vld [vmem:[#allocation40_spill] sm:$0xff] }
 0x63a   :  { %v3121_v9 = vmul.f32 %v6916_v44, %v3070_v29  ;;  %v3036_v3 = vpop.f32.mrf.mxu2 }
 0x63b   :  { %v3037_v43 = vadd.f32 %v6867_v63, %v3036_v3 }
 0x63c   :  { %v6931_v2 = vsub.f32 %v6880_v57, %v3121_v9 }
 0x63d   :  { %v6980_v61 = vadd.f32 %v3037_v43, %v7640_v42 }
 0x63e   :  { %v3153_v39 = vmul.f32 %v6931_v2, %v6931_v2 }
 0x63f   :  { %v3098_v12 = vsel %vm1491_vm0, %v6980_v61, 0.0 }
 0x640   :  { %v3171_v37 = vsel %vm1491_vm0, %v3153_v39, 0.0 }
 0x641   :  { %3172 = vadd.xlane.f32.xlu2 %v3171_v37  ;;  %3087 = vadd.xlane.f32.xlu0 %v3086_v36  ;;  %v7642_v37 = vld [vmem:[#allocation41_spill] sm:$0xff] }
 0x642   :  { %v3039_v25 = vpop.f32.mrf.mxu2 }
 0x643   :  { %v3040_v16 = vadd.f32 %v6867_v63, %v3039_v25 }
 0x645   :  { %v6993_v29 = vadd.f32 %v3040_v16, %v7641_v54 }
 0x647   :  { %v3101_v4 = vsel %vm1491_vm0, %v6993_v29, 0.0 }
 0x649   :  { %3090 = vadd.xlane.f32.xlu0 %v3089_v21 }
 0x64a   :  { %v3041_v24 = vpop.f32.mrf.mxu2 }
 0x64b   :  { %v3042_v17 = vadd.f32 %v6867_v63, %v3041_v24 }
 0x64d   :  { %v7005_v36 = vadd.f32 %v3042_v17, %v7642_v37  ;;  %v7644_v37 = vld [vmem:[#allocation43_spill] sm:$0xff] }
 0x64f   :  { %v3104_v58 = vsel %vm1491_vm0, %v7005_v36, 0.0 }
 0x652   :  { %v3044_v34 = vpop.f32.mrf.mxu2 }
 0x653   :  { %v3045_v21 = vadd.f32 %v6867_v63, %v3044_v34 }
 0x66b   :  { %v3073_v27 = vpop.xlane.xlu1 %3072 }
 0x66c   :  { %v3122_v15 = vmul.f32 %v6916_v44, %v3073_v27  ;;  %v7643_v27 = vld [vmem:[#allocation42_spill] sm:$0xff] }
 0x66e   :  { %v6946_v30 = vsub.f32 %v6888_v53, %v3122_v15  ;;  %v7011_v15 = vadd.f32 %v3045_v21, %v7643_v27  ;;  %v7050_v21 = vld [vmem:[%s7283_s8] ss:$0 sm:$0xff] }
 0x670   :  { %v3154_v62 = vmul.f32 %v6946_v30, %v6946_v30  ;;  %v3107_v14 = vsel %vm1491_vm0, %v7011_v15, 0.0 }
 0x672   :  { %v3174_v20 = vsel %vm1491_vm0, %v3154_v62, 0.0 }
 0x673   :  { %3175 = vadd.xlane.f32.xlu2 %v3174_v20  ;;  %v3076_v49 = vpop.xlane.xlu0 %3075 }
 0x674   :  { %v3123_v28 = vmul.f32 %v6916_v44, %v3076_v49 }
 0x676   :  { %v6957_v32 = vsub.f32 %v6894_v1, %v3123_v28  ;;  %v4070_v28 = vld [vmem:[%s7285_s10 + $0x10] sm:$0xff] }
 0x677   :  { %3537 = vmatpush.bf16.msra.mxu3 %v4070_v28 }
 0x678   :  { %v3155_v60 = vmul.f32 %v6957_v32, %v6957_v32 }
 0x67a   :  { %v3177_v55 = vsel %vm1491_vm0, %v3155_v60, 0.0 }
 0x67b   :  { %v3079_v33 = vpop.xlane.xlu2 %3078  ;;  %3093 = vadd.xlane.f32.xlu2 %v3092_v6  ;;  %3178 = vadd.xlane.f32.xlu1 %v3177_v55  ;;  %v4068_v55 = vld [vmem:[%s7285_s10] sm:$0xff] }
 0x67c   :  { %v3124_v40 = vmul.f32 %v6916_v44, %v3079_v33  ;;  %3538 = vmatpush.bf16.msra.mxu3 %v4069_v18 }
 0x67e   :  { %v6970_v19 = vsub.f32 %v6900_v59, %v3124_v40 }
 0x680   :  { %v3156_v38 = vmul.f32 %v6970_v19, %v6970_v19  ;;  %3539 = vmatpush.bf16.msra.mxu3 %v4068_v55 }
 0x682   :  { %v3180_v13 = vsel %vm1491_vm0, %v3156_v38, 0.0 }
 0x683   :  { %v3082_v26 = vpop.xlane.xlu1 %3081  ;;  %3096 = vadd.xlane.f32.xlu2 %v3095_v23  ;;  %3181 = vadd.xlane.f32.xlu1 %v3180_v13 }
 0x684   :  { %v3125_v7 = vmul.f32 %v6916_v44, %v3082_v26 }
 0x686   :  { %v6983_v41 = vsub.f32 %v6906_v22, %v3125_v7 }
 0x688   :  { %v3157_v48 = vmul.f32 %v6983_v41, %v6983_v41 }
 0x68a   :  { %v3183_v46 = vsel %vm1491_vm0, %v3157_v48, 0.0 }
 0x68b   :  { %v3085_v31 = vpop.xlane.xlu1 %3084  ;;  %3184 = vadd.xlane.f32.xlu0 %v3183_v46  ;;  %3099 = vadd.xlane.f32.xlu1 %v3098_v12  ;;  %v3046_v46 = vpop.f32.mrf.mxu2 }
 0x68c   :  { %v3126_v52 = vmul.f32 %v6916_v44, %v3085_v31  ;;  %v3047_v54 = vadd.f32 %v6867_v63, %v3046_v46 }
 0x68e   :  { %v6996_v9 = vsub.f32 %v6912_v35, %v3126_v52  ;;  %v7045_v34 = vadd.f32 %v3047_v54, %v7644_v37 }
 0x690   :  { %v3158_v50 = vmul.f32 %v6996_v9, %v6996_v9 }
 0x692   :  { %v3186_v39 = vsel %vm1491_vm0, %v3158_v50, 0.0 }
 0x693   :  { %3187 = vadd.xlane.f32.xlu0 %v3186_v39  ;;  %3102 = vadd.xlane.f32.xlu1 %v3101_v4 }
 0x69b   :  { %3105 = vadd.xlane.f32.xlu0 %v3104_v58 }
 0x6a3   :  { %3108 = vadd.xlane.f32.xlu0 %v3107_v14  ;;  %v7056_v14 = vld [vmem:[%s7284_s9] ss:$0 sm:$0xff] }
 0x6ac   :  { %v3170_v62 = vpop.xlane.xlu0 %3169 }
 0x6ad   :  { %v3216_v20 = vmul.f32 %v3170_v62, %v6916_v44 }
 0x6af   :  { %v3232_v49 = vadd.f32 1e-05, %v3216_v20  ;;  %v3110_v20 = vsel %vm1491_vm0, %v7045_v34, 0.0 }
 0x6b1   :  { %4447 = vrsqrt.f32 %v3232_v49  ;;  %vm3254_vm7 = vweird.f32 %v3232_v49 }
 0x6b4   :  { %v3173_v60 = vpop.xlane.xlu2 %3172  ;;  %v3088_v3 = vpop.xlane.xlu0 %3087 }
 0x6b5   :  { %v3217_v45 = vmul.f32 %v3173_v60, %v6916_v44  ;;  %v3127_v6 = vmul.f32 %v6916_v44, %v3088_v3 }
 0x6b7   :  { %v4448_v33 = vpop.eup %4447  ;;  %v3233_v40 = vadd.f32 1e-05, %v3217_v45  ;;  %v7031_v51 = vsub.f32 %v6928_v5, %v3127_v6 }
 0x6b8   :  { %v3249_v38 = vmul.f32 %v4448_v33, %v3232_v49  ;;  %vm3255_vm6 = vweird.f32 %v4448_v33 }
 0x6b9   :  { %4449 = vrsqrt.f32 %v3233_v40  ;;  %v3159_v43 = vmul.f32 %v7031_v51, %v7031_v51  ;;  %vm3256_vm8 = vmor %vm3254_vm7, %vm3255_vm6  ;;  %vm3264_vm10 = vweird.f32 %v3233_v40 }
 0x6ba   :  { %v3250_v23 = vmul.f32 %v4448_v33, %v3249_v38 }
 0x6bb   :  { %v3189_v13 = vsel %vm1491_vm0, %v3159_v43, 0.0 }
 0x6bc   :  { %v3251_v25 = vmul.f32 0.5, %v3250_v23  ;;  %3190 = vadd.xlane.f32.xlu2 %v3189_v13  ;;  %v3091_v26 = vpop.xlane.xlu0 %3090 }
 0x6bd   :  { %v3128_v7 = vmul.f32 %v6916_v44, %v3091_v26 }
 0x6be   :  { %v3252_v42 = vsub.f32 1.5, %v3251_v25 }
 0x6bf   :  { %v4450_v48 = vpop.eup %4449  ;;  %v7038_v16 = vsub.f32 %v6940_v0, %v3128_v7 }
 0x6c0   :  { %v3253_v12 = vmul.f32 %v4448_v33, %v3252_v42  ;;  %v3259_v31 = vmul.f32 %v4450_v48, %v3233_v40  ;;  %vm3265_vm9 = vweird.f32 %v4450_v48 }
 0x6c1   :  { %v3160_v52 = vmul.f32 %v7038_v16, %v7038_v16  ;;  %vm3266_vm11 = vmor %vm3264_vm10, %vm3265_vm9 }
 0x6c2   :  { %v3260_v24 = vmul.f32 %v4450_v48, %v3259_v31  ;;  %v3257_v17 = vsel %vm3256_vm8, %v4448_v33, %v3253_v12 }
 0x6c3   :  { %v3192_v50 = vsel %vm1491_vm0, %v3160_v52, 0.0  ;;  %v3408_v58 = vmul.f32 %v3257_v17, %v6920_v47 }
 0x6c4   :  { %v3261_v39 = vmul.f32 0.5, %v3260_v24  ;;  %3193 = vadd.xlane.f32.xlu2 %v3192_v50 }
 0x6c5   :  { %v3428_v62 = vmul.f32 %v7050_v21, %v3408_v58 }
 0x6c6   :  { %v3262_v4 = vsub.f32 1.5, %v3261_v39 }
 0x6c7   :  { %v3448_v47 = vadd.f32 %v7056_v14, %v3428_v62 }
 0x6c8   :  { %v3263_v27 = vmul.f32 %v4450_v48, %v3262_v4 }
 0x6ca   :  { %v3267_v63 = vsel %vm3266_vm11, %v4450_v48, %v3263_v27 }
 0x6cb   :  { %v3409_v10 = vmul.f32 %v3267_v63, %v6931_v2 }
 0x6cc   :  { %3111 = vadd.xlane.f32.xlu2 %v3110_v20 }
 0x6cd   :  { %v3429_v49 = vmul.f32 %v7050_v21, %v3409_v10 }
 0x6cf   :  { %v3449_v28 = vadd.f32 %v7056_v14, %v3429_v49 }
 0x6d1   :  { %v3464_v18 = vpack.c.bf16 %v3449_v28, %v3448_v47 }
 0x6d3   :  { %3996 = vmatmul.msk.bf16.vlgmr.msra.gmra.mxu3 %vm1491_vm0, %v3464_v18 }
 0x6e6   :  { %v3176_v60 = vpop.xlane.xlu2 %3175 }
 0x6e7   :  { %v3218_v3 = vmul.f32 %v3176_v60, %v6916_v44 }
 0x6e9   :  { %v3234_v45 = vadd.f32 1e-05, %v3218_v3 }
 0x6eb   :  { %4451 = vrsqrt.f32 %v3234_v45  ;;  %vm3274_vm13 = vweird.f32 %v3234_v45 }
 0x6ee   :  { %v3094_v6 = vpop.xlane.xlu2 %3093  ;;  %v3179_v2 = vpop.xlane.xlu1 %3178 }
 0x6ef   :  { %v3129_v55 = vmul.f32 %v6916_v44, %v3094_v6  ;;  %v3219_v33 = vmul.f32 %v3179_v2, %v6916_v44 }
 0x6f1   :  { %v4452_v40 = vpop.eup %4451  ;;  %v7070_v38 = vsub.f32 %v6954_v11, %v3129_v55  ;;  %v3235_v43 = vadd.f32 1e-05, %v3219_v33 }
 0x6f2   :  { %v3269_v23 = vmul.f32 %v4452_v40, %v3234_v45  ;;  %vm3275_vm12 = vweird.f32 %v4452_v40 }
 0x6f3   :  { %4453 = vrsqrt.f32 %v3235_v43  ;;  %v3161_v13 = vmul.f32 %v7070_v38, %v7070_v38  ;;  %vm3276_vm14 = vmor %vm3274_vm13, %vm3275_vm12  ;;  %vm3284_vm1 = vweird.f32 %v3235_v43 }
 0x6f4   :  { %v3270_v25 = vmul.f32 %v4452_v40, %v3269_v23 }
 0x6f5   :  { %v3195_v26 = vsel %vm1491_vm0, %v3161_v13, 0.0 }
 0x6f6   :  { %v3271_v7 = vmul.f32 0.5, %v3270_v25  ;;  %v3097_v42 = vpop.xlane.xlu2 %3096  ;;  %3196 = vadd.xlane.f32.xlu1 %v3195_v26  ;;  %v3182_v48 = vpop.xlane.xlu1 %3181 }
 0x6f7   :  { %v3130_v46 = vmul.f32 %v6916_v44, %v3097_v42  ;;  %v3220_v12 = vmul.f32 %v3182_v48, %v6916_v44 }
 0x6f8   :  { %v3272_v31 = vsub.f32 1.5, %v3271_v7 }
 0x6f9   :  { %v4454_v52 = vpop.eup %4453  ;;  %v7078_v24 = vsub.f32 %v6967_v8, %v3130_v46  ;;  %v3236_v54 = vadd.f32 1e-05, %v3220_v12 }
 0x6fa   :  { %v3273_v50 = vmul.f32 %v4452_v40, %v3272_v31  ;;  %v3279_v17 = vmul.f32 %v4454_v52, %v3235_v43  ;;  %vm3285_vm15 = vweird.f32 %v4454_v52 }
 0x6fb   :  { %4455 = vrsqrt.f32 %v3236_v54  ;;  %v3162_v39 = vmul.f32 %v7078_v24, %v7078_v24  ;;  %vm3286_vm2 = vmor %vm3284_vm1, %vm3285_vm15  ;;  %vm3294_vm4 = vweird.f32 %v3236_v54 }
 0x6fc   :  { %v3280_v4 = vmul.f32 %v4454_v52, %v3279_v17  ;;  %v3277_v58 = vsel %vm3276_vm14, %v4452_v40, %v3273_v50 }
 0x6fd   :  { %v3198_v37 = vsel %vm1491_vm0, %v3162_v39, 0.0  ;;  %v3410_v28 = vmul.f32 %v3277_v58, %v6946_v30 }
 0x6fe   :  { %v3281_v27 = vmul.f32 0.5, %v3280_v4  ;;  %3199 = vadd.xlane.f32.xlu1 %v3198_v37  ;;  %v3100_v63 = vpop.xlane.xlu1 %3099  ;;  %v3185_v62 = vpop.xlane.xlu0 %3184 }
 0x6ff   :  { %v3131_v10 = vmul.f32 %v6916_v44, %v3100_v63  ;;  %v3221_v20 = vmul.f32 %v3185_v62, %v6916_v44  ;;  %v3430_v30 = vmul.f32 %v7050_v21, %v3410_v28 }
 0x700   :  { %v3282_v49 = vsub.f32 1.5, %v3281_v27 }
 0x701   :  { %v4456_v47 = vpop.eup %4455  ;;  %v7087_v18 = vsub.f32 %v6980_v61, %v3131_v10  ;;  %v3237_v60 = vadd.f32 1e-05, %v3221_v20  ;;  %v3450_v46 = vadd.f32 %v7056_v14, %v3430_v30 }
 0x702   :  { %v3283_v3 = vmul.f32 %v4454_v52, %v3282_v49  ;;  %v3289_v45 = vmul.f32 %v4456_v47, %v3236_v54  ;;  %vm3295_vm3 = vweird.f32 %v4456_v47 }
 0x703   :  { %4457 = vrsqrt.f32 %v3237_v60  ;;  %v3163_v6 = vmul.f32 %v7087_v18, %v7087_v18  ;;  %vm3296_vm5 = vmor %vm3294_vm4, %vm3295_vm3  ;;  %vm3304_vm7 = vweird.f32 %v3237_v60 }
 0x704   :  { %v3287_v2 = vsel %vm3286_vm2, %v4454_v52, %v3283_v3  ;;  %v3290_v55 = vmul.f32 %v4456_v47, %v3289_v45 }
 0x705   :  { %v3411_v33 = vmul.f32 %v3287_v2, %v6957_v32  ;;  %v3201_v40 = vsel %vm1491_vm0, %v3163_v6, 0.0 }
 0x706   :  { %v3291_v23 = vmul.f32 0.5, %v3290_v55  ;;  %3202 = vadd.xlane.f32.xlu0 %v3201_v40  ;;  %v3103_v13 = vpop.xlane.xlu1 %3102  ;;  %v3188_v25 = vpop.xlane.xlu0 %3187 }
 0x707   :  { %v3132_v43 = vmul.f32 %v6916_v44, %v3103_v13  ;;  %v3431_v26 = vmul.f32 %v7050_v21, %v3411_v33  ;;  %v3222_v33 = vmul.f32 %v3188_v25, %v6916_v44 }
 0x708   :  { %v3292_v7 = vsub.f32 1.5, %v3291_v23 }
 0x709   :  { %v4458_v42 = vpop.eup %4457  ;;  %v7097_v48 = vsub.f32 %v6993_v29, %v3132_v43  ;;  %v3451_v32 = vadd.f32 %v7056_v14, %v3431_v26  ;;  %v3238_v23 = vadd.f32 1e-05, %v3222_v33 }
 0x70a   :  { %v3293_v12 = vmul.f32 %v4456_v47, %v3292_v7  ;;  %v3299_v31 = vmul.f32 %v4458_v42, %v3237_v60  ;;  %vm3305_vm6 = vweird.f32 %v4458_v42 }
 0x70b   :  { %v3465_v52 = vpack.c.bf16 %v3451_v32, %v3450_v46  ;;  %v3164_v50 = vmul.f32 %v7097_v48, %v7097_v48  ;;  %vm3306_vm8 = vmor %vm3304_vm7, %vm3305_vm6  ;;  %4459 = vrsqrt.f32 %v3238_v23  ;;  %vm3314_vm10 = vweird.f32 %v3238_v23 }
 0x70c   :  { %v3300_v17 = vmul.f32 %v4458_v42, %v3299_v31  ;;  %v3297_v4 = vsel %vm3296_vm5, %v4456_v47, %v3293_v12  ;;  %v4075_v31 = vld [vmem:[%s7287_s12 + $0x18] sm:$0xff] }
 0x70d   :  { %3997 = vmatmul.msk.bf16.gmra.mxu3 %vm1491_vm0, %v3465_v52  ;;  %v3204_v39 = vsel %vm1491_vm0, %v3164_v50, 0.0  ;;  %v3412_v62 = vmul.f32 %v3297_v4, %v6970_v19  ;;  %3669 = vmatpush.bf16.msrb.mxu0 %v4075_v31 }
 0x70e   :  { %v3301_v37 = vmul.f32 0.5, %v3300_v17  ;;  %3205 = vadd.xlane.f32.xlu2 %v3204_v39  ;;  %v3106_v58 = vpop.xlane.xlu0 %3105  ;;  %v4074_v39 = vld [vmem:[%s7287_s12 + $0x10] sm:$0xff] }
 0x70f   :  { %v3133_v27 = vmul.f32 %v6916_v44, %v3106_v58  ;;  %v3432_v3 = vmul.f32 %v7050_v21, %v3412_v62 }
 0x710   :  { %v3302_v63 = vsub.f32 1.5, %v3301_v37 }
 0x711   :  { %v7108_v10 = vsub.f32 %v7005_v36, %v3133_v27  ;;  %v3452_v60 = vadd.f32 %v7056_v14, %v3432_v3  ;;  %v4460_v13 = vpop.eup %4459  ;;  %3670 = vmatpush.bf16.msrb.mxu0 %v4074_v39 }
 0x712   :  { %v3303_v54 = vmul.f32 %v4458_v42, %v3302_v63  ;;  %v3309_v43 = vmul.f32 %v4460_v13, %v3238_v23  ;;  %vm3315_vm9 = vweird.f32 %v4460_v13 }
 0x713   :  { %v3165_v20 = vmul.f32 %v7108_v10, %v7108_v10  ;;  %vm3316_vm11 = vmor %vm3314_vm10, %vm3315_vm9 }
 0x714   :  { %v3307_v49 = vsel %vm3306_vm8, %v4458_v42, %v3303_v54  ;;  %v3310_v26 = vmul.f32 %v4460_v13, %v3309_v43 }
 0x715   :  { %v3413_v47 = vmul.f32 %v3307_v49, %v6983_v41  ;;  %v3207_v28 = vsel %vm1491_vm0, %v3165_v20, 0.0 }
 0x716   :  { %3208 = vadd.xlane.f32.xlu1 %v3207_v28  ;;  %v3109_v45 = vpop.xlane.xlu0 %3108  ;;  %v3311_v32 = vmul.f32 0.5, %v3310_v26 }
 0x717   :  { %v3134_v19 = vmul.f32 %v6916_v44, %v3109_v45  ;;  %v3433_v6 = vmul.f32 %v7050_v21, %v3413_v47  ;;  %v4073_v47 = vld [vmem:[%s7287_s12 + $0x8] sm:$0xff]  ;;  %v4072_v45 = vld [vmem:[%s7287_s12] sm:$0xff] }
 0x718   :  { %v3312_v25 = vsub.f32 1.5, %v3311_v32  ;;  %3671 = vmatpush.bf16.msrb.mxu0 %v4073_v47 }
 0x719   :  { %v7118_v2 = vsub.f32 %v7011_v15, %v3134_v19  ;;  %v3453_v55 = vadd.f32 %v7056_v14, %v3433_v6 }
 0x71a   :  { %v3313_v50 = vmul.f32 %v4460_v13, %v3312_v25 }
 0x71b   :  { %v3466_v41 = vpack.c.bf16 %v3453_v55, %v3452_v60  ;;  %v3166_v40 = vmul.f32 %v7118_v2, %v7118_v2 }
 0x71c   :  { %v3317_v37 = vsel %vm3316_vm11, %v4460_v13, %v3313_v50  ;;  %3672 = vmatpush.bf16.msrb.mxu0 %v4072_v45 }
 0x71d   :  { %3998 = vmatmul.msk.bf16.gmra.mxu3 %vm1491_vm0, %v3466_v41  ;;  %v3210_v30 = vsel %vm1491_vm0, %v3166_v40, 0.0  ;;  %v3414_v54 = vmul.f32 %v3317_v37, %v6996_v9 }
 0x71e   :  { %3211 = vadd.xlane.f32.xlu0 %v3210_v30 }
 0x71f   :  { %v3434_v6 = vmul.f32 %v7050_v21, %v3414_v54 }
 0x721   :  { %v3454_v55 = vadd.f32 %v7056_v14, %v3434_v6 }
 0x72f   :  { %v3191_v7 = vpop.xlane.xlu2 %3190 }
 0x730   :  { %v3223_v42 = vmul.f32 %v3191_v7, %v6916_v44 }
 0x732   :  { %v3239_v46 = vadd.f32 1e-05, %v3223_v42 }
 0x734   :  { %4461 = vrsqrt.f32 %v3239_v46  ;;  %vm3324_vm13 = vweird.f32 %v3239_v46 }
 0x737   :  { %v3194_v12 = vpop.xlane.xlu2 %3193 }
 0x738   :  { %v3224_v40 = vmul.f32 %v3194_v12, %v6916_v44 }
 0x73a   :  { %v4462_v52 = vpop.eup %4461  ;;  %v3240_v23 = vadd.f32 1e-05, %v3224_v40 }
 0x73b   :  { %v3319_v17 = vmul.f32 %v4462_v52, %v3239_v46  ;;  %vm3325_vm12 = vweird.f32 %v4462_v52 }
 0x73c   :  { %vm3326_vm14 = vmor %vm3324_vm13, %vm3325_vm12  ;;  %4463 = vrsqrt.f32 %v3240_v23  ;;  %vm3334_vm1 = vweird.f32 %v3240_v23 }
 0x73d   :  { %v3320_v4 = vmul.f32 %v4462_v52, %v3319_v17 }
 0x73f   :  { %v3321_v58 = vmul.f32 0.5, %v3320_v4  ;;  %v3112_v27 = vpop.xlane.xlu2 %3111 }
 0x740   :  { %v3135_v63 = vmul.f32 %v6916_v44, %v3112_v27 }
 0x741   :  { %v3322_v62 = vsub.f32 1.5, %v3321_v58 }
 0x742   :  { %v7137_v20 = vsub.f32 %v7045_v34, %v3135_v63  ;;  %v4464_v46 = vpop.eup %4463 }
 0x743   :  { %v3323_v49 = vmul.f32 %v4462_v52, %v3322_v62  ;;  %v3329_v25 = vmul.f32 %v4464_v46, %v3240_v23  ;;  %vm3335_vm15 = vweird.f32 %v4464_v46 }
 0x744   :  { %v3167_v28 = vmul.f32 %v7137_v20, %v7137_v20  ;;  %vm3336_vm2 = vmor %vm3334_vm1, %vm3335_vm15 }
 0x745   :  { %v3327_v3 = vsel %vm3326_vm14, %v4462_v52, %v3323_v49  ;;  %v3330_v12 = vmul.f32 %v4464_v46, %v3329_v25 }
 0x746   :  { %v3415_v9 = vmul.f32 %v3327_v3, %v7031_v51  ;;  %v3213_v19 = vsel %vm1491_vm0, %v3167_v28, 0.0  ;;  %v7158_v51 = vld [vmem:[%s7286_s11] ss:$0 sm:$0xff] }
 0x747   :  { %3214 = vadd.xlane.f32.xlu2 %v3213_v19  ;;  %v3331_v17 = vmul.f32 0.5, %v3330_v12 }
 0x748   :  { %v3435_v60 = vmul.f32 %v7050_v21, %v3415_v9 }
 0x749   :  { %v3332_v39 = vsub.f32 1.5, %v3331_v17 }
 0x74a   :  { %v3455_v33 = vadd.f32 %v7056_v14, %v3435_v60 }
 0x74b   :  { %v3333_v63 = vmul.f32 %v4464_v46, %v3332_v39 }
 0x74c   :  { %v3467_v41 = vpack.c.bf16 %v3455_v33, %v3454_v55 }
 0x74d   :  { %v3337_v49 = vsel %vm3336_vm2, %v4464_v46, %v3333_v63 }
 0x74e   :  { %3999 = vmatmul.msk.bf16.gmra.mxu3 %vm1491_vm0, %v3467_v41  ;;  %v3416_v19 = vmul.f32 %v3337_v49, %v7038_v16 }
 0x756   :  { %v3541_v30 = vpop.f32.mrf.mxu3 }
 0x757   :  { %v3542_v13 = vadd.f32 %v7158_v51, %v3541_v30  ;;  %v3436_v30 = vmul.f32 %v7050_v21, %v3416_v19 }
 0x759   :  { %v3581_v7 = vmax.f32 %v3542_v13, 0.0  ;;  %v3456_v46 = vadd.f32 %v7056_v14, %v3436_v30 }
 0x75e   :  { %v3543_v43 = vpop.f32.mrf.mxu3 }
 0x75f   :  { %v3544_v26 = vadd.f32 %v7158_v51, %v3543_v43 }
 0x761   :  { %v3582_v42 = vmax.f32 %v3544_v26, 0.0 }
 0x763   :  { %v3597_v32 = vpack.c.bf16 %v3582_v42, %v3581_v7 }
 0x765   :  { %4020 = vmatmul.msk.bf16.vlgmr.msrb.gmra.mxu0 %vm1491_vm0, %v3597_v32 }
 0x769   :  { %v3197_v31 = vpop.xlane.xlu1 %3196 }
 0x76a   :  { %v3225_v52 = vmul.f32 %v3197_v31, %v6916_v44 }
 0x76c   :  { %v3241_v50 = vadd.f32 1e-05, %v3225_v52 }
 0x76e   :  { %4465 = vrsqrt.f32 %v3241_v50  ;;  %vm3344_vm4 = vweird.f32 %v3241_v50 }
 0x771   :  { %v3200_v4 = vpop.xlane.xlu1 %3199 }
 0x772   :  { %v3226_v37 = vmul.f32 %v3200_v4, %v6916_v44 }
 0x774   :  { %v4466_v58 = vpop.eup %4465  ;;  %v3242_v27 = vadd.f32 1e-05, %v3226_v37 }
 0x775   :  { %v3339_v62 = vmul.f32 %v4466_v58, %v3241_v50  ;;  %vm3345_vm3 = vweird.f32 %v4466_v58 }
 0x776   :  { %4467 = vrsqrt.f32 %v3242_v27  ;;  %vm3346_vm5 = vmor %vm3344_vm4, %vm3345_vm3  ;;  %vm3354_vm7 = vweird.f32 %v3242_v27 }
 0x777   :  { %v3340_v54 = vmul.f32 %v4466_v58, %v3339_v62 }
 0x779   :  { %v3341_v47 = vmul.f32 0.5, %v3340_v54  ;;  %v3203_v28 = vpop.xlane.xlu0 %3202 }
 0x77a   :  { %v3227_v3 = vmul.f32 %v3203_v28, %v6916_v44 }
 0x77b   :  { %v3342_v45 = vsub.f32 1.5, %v3341_v47 }
 0x77c   :  { %v4468_v9 = vpop.eup %4467  ;;  %v3243_v6 = vadd.f32 1e-05, %v3227_v3 }
 0x77d   :  { %v3343_v60 = vmul.f32 %v4466_v58, %v3342_v45  ;;  %v3349_v55 = vmul.f32 %v4468_v9, %v3242_v27  ;;  %vm3355_vm6 = vweird.f32 %v4468_v9 }
 0x77e   :  { %4469 = vrsqrt.f32 %v3243_v6  ;;  %vm3356_vm8 = vmor %vm3354_vm7, %vm3355_vm6  ;;  %vm3364_vm10 = vweird.f32 %v3243_v6 }
 0x77f   :  { %v3347_v33 = vsel %vm3346_vm5, %v4466_v58, %v3343_v60  ;;  %v3350_v41 = vmul.f32 %v4468_v9, %v3349_v55 }
 0x780   :  { %v3417_v40 = vmul.f32 %v3347_v33, %v7070_v38 }
 0x781   :  { %v3351_v23 = vmul.f32 0.5, %v3350_v41  ;;  %v3206_v13 = vpop.xlane.xlu2 %3205 }
 0x782   :  { %v3228_v43 = vmul.f32 %v3206_v13, %v6916_v44  ;;  %v3437_v26 = vmul.f32 %v7050_v21, %v3417_v40 }
 0x783   :  { %v3352_v7 = vsub.f32 1.5, %v3351_v23 }
 0x784   :  { %v4470_v16 = vpop.eup %4469  ;;  %v3244_v42 = vadd.f32 1e-05, %v3228_v43  ;;  %v3457_v32 = vadd.f32 %v7056_v14, %v3437_v26 }
 0x785   :  { %v3353_v25 = vmul.f32 %v4468_v9, %v3352_v7  ;;  %v3359_v12 = vmul.f32 %v4470_v16, %v3243_v6  ;;  %vm3365_vm9 = vweird.f32 %v4470_v16 }
 0x786   :  { %4471 = vrsqrt.f32 %v3244_v42  ;;  %v3468_v38 = vpack.c.bf16 %v3457_v32, %v3456_v46  ;;  %vm3366_vm11 = vmor %vm3364_vm10, %vm3365_vm9  ;;  %vm3374_vm13 = vweird.f32 %v3244_v42 }
 0x787   :  { %v3360_v31 = vmul.f32 %v4470_v16, %v3359_v12  ;;  %v3357_v52 = vsel %vm3356_vm8, %v4468_v9, %v3353_v25 }
 0x788   :  { %4000 = vmatmul.msk.bf16.gmra.mxu3 %vm1491_vm0, %v3468_v38  ;;  %v3418_v58 = vmul.f32 %v3357_v52, %v7078_v24 }
 0x789   :  { %v3361_v50 = vmul.f32 0.5, %v3360_v31  ;;  %v3209_v17 = vpop.xlane.xlu1 %3208 }
 0x78a   :  { %v3229_v39 = vmul.f32 %v3209_v17, %v6916_v44  ;;  %v3438_v3 = vmul.f32 %v7050_v21, %v3418_v58 }
 0x78b   :  { %v3362_v4 = vsub.f32 1.5, %v3361_v50 }
 0x78c   :  { %v4472_v37 = vpop.eup %4471  ;;  %v3245_v63 = vadd.f32 1e-05, %v3229_v39  ;;  %v3458_v24 = vadd.f32 %v7056_v14, %v3438_v3 }
 0x78d   :  { %v3363_v62 = vmul.f32 %v4470_v16, %v3362_v4  ;;  %v3369_v54 = vmul.f32 %v4472_v37, %v3244_v42  ;;  %vm3375_vm12 = vweird.f32 %v4472_v37 }
 0x78e   :  { %4473 = vrsqrt.f32 %v3245_v63  ;;  %vm3376_vm14 = vmor %vm3374_vm13, %vm3375_vm12  ;;  %vm3384_vm1 = vweird.f32 %v3245_v63 }
 0x78f   :  { %v3367_v27 = vsel %vm3366_vm11, %v4470_v16, %v3363_v62  ;;  %v3370_v49 = vmul.f32 %v4472_v37, %v3369_v54 }
 0x790   :  { %v3419_v47 = vmul.f32 %v3367_v27, %v7087_v18  ;;  %v3546_v28 = vpop.f32.mrf.mxu3 }
 0x791   :  { %v3371_v45 = vmul.f32 0.5, %v3370_v49  ;;  %v3547_v18 = vadd.f32 %v7158_v51, %v3546_v28  ;;  %v3212_v52 = vpop.xlane.xlu0 %3211 }
 0x792   :  { %v3439_v9 = vmul.f32 %v7050_v21, %v3419_v47 }
 0x793   :  { %v3372_v19 = vsub.f32 1.5, %v3371_v45  ;;  %v3583_v7 = vmax.f32 %v3547_v18, 0.0 }
 0x794   :  { %v4474_v60 = vpop.eup %4473  ;;  %v3459_v55 = vadd.f32 %v7056_v14, %v3439_v9 }
 0x795   :  { %v3373_v6 = vmul.f32 %v4472_v37, %v3372_v19  ;;  %v3379_v33 = vmul.f32 %v4474_v60, %v3245_v63  ;;  %vm3385_vm15 = vweird.f32 %v4474_v60 }
 0x796   :  { %v3469_v41 = vpack.c.bf16 %v3459_v55, %v3458_v24  ;;  %vm3386_vm2 = vmor %vm3384_vm1, %vm3385_vm15 }
 0x797   :  { %v3380_v40 = vmul.f32 %v4474_v60, %v3379_v33  ;;  %v3377_v23 = vsel %vm3376_vm14, %v4472_v37, %v3373_v6 }
 0x798   :  { %v3548_v30 = vpop.f32.mrf.mxu3  ;;  %4001 = vmatmul.msk.bf16.gmra.mxu3 %vm1491_vm0, %v3469_v41  ;;  %v3420_v46 = vmul.f32 %v3377_v23, %v7097_v48  ;;  %v3230_v48 = vmul.f32 %v3212_v52, %v6916_v44 }
 0x799   :  { %v3381_v13 = vmul.f32 0.5, %v3380_v40  ;;  %v3549_v43 = vadd.f32 %v7158_v51, %v3548_v30 }
 0x79a   :  { %v3440_v31 = vmul.f32 %v7050_v21, %v3420_v46  ;;  %v3246_v63 = vadd.f32 1e-05, %v3230_v48 }
 0x79b   :  { %v3382_v26 = vsub.f32 1.5, %v3381_v13  ;;  %v3584_v16 = vmax.f32 %v3549_v43, 0.0 }
 0x79c   :  { %v3460_v17 = vadd.f32 %v7056_v14, %v3440_v31  ;;  %4475 = vrsqrt.f32 %v3246_v63  ;;  %vm3394_vm4 = vweird.f32 %v3246_v63  ;;  %v7209_v31 = vld [vmem:[%s7288_s13] ss:$0 sm:$0xff]  ;;  %s4508_s13 = smov [#allocation2]  }
 0x79d   :  { %v3383_v32 = vmul.f32 %v4474_v60, %v3382_v26  ;;  %v3598_v42 = vpack.c.bf16 %v3584_v16, %v3583_v7  ;;  %s3750_s5 = sshll.u32 %s4508_s13, 4  ;;  %s3751_s5 = int_to_ptr.vmem [resolvable:$true] %s3750_s5 }
 0x79f   :  { %v3387_v25 = vsel %vm3386_vm2, %v4474_v60, %v3383_v32  ;;  %4021 = vmatmul.msk.bf16.gmra.mxu0 %vm1491_vm0, %v3598_v42 }
 0x7a0   :  { %v3421_v12 = vmul.f32 %v3387_v25, %v7108_v10  ;;  %v3551_v38 = vpop.f32.mrf.mxu3 }
 0x7a1   :  { %v3552_v37 = vadd.f32 %v7158_v51, %v3551_v38 }
 0x7a2   :  { %v3441_v50 = vmul.f32 %v7050_v21, %v3421_v12  ;;  %v4476_v49 = vpop.eup %4475 }
 0x7a3   :  { %v3585_v62 = vmax.f32 %v3552_v37, 0.0  ;;  %v3389_v47 = vmul.f32 %v4476_v49, %v3246_v63  ;;  %vm3395_vm3 = vweird.f32 %v4476_v49 }
 0x7a4   :  { %v3461_v39 = vadd.f32 %v7056_v14, %v3441_v50  ;;  %vm3396_vm5 = vmor %vm3394_vm4, %vm3395_vm3 }
 0x7a5   :  { %v3390_v28 = vmul.f32 %v4476_v49, %v3389_v47 }
 0x7a6   :  { %v3470_v4 = vpack.c.bf16 %v3461_v39, %v3460_v17 }
 0x7a7   :  { %v3391_v19 = vmul.f32 0.5, %v3390_v28 }
 0x7a8   :  { %v3553_v58 = vpop.f32.mrf.mxu3  ;;  %4002 = vmatmul.msk.bf16.gmra.mxu3 %vm1491_vm0, %v3470_v4 }
 0x7a9   :  { %v3554_v10 = vadd.f32 %v7158_v51, %v3553_v58  ;;  %v3392_v60 = vsub.f32 1.5, %v3391_v19 }
 0x7ab   :  { %v3586_v54 = vmax.f32 %v3554_v10, 0.0  ;;  %v3393_v55 = vmul.f32 %v4476_v49, %v3392_v60 }
 0x7ad   :  { %v3599_v27 = vpack.c.bf16 %v3586_v54, %v3585_v62  ;;  %v3397_v41 = vsel %vm3396_vm5, %v4476_v49, %v3393_v55 }
 0x7ae   :  { %v3422_v30 = vmul.f32 %v3397_v41, %v7118_v2 }
 0x7af   :  { %4022 = vmatmul.msk.bf16.gmra.mxu0 %vm1491_vm0, %v3599_v27 }
 0x7b0   :  { %v3442_v26 = vmul.f32 %v7050_v21, %v3422_v30 }
 0x7b2   :  { %v3462_v16 = vadd.f32 %v7056_v14, %v3442_v26 }
 0x7ba   :  { %v3215_v3 = vpop.xlane.xlu2 %3214 }
 0x7bb   :  { %v3231_v45 = vmul.f32 %v3215_v3, %v6916_v44 }
 0x7bd   :  { %v3247_v9 = vadd.f32 1e-05, %v3231_v45 }
 0x7bf   :  { %4477 = vrsqrt.f32 %v3247_v9  ;;  %vm3404_vm7 = vweird.f32 %v3247_v9 }
 0x7c5   :  { %v4478_v24 = vpop.eup %4477 }
 0x7c6   :  { %v3399_v6 = vmul.f32 %v4478_v24, %v3247_v9  ;;  %vm3405_vm6 = vweird.f32 %v4478_v24 }
 0x7c7   :  { %vm3406_vm8 = vmor %vm3404_vm7, %vm3405_vm6 }
 0x7c8   :  { %v3400_v33 = vmul.f32 %v4478_v24, %v3399_v6 }
 0x7ca   :  { %v3401_v40 = vmul.f32 0.5, %v3400_v33 }
 0x7cc   :  { %v3402_v18 = vsub.f32 1.5, %v3401_v40 }
 0x7ce   :  { %v3403_v23 = vmul.f32 %v4478_v24, %v3402_v18 }
 0x7d0   :  { %v3407_v44 = vsel %vm3406_vm8, %v4478_v24, %v3403_v23 }
 0x7d1   :  { %v3423_v13 = vmul.f32 %v3407_v44, %v7137_v20  ;;  %v3556_v43 = vpop.f32.mrf.mxu3 }
 0x7d2   :  { %v3557_v42 = vadd.f32 %v7158_v51, %v3556_v43 }
 0x7d3   :  { %v3443_v7 = vmul.f32 %v7050_v21, %v3423_v13 }
 0x7d4   :  { %v3587_v12 = vmax.f32 %v3557_v42, 0.0 }
 0x7d5   :  { %v3463_v46 = vadd.f32 %v7056_v14, %v3443_v7 }
 0x7d7   :  { %v3471_v32 = vpack.c.bf16 %v3463_v46, %v3462_v16 }
 0x7d9   :  { %v3558_v25 = vpop.f32.mrf.mxu3  ;;  %4003 = vmatmul.msk.bf16.gmra.mxu3 %vm1491_vm0, %v3471_v32 }
 0x7da   :  { %v3559_v2 = vadd.f32 %v7158_v51, %v3558_v25 }
 0x7dc   :  { %v3588_v38 = vmax.f32 %v3559_v2, 0.0 }
 0x7de   :  { %v3600_v20 = vpack.c.bf16 %v3588_v38, %v3587_v12 }
 0x7e0   :  { %4023 = vmatmul.msk.bf16.gmra.mxu0 %vm1491_vm0, %v3600_v20 }
 0x7e2   :  { %v3674_v21 = vpop.f32.mrf.mxu0 }
 0x7e3   :  { %v3675_v14 = vadd.f32 %v7209_v31, %v3674_v21 }
 0x7e5   :  { %v3714_v52 = vadd.f32 %v3675_v14, %v6872_v56 }
 0x7e7   :  { %3730 = vst.msk [vmem:[#allocation2] sm:$0xff] %vm1491_vm0, %v3714_v52 }
 0x7ea   :  { %v3676_v50 = vpop.f32.mrf.mxu0 }
 0x7eb   :  { %v3677_v17 = vadd.f32 %v7209_v31, %v3676_v50 }
 0x7ed   :  { %v3715_v39 = vadd.f32 %v3677_v17, %v6880_v57 }
 0x7ef   :  { %3731 = vst.msk [vmem:[#allocation2 + $0x8] sm:$0xff] %vm1491_vm0, %v3715_v39 }
 0x80b   :  { %v3561_v48 = vpop.f32.mrf.mxu3 }
 0x80c   :  { %v3562_v4 = vadd.f32 %v7158_v51, %v3561_v48 }
 0x80e   :  { %v3589_v63 = vmax.f32 %v3562_v4, 0.0 }
 0x813   :  { %v3563_v37 = vpop.f32.mrf.mxu3 }
 0x814   :  { %v3564_v58 = vadd.f32 %v7158_v51, %v3563_v37 }
 0x816   :  { %v3590_v10 = vmax.f32 %v3564_v58, 0.0 }
 0x818   :  { %v3601_v62 = vpack.c.bf16 %v3590_v10, %v3589_v63 }
 0x81a   :  { %4024 = vmatmul.msk.bf16.gmra.mxu0 %vm1491_vm0, %v3601_v62 }
 0x81b   :  { %v3566_v56 = vpop.f32.mrf.mxu3 }
 0x81c   :  { %v3679_v54 = vpop.f32.mrf.mxu0  ;;  %v3567_v57 = vadd.f32 %v7158_v51, %v3566_v56 }
 0x81d   :  { %v3680_v27 = vadd.f32 %v7209_v31, %v3679_v54 }
 0x81e   :  { %v3591_v9 = vmax.f32 %v3567_v57, 0.0 }
 0x81f   :  { %v3716_v49 = vadd.f32 %v3680_v27, %v6888_v53 }
 0x821   :  { %3732 = vst.msk [vmem:[#allocation2 + $0x10] sm:$0xff] %vm1491_vm0, %v3716_v49 }
 0x823   :  { %v3568_v47 = vpop.f32.mrf.mxu3 }
 0x824   :  { %v3569_v28 = vadd.f32 %v7158_v51, %v3568_v47  ;;  %v3681_v3 = vpop.f32.mrf.mxu0 }
 0x825   :  { %v3682_v45 = vadd.f32 %v7209_v31, %v3681_v3 }
 0x826   :  { %v3592_v19 = vmax.f32 %v3569_v28, 0.0 }
 0x827   :  { %v3717_v60 = vadd.f32 %v3682_v45, %v6894_v1 }
 0x828   :  { %v3602_v24 = vpack.c.bf16 %v3592_v19, %v3591_v9 }
 0x829   :  { %3733 = vst.msk [vmem:[#allocation2 + $0x18] sm:$0xff] %vm1491_vm0, %v3717_v60 }
 0x82a   :  { %4025 = vmatmul.msk.bf16.gmra.mxu0 %vm1491_vm0, %v3602_v24 }
 0x82b   :  { %v3571_v53 = vpop.f32.mrf.mxu3 }
 0x82c   :  { %v3684_v55 = vpop.f32.mrf.mxu0  ;;  %v3572_v41 = vadd.f32 %v7158_v51, %v3571_v53 }
 0x82d   :  { %v3685_v6 = vadd.f32 %v7209_v31, %v3684_v55 }
 0x82e   :  { %v3593_v23 = vmax.f32 %v3572_v41, 0.0 }
 0x82f   :  { %v3718_v33 = vadd.f32 %v3685_v6, %v6900_v59 }
 0x831   :  { %3734 = vst.msk [vmem:[#allocation2 + $0x20] sm:$0xff] %vm1491_vm0, %v3718_v33 }
 0x833   :  { %v3573_v40 = vpop.f32.mrf.mxu3 }
 0x834   :  { %v3574_v18 = vadd.f32 %v7158_v51, %v3573_v40  ;;  %v3686_v30 = vpop.f32.mrf.mxu0 }
 0x835   :  { %v3687_v1 = vadd.f32 %v7209_v31, %v3686_v30 }
 0x836   :  { %v3594_v44 = vmax.f32 %v3574_v18, 0.0 }
 0x837   :  { %v3719_v13 = vadd.f32 %v3687_v1, %v6906_v22 }
 0x838   :  { %v3603_v43 = vpack.c.bf16 %v3594_v44, %v3593_v23 }
 0x839   :  { %3735 = vst.msk [vmem:[#allocation2 + $0x28] sm:$0xff] %vm1491_vm0, %v3719_v13 }
 0x83a   :  { %4026 = vmatmul.msk.bf16.gmra.mxu0 %vm1491_vm0, %v3603_v43 }
 0x85c   :  { %v3576_v59 = vpop.f32.mrf.mxu3 }
 0x85d   :  { %v3689_v26 = vpop.f32.mrf.mxu0  ;;  %v3577_v46 = vadd.f32 %v7158_v51, %v3576_v59 }
 0x85e   :  { %v3690_v7 = vadd.f32 %v7209_v31, %v3689_v26 }
 0x85f   :  { %v3595_v2 = vmax.f32 %v3577_v46, 0.0 }
 0x860   :  { %v3720_v16 = vadd.f32 %v3690_v7, %v6912_v35 }
 0x862   :  { %3736 = vst.msk [vmem:[#allocation2 + $0x30] sm:$0xff] %vm1491_vm0, %v3720_v16 }
 0x864   :  { %v3578_v32 = vpop.f32.mrf.mxu3 }
 0x865   :  { %v3579_v42 = vadd.f32 %v7158_v51, %v3578_v32  ;;  %v3691_v25 = vpop.f32.mrf.mxu0 }
 0x866   :  { %v3692_v22 = vadd.f32 %v7209_v31, %v3691_v25 }
 0x867   :  { %v3596_v12 = vmax.f32 %v3579_v42, 0.0 }
 0x868   :  { %v3721_v38 = vadd.f32 %v3692_v22, %v6928_v5 }
 0x869   :  { %v3604_v20 = vpack.c.bf16 %v3596_v12, %v3595_v2 }
 0x86a   :  { %3737 = vst.msk [vmem:[#allocation2 + $0x38] sm:$0xff] %vm1491_vm0, %v3721_v38 }
 0x86b   :  { %4027 = vmatmul.msk.bf16.gmra.mxu0 %vm1491_vm0, %v3604_v20 }
 0x897   :  { %v3694_v35 = vpop.f32.mrf.mxu0 }
 0x898   :  { %v3695_v21 = vadd.f32 %v7209_v31, %v3694_v35 }
 0x89a   :  { %v3722_v14 = vadd.f32 %v3695_v21, %v6940_v0 }
 0x89c   :  { %3738 = vst.msk [vmem:[#allocation2 + $0x40] sm:$0xff] %vm1491_vm0, %v3722_v14 }
 0x89f   :  { %v3696_v51 = vpop.f32.mrf.mxu0 }
 0x8a0   :  { %v3697_v52 = vadd.f32 %v7209_v31, %v3696_v51 }
 0x8a2   :  { %v3723_v50 = vadd.f32 %v3697_v52, %v6954_v11 }
 0x8a4   :  { %3739 = vst.msk [vmem:[#allocation2 + $0x48] sm:$0xff] %vm1491_vm0, %v3723_v50 }
 0x8a7   :  { %v3699_v5 = vpop.f32.mrf.mxu0 }
 0x8a8   :  { %v3700_v17 = vadd.f32 %v7209_v31, %v3699_v5 }
 0x8aa   :  { %v3724_v39 = vadd.f32 %v3700_v17, %v6967_v8 }
 0x8ac   :  { %3740 = vst.msk [vmem:[#allocation2 + $0x50] sm:$0xff] %vm1491_vm0, %v3724_v39 }
 0x8af   :  { %v3701_v48 = vpop.f32.mrf.mxu0 }
 0x8b0   :  { %v3702_v4 = vadd.f32 %v7209_v31, %v3701_v48 }
 0x8b2   :  { %v3725_v0 = vadd.f32 %v3702_v4, %v6980_v61 }
 0x8b4   :  { %3741 = vst.msk [vmem:[#allocation2 + $0x58] sm:$0xff] %vm1491_vm0, %v3725_v0 }
 0x8b7   :  { %v3704_v37 = vpop.f32.mrf.mxu0 }
 0x8b8   :  { %v3705_v58 = vadd.f32 %v7209_v31, %v3704_v37 }
 0x8ba   :  { %v3726_v11 = vadd.f32 %v3705_v58, %v6993_v29 }
 0x8bc   :  { %3742 = vst.msk [vmem:[#allocation2 + $0x60] sm:$0xff] %vm1491_vm0, %v3726_v11 }
 0x8bf   :  { %v3706_v63 = vpop.f32.mrf.mxu0 }
 0x8c0   :  { %v3707_v10 = vadd.f32 %v7209_v31, %v3706_v63 }
 0x8c2   :  { %v3727_v8 = vadd.f32 %v3707_v10, %v7005_v36 }
 0x8c4   :  { %3743 = vst.msk [vmem:[#allocation2 + $0x68] sm:$0xff] %vm1491_vm0, %v3727_v8 }
 0x8e8   :  { %v3709_v62 = vpop.f32.mrf.mxu0 }
 0x8e9   :  { %v3710_v56 = vadd.f32 %v7209_v31, %v3709_v62 }
 0x8eb   :  { %v3728_v61 = vadd.f32 %v3710_v56, %v7011_v15 }
 0x8ed   :  { %3744 = vst.msk [vmem:[#allocation2 + $0x70] sm:$0xff] %vm1491_vm0, %v3728_v61 }
 0x8f0   :  { %v3711_v29 = vpop.f32.mrf.mxu0 }
 0x8f1   :  { %v3712_v54 = vadd.f32 %v7209_v31, %v3711_v29 }
 0x8f3   :  { %v3729_v36 = vadd.f32 %v3712_v54, %v7045_v34 }
 0x8f5   :  { %3745 = vst.msk [vmem:[#allocation2 + $0x78] sm:$0xff] %vm1491_vm0, %v3729_v36 }
 0x8f6   :  { %3758 = dma.vmem_to_hbm [thread:$0]  %s3751_s5, 2048, %s3753_s6, [#allocation3], %s4509_s26, %s4509_s26, %s4510_s7  }
 0x8f7   :  { %4503 = dma.done.wait [#allocation3], 2048  }
 0x8f8   :  { %4504 = vsyncadd [#allocation3], 4294965248 }
 0x8f9   :  { %3763 = vsyncpa [#allocation3], 1 }

</bundles_post_ra>
